<compile_context>
chip_gen: v7x
topology: tpu7x:2x2x1
jax: 0.10.0
libtpu: 0.0.40
codegen_flags: <defaults>
</compile_context>

<pallas_src>
import functools

import jax
import jax.numpy as jnp
from jax.experimental import pallas as pl
from jax.experimental.pallas import tpu as pltpu

EPS = 1e-5          # nn.InstanceNorm3d default eps
NEG_SLOPE = 0.01    # nn.LeakyReLU default negative_slope


# ----------------------------- in-kernel helpers -----------------------------

def _leaky_relu(v):
    return jnp.where(v >= 0, v, NEG_SLOPE * v)


def _masked_instance_norm(v, mask, count):
    # v: (C, Sp) f32, mask: (1, Sp) with 1.0 at valid output positions (count of them).
    # One-pass statistics over the valid positions only; normalization is applied to
    # every position (invalid ones are masked / discarded by the caller).
    vm = v * mask
    s1 = jnp.sum(vm, axis=-1, keepdims=True)
    s2 = jnp.sum(vm * vm, axis=-1, keepdims=True)
    inv_n = 1.0 / count
    mean = s1 * inv_n
    var = s2 * inv_n - mean * mean
    return (v - mean) * jax.lax.rsqrt(var + EPS)


# --------------------------------- kernel ------------------------------------

def fused_res_block_kernel(m1_ref, m2_ref, x_ref, w1_ref, w2_ref, ws_ref,
                           y_ref, p1_ref, hext_ref, p2_ref,
                           *, Sp, EXT, S, So, tap_starts):
    """Per batch element, channels x flattened-padded-spatial layout (spatial on lanes):

       conv1  = (Cmid, 27*Cin) @ (27*Cin, Sp)   [bf16 MXU, f32 acc]
       IN -> Dropout(identity) -> LeakyReLU -> h (stays in VMEM)
       conv2  = (Cout, 27*Cmid) @ (27*Cmid, Sp) [bf16 MXU, f32 acc]
       short  = (Cout, Cin) @ (Cin, Sp)         [f32]
       LeakyReLU(IN(conv2) + IN(short)) -> y
    """
    cin = x_ref.shape[1]
    cmid = hext_ref.shape[0]

    m1 = m1_ref[...]            # (1, Sp) interior mask (stride 1)
    m2 = m2_ref[...]            # (1, Sp) strided-interior mask

    # ---- conv1: in-kernel im2col (27 static lane windows) + single GEMM ----
    for t, st in enumerate(tap_starts):
        p1_ref[t * cin:(t + 1) * cin, :] = x_ref[0, :, st:st + Sp]
    acc1 = jnp.dot(w1_ref[...], p1_ref[...].astype(jnp.bfloat16),
                   preferred_element_type=jnp.float32)                 # (Cmid, Sp)

    h = _leaky_relu(_masked_instance_norm(acc1, m1, S)) * m1           # zero halo

    # stage h into the zero-extended scratch so conv2 taps are plain lane windows
    edge = jnp.zeros((cmid, EXT), jnp.float32)
    hext_ref[:, 0:EXT] = edge
    hext_ref[:, EXT + Sp:EXT + Sp + EXT] = edge
    hext_ref[:, EXT:EXT + Sp] = h

    # ---- conv2: in-kernel im2col + single GEMM ----
    for t, st in enumerate(tap_starts):
        p2_ref[t * cmid:(t + 1) * cmid, :] = hext_ref[:, st:st + Sp]
    acc2 = jnp.dot(w2_ref[...], p2_ref[...].astype(jnp.bfloat16),
                   preferred_element_type=jnp.float32)                 # (Cout, Sp)

    # ---- 1x1 shortcut conv (K = Cin is tiny -> keep f32) ----
    xs = x_ref[0, :, EXT:EXT + Sp]                                     # (Cin, Sp)
    accs = jnp.dot(ws_ref[...], xs, preferred_element_type=jnp.float32)

    out = _leaky_relu(_masked_instance_norm(acc2, m2, So)
                      + _masked_instance_norm(accs, m2, So))
    y_ref[0] = out


# --------------------------------- wrapper ------------------------------------

def res_two_layer_conv_block(x_ncdhw, w1, w2, ws, stride=1):
    """x_ncdhw: (B, Cin, D, H, W) f32.  PyTorch weight layouts:
       w1: (Cmid, Cin, 3,3,3)  w2: (Cout, Cmid, 3,3,3)  ws: (Cout, Cin, 1,1,1)."""
    B, Cin, D, H, W = x_ncdhw.shape
    Cmid, Cout = w1.shape[0], w2.shape[0]

    Dp, Hp, Wp = D + 2, H + 2, W + 2
    Sp = Dp * Hp * Wp                       # flattened padded spatial size
    R = Hp * Wp + Wp + 1                    # max |flat offset| of a 3x3x3 tap
    EXT = -(-R // 128) * 128                # lane-aligned extension (>= R)
    SpE = Sp + 2 * EXT
    Do = (D - 1) // stride + 1
    Ho = (H - 1) // stride + 1
    Wo = (W - 1) // stride + 1
    S, So = D * H * W, Do * Ho * Wo

    x = x_ncdhw.astype(jnp.float32)
    # conv padding=1, flatten spatial, then extend lanes so every tap is a static window
    xp = jnp.pad(x, ((0, 0), (0, 0), (1, 1), (1, 1), (1, 1))).reshape(B, Cin, Sp)
    xe = jnp.pad(xp, ((0, 0), (0, 0), (EXT, EXT)))                     # (B, Cin, SpE)

    def vol_mask(st):
        def axis_mask(n, npad):
            return jnp.zeros((npad,), jnp.float32).at[1:1 + n:st].set(1.0)
        md, mh, mw = axis_mask(D, Dp), axis_mask(H, Hp), axis_mask(W, Wp)
        return (md[:, None, None] * mh[None, :, None] * mw[None, None, :]).reshape(1, Sp)

    m1 = vol_mask(1)            # valid positions of the stride-1 conv1
    m2 = vol_mask(stride)       # valid (strided) positions of conv2 / shortcut

    # weights -> im2col GEMM layout: column = tap*(in_channels) + c, tap = kd*9+kh*3+kw
    w1_t = jnp.transpose(w1, (0, 2, 3, 4, 1)).reshape(Cmid, 27 * Cin).astype(jnp.bfloat16)
    w2_t = jnp.transpose(w2, (0, 2, 3, 4, 1)).reshape(Cout, 27 * Cmid).astype(jnp.bfloat16)
    ws_t = ws.reshape(Cout, Cin).astype(jnp.float32)

    # window start of tap (kd,kh,kw) inside the EXT-extended flat array
    tap_starts = tuple(EXT - R + kd * Hp * Wp + kh * Wp + kw
                       for kd in range(3) for kh in range(3) for kw in range(3))

    kernel = functools.partial(fused_res_block_kernel, Sp=Sp, EXT=EXT, S=S, So=So,
                               tap_starts=tap_starts)

    y_flat = pl.pallas_call(
        kernel,
        out_shape=jax.ShapeDtypeStruct((B, Cout, Sp), jnp.float32),
        grid=(B,),
        in_specs=[
            pl.BlockSpec((1, Sp), lambda b: (0, 0)),                 # m1
            pl.BlockSpec((1, Sp), lambda b: (0, 0)),                 # m2
            pl.BlockSpec((1, Cin, SpE), lambda b: (b, 0, 0)),        # x (extended flat)
            pl.BlockSpec((Cmid, 27 * Cin), lambda b: (0, 0)),        # w1 (bf16)
            pl.BlockSpec((Cout, 27 * Cmid), lambda b: (0, 0)),       # w2 (bf16)
            pl.BlockSpec((Cout, Cin), lambda b: (0, 0)),             # ws
        ],
        out_specs=pl.BlockSpec((1, Cout, Sp), lambda b: (b, 0, 0)),
        scratch_shapes=[
            pltpu.VMEM((27 * Cin, Sp), jnp.float32),   # conv1 im2col patches
            pltpu.VMEM((Cmid, SpE), jnp.float32),      # zero-extended h
            pltpu.VMEM((27 * Cmid, Sp), jnp.float32),  # conv2 im2col patches
        ],
        compiler_params=pltpu.CompilerParams(dimension_semantics=("parallel",)),
    )(m1, m2, xe, w1_t, w2_t, ws_t)

    # gather (strided) interior positions -> output is already NCDHW (no transpose)
    y = y_flat.reshape(B, Cout, Dp, Hp, Wp)[
        :, :, 1:1 + D:stride, 1:1 + H:stride, 1:1 + W:stride]
    return y


# ------------------------------ pure-JAX reference -----------------------------

def _ref_inorm(v):  # v: (B, C, D, H, W)
    mean = jnp.mean(v, axis=(2, 3, 4), keepdims=True)
    var = jnp.mean((v - mean) ** 2, axis=(2, 3, 4), keepdims=True)
    return (v - mean) / jnp.sqrt(var + EPS)


def _ref_lrelu(v):
    return jnp.where(v >= 0, v, NEG_SLOPE * v)


def reference_forward(x, w1, w2, ws, stride=1):
    dims = ("NCDHW", "OIDHW", "NCDHW")
    dn1 = jax.lax.conv_dimension_numbers(x.shape, w1.shape, dims)
    c1 = jax.lax.conv_general_dilated(x, w1, (1, 1, 1), [(1, 1)] * 3,
                                      dimension_numbers=dn1)
    h = _ref_lrelu(_ref_inorm(c1))
    dn2 = jax.lax.conv_dimension_numbers(h.shape, w2.shape, dims)
    c2 = jax.lax.conv_general_dilated(h, w2, (stride,) * 3, [(1, 1)] * 3,
                                      dimension_numbers=dn2)
    dns = jax.lax.conv_dimension_numbers(x.shape, ws.shape, dims)
    s = jax.lax.conv_general_dilated(x, ws, (stride,) * 3, [(0, 0)] * 3,
                                     dimension_numbers=dns)
    return _ref_lrelu(_ref_inorm(c2) + _ref_inorm(s))


# ----------------------------------- main --------------------------------------

if __name__ == "__main__":
    B, Cin, Cmid, Cout = 2, 4, 8, 8
    D = H = W = 8

    key = jax.random.PRNGKey(0)
    kx, k1, k2, k3 = jax.random.split(key, 4)
    x = jax.random.normal(kx, (B, Cin, D, H, W), jnp.float32)
    w1 = jax.random.normal(k1, (Cmid, Cin, 3, 3, 3), jnp.float32) * 0.1
    w2 = jax.random.normal(k2, (Cout, Cmid, 3, 3, 3), jnp.float32) * 0.1
    ws = jax.random.normal(k3, (Cout, Cin, 1, 1, 1), jnp.float32) * 0.1

    for stride in (1, 2):
        fwd = jax.jit(functools.partial(res_two_layer_conv_block, stride=stride))
        ref = jax.jit(functools.partial(reference_forward, stride=stride))
        y = jax.block_until_ready(fwd(x, w1, w2, ws))
        y_ref = jax.block_until_ready(ref(x, w1, w2, ws))
        assert y.shape == y_ref.shape, (stride, y.shape, y_ref.shape)
        err = float(jnp.max(jnp.abs(y - y_ref)))
        # bf16 MXU operands (per perf review); IN-normalized outputs are O(1), so a
        # slightly loosened absolute tolerance is used.
        assert err < 5e-2, (stride, err)

    print("KERNEL_OK")
</pallas_src>

<mosaic_0001>
module attributes {stable_mosaic.version = 11 : i64} {
  func.func @fused_res_block_kernel(%arg0: i32, %arg1: memref<1x1000xf32, #tpu.memory_space<vmem>>, %arg2: memref<1x1000xf32, #tpu.memory_space<vmem>>, %arg3: memref<1x4x1256xf32, #tpu.memory_space<vmem>>, %arg4: memref<8x108xbf16, #tpu.memory_space<vmem>>, %arg5: memref<8x216xbf16, #tpu.memory_space<vmem>>, %arg6: memref<8x4xf32, #tpu.memory_space<vmem>>, %arg7: memref<1x8x1000xf32, #tpu.memory_space<vmem>>, %arg8: memref<108x1000xf32, #tpu.memory_space<vmem>>, %arg9: memref<8x1256xf32, #tpu.memory_space<vmem>>, %arg10: memref<216x1000xf32, #tpu.memory_space<vmem>>) attributes {dimension_semantics = [#tpu.dimension_semantics<parallel>], iteration_bounds = array<i64: 2>, scalar_prefetch = 0 : i64, scratch_operands = 3 : i64, tpu.core_type = #tpu.core_type<tc>, window_params = [{pipeline_mode = #tpu.pipeline_mode<synchronous>, transform_indices = @transform_0, window_bounds = array<i64: 1, 1000>}, {pipeline_mode = #tpu.pipeline_mode<synchronous>, transform_indices = @transform_1, window_bounds = array<i64: 1, 1000>}, {transform_indices = @transform_2, window_bounds = array<i64: 1, 4, 1256>}, {pipeline_mode = #tpu.pipeline_mode<synchronous>, transform_indices = @transform_3, window_bounds = array<i64: 8, 108>}, {pipeline_mode = #tpu.pipeline_mode<synchronous>, transform_indices = @transform_4, window_bounds = array<i64: 8, 216>}, {pipeline_mode = #tpu.pipeline_mode<synchronous>, transform_indices = @transform_5, window_bounds = array<i64: 8, 4>}, {transform_indices = @transform_6, window_bounds = array<i64: 1, 8, 1000>}]} {
    %c0 = arith.constant 0 : index
    %c0_0 = arith.constant 0 : index
    %0 = vector.load %arg1[%c0, %c0_0] : memref<1x1000xf32, #tpu.memory_space<vmem>>, vector<1x1000xf32>
    %c0_1 = arith.constant 0 : index
    %c0_2 = arith.constant 0 : index
    %1 = vector.load %arg2[%c0_1, %c0_2] : memref<1x1000xf32, #tpu.memory_space<vmem>>, vector<1x1000xf32>
    %c0_3 = arith.constant 0 : index
    %c0_4 = arith.constant 0 : index
    %c17 = arith.constant 17 : index
    %2 = vector.load %arg3[%c0_3, %c0_4, %c17] : memref<1x4x1256xf32, #tpu.memory_space<vmem>>, vector<1x4x1000xf32>
    %3 = vector.shape_cast %2 : vector<1x4x1000xf32> to vector<4x1000xf32>
    %c0_5 = arith.constant 0 : index
    %c0_6 = arith.constant 0 : index
    %4 = vector.load %arg8[%c0_5, %c0_6] : memref<108x1000xf32, #tpu.memory_space<vmem>>, vector<4x1000xf32>
    tpu.vector_store %arg8[%c0_5, %c0_6], %3 {strides = array<i32>} : memref<108x1000xf32, #tpu.memory_space<vmem>>, vector<4x1000xf32>,
    %c0_7 = arith.constant 0 : index
    %c0_8 = arith.constant 0 : index
    %c18 = arith.constant 18 : index
    %5 = vector.load %arg3[%c0_7, %c0_8, %c18] : memref<1x4x1256xf32, #tpu.memory_space<vmem>>, vector<1x4x1000xf32>
    %6 = vector.shape_cast %5 : vector<1x4x1000xf32> to vector<4x1000xf32>
    %c4 = arith.constant 4 : index
    %c0_9 = arith.constant 0 : index
    %7 = vector.load %arg8[%c4, %c0_9] : memref<108x1000xf32, #tpu.memory_space<vmem>>, vector<4x1000xf32>
    tpu.vector_store %arg8[%c4, %c0_9], %6 {strides = array<i32>} : memref<108x1000xf32, #tpu.memory_space<vmem>>, vector<4x1000xf32>,
    %c0_10 = arith.constant 0 : index
    %c0_11 = arith.constant 0 : index
    %c19 = arith.constant 19 : index
    %8 = vector.load %arg3[%c0_10, %c0_11, %c19] : memref<1x4x1256xf32, #tpu.memory_space<vmem>>, vector<1x4x1000xf32>
    %9 = vector.shape_cast %8 : vector<1x4x1000xf32> to vector<4x1000xf32>
    %c8 = arith.constant 8 : index
    %c0_12 = arith.constant 0 : index
    %10 = vector.load %arg8[%c8, %c0_12] : memref<108x1000xf32, #tpu.memory_space<vmem>>, vector<4x1000xf32>
    tpu.vector_store %arg8[%c8, %c0_12], %9 {strides = array<i32>} : memref<108x1000xf32, #tpu.memory_space<vmem>>, vector<4x1000xf32>,
    %c0_13 = arith.constant 0 : index
    %c0_14 = arith.constant 0 : index
    %c27 = arith.constant 27 : index
    %11 = vector.load %arg3[%c0_13, %c0_14, %c27] : memref<1x4x1256xf32, #tpu.memory_space<vmem>>, vector<1x4x1000xf32>
    %12 = vector.shape_cast %11 : vector<1x4x1000xf32> to vector<4x1000xf32>
    %c12 = arith.constant 12 : index
    %c0_15 = arith.constant 0 : index
    %13 = vector.load %arg8[%c12, %c0_15] : memref<108x1000xf32, #tpu.memory_space<vmem>>, vector<4x1000xf32>
    tpu.vector_store %arg8[%c12, %c0_15], %12 {strides = array<i32>} : memref<108x1000xf32, #tpu.memory_space<vmem>>, vector<4x1000xf32>,
    %c0_16 = arith.constant 0 : index
    %c0_17 = arith.constant 0 : index
    %c28 = arith.constant 28 : index
    %14 = vector.load %arg3[%c0_16, %c0_17, %c28] : memref<1x4x1256xf32, #tpu.memory_space<vmem>>, vector<1x4x1000xf32>
    %15 = vector.shape_cast %14 : vector<1x4x1000xf32> to vector<4x1000xf32>
    %c16 = arith.constant 16 : index
    %c0_18 = arith.constant 0 : index
    %16 = vector.load %arg8[%c16, %c0_18] : memref<108x1000xf32, #tpu.memory_space<vmem>>, vector<4x1000xf32>
    tpu.vector_store %arg8[%c16, %c0_18], %15 {strides = array<i32>} : memref<108x1000xf32, #tpu.memory_space<vmem>>, vector<4x1000xf32>,
    %c0_19 = arith.constant 0 : index
    %c0_20 = arith.constant 0 : index
    %c29 = arith.constant 29 : index
    %17 = vector.load %arg3[%c0_19, %c0_20, %c29] : memref<1x4x1256xf32, #tpu.memory_space<vmem>>, vector<1x4x1000xf32>
    %18 = vector.shape_cast %17 : vector<1x4x1000xf32> to vector<4x1000xf32>
    %c20 = arith.constant 20 : index
    %c0_21 = arith.constant 0 : index
    %19 = vector.load %arg8[%c20, %c0_21] : memref<108x1000xf32, #tpu.memory_space<vmem>>, vector<4x1000xf32>
    tpu.vector_store %arg8[%c20, %c0_21], %18 {strides = array<i32>} : memref<108x1000xf32, #tpu.memory_space<vmem>>, vector<4x1000xf32>,
    %c0_22 = arith.constant 0 : index
    %c0_23 = arith.constant 0 : index
    %c37 = arith.constant 37 : index
    %20 = vector.load %arg3[%c0_22, %c0_23, %c37] : memref<1x4x1256xf32, #tpu.memory_space<vmem>>, vector<1x4x1000xf32>
    %21 = vector.shape_cast %20 : vector<1x4x1000xf32> to vector<4x1000xf32>
    %c24 = arith.constant 24 : index
    %c0_24 = arith.constant 0 : index
    %22 = vector.load %arg8[%c24, %c0_24] : memref<108x1000xf32, #tpu.memory_space<vmem>>, vector<4x1000xf32>
    tpu.vector_store %arg8[%c24, %c0_24], %21 {strides = array<i32>} : memref<108x1000xf32, #tpu.memory_space<vmem>>, vector<4x1000xf32>,
    %c0_25 = arith.constant 0 : index
    %c0_26 = arith.constant 0 : index
    %c38 = arith.constant 38 : index
    %23 = vector.load %arg3[%c0_25, %c0_26, %c38] : memref<1x4x1256xf32, #tpu.memory_space<vmem>>, vector<1x4x1000xf32>
    %24 = vector.shape_cast %23 : vector<1x4x1000xf32> to vector<4x1000xf32>
    %c28_27 = arith.constant 28 : index
    %c0_28 = arith.constant 0 : index
    %25 = vector.load %arg8[%c28_27, %c0_28] : memref<108x1000xf32, #tpu.memory_space<vmem>>, vector<4x1000xf32>
    tpu.vector_store %arg8[%c28_27, %c0_28], %24 {strides = array<i32>} : memref<108x1000xf32, #tpu.memory_space<vmem>>, vector<4x1000xf32>,
    %c0_29 = arith.constant 0 : index
    %c0_30 = arith.constant 0 : index
    %c39 = arith.constant 39 : index
    %26 = vector.load %arg3[%c0_29, %c0_30, %c39] : memref<1x4x1256xf32, #tpu.memory_space<vmem>>, vector<1x4x1000xf32>
    %27 = vector.shape_cast %26 : vector<1x4x1000xf32> to vector<4x1000xf32>
    %c32 = arith.constant 32 : index
    %c0_31 = arith.constant 0 : index
    %28 = vector.load %arg8[%c32, %c0_31] : memref<108x1000xf32, #tpu.memory_space<vmem>>, vector<4x1000xf32>
    tpu.vector_store %arg8[%c32, %c0_31], %27 {strides = array<i32>} : memref<108x1000xf32, #tpu.memory_space<vmem>>, vector<4x1000xf32>,
    %c0_32 = arith.constant 0 : index
    %c0_33 = arith.constant 0 : index
    %c117 = arith.constant 117 : index
    %29 = vector.load %arg3[%c0_32, %c0_33, %c117] : memref<1x4x1256xf32, #tpu.memory_space<vmem>>, vector<1x4x1000xf32>
    %30 = vector.shape_cast %29 : vector<1x4x1000xf32> to vector<4x1000xf32>
    %c36 = arith.constant 36 : index
    %c0_34 = arith.constant 0 : index
    %31 = vector.load %arg8[%c36, %c0_34] : memref<108x1000xf32, #tpu.memory_space<vmem>>, vector<4x1000xf32>
    tpu.vector_store %arg8[%c36, %c0_34], %30 {strides = array<i32>} : memref<108x1000xf32, #tpu.memory_space<vmem>>, vector<4x1000xf32>,
    %c0_35 = arith.constant 0 : index
    %c0_36 = arith.constant 0 : index
    %c118 = arith.constant 118 : index
    %32 = vector.load %arg3[%c0_35, %c0_36, %c118] : memref<1x4x1256xf32, #tpu.memory_space<vmem>>, vector<1x4x1000xf32>
    %33 = vector.shape_cast %32 : vector<1x4x1000xf32> to vector<4x1000xf32>
    %c40 = arith.constant 40 : index
    %c0_37 = arith.constant 0 : index
    %34 = vector.load %arg8[%c40, %c0_37] : memref<108x1000xf32, #tpu.memory_space<vmem>>, vector<4x1000xf32>
    tpu.vector_store %arg8[%c40, %c0_37], %33 {strides = array<i32>} : memref<108x1000xf32, #tpu.memory_space<vmem>>, vector<4x1000xf32>,
    %c0_38 = arith.constant 0 : index
    %c0_39 = arith.constant 0 : index
    %c119 = arith.constant 119 : index
    %35 = vector.load %arg3[%c0_38, %c0_39, %c119] : memref<1x4x1256xf32, #tpu.memory_space<vmem>>, vector<1x4x1000xf32>
    %36 = vector.shape_cast %35 : vector<1x4x1000xf32> to vector<4x1000xf32>
    %c44 = arith.constant 44 : index
    %c0_40 = arith.constant 0 : index
    %37 = vector.load %arg8[%c44, %c0_40] : memref<108x1000xf32, #tpu.memory_space<vmem>>, vector<4x1000xf32>
    tpu.vector_store %arg8[%c44, %c0_40], %36 {strides = array<i32>} : memref<108x1000xf32, #tpu.memory_space<vmem>>, vector<4x1000xf32>,
    %c0_41 = arith.constant 0 : index
    %c0_42 = arith.constant 0 : index
    %c127 = arith.constant 127 : index
    %38 = vector.load %arg3[%c0_41, %c0_42, %c127] : memref<1x4x1256xf32, #tpu.memory_space<vmem>>, vector<1x4x1000xf32>
    %39 = vector.shape_cast %38 : vector<1x4x1000xf32> to vector<4x1000xf32>
    %c48 = arith.constant 48 : index
    %c0_43 = arith.constant 0 : index
    %40 = vector.load %arg8[%c48, %c0_43] : memref<108x1000xf32, #tpu.memory_space<vmem>>, vector<4x1000xf32>
    tpu.vector_store %arg8[%c48, %c0_43], %39 {strides = array<i32>} : memref<108x1000xf32, #tpu.memory_space<vmem>>, vector<4x1000xf32>,
    %c0_44 = arith.constant 0 : index
    %c0_45 = arith.constant 0 : index
    %c128 = arith.constant 128 : index
    %41 = vector.load %arg3[%c0_44, %c0_45, %c128] : memref<1x4x1256xf32, #tpu.memory_space<vmem>>, vector<1x4x1000xf32>
    %42 = vector.shape_cast %41 : vector<1x4x1000xf32> to vector<4x1000xf32>
    %c52 = arith.constant 52 : index
    %c0_46 = arith.constant 0 : index
    %43 = vector.load %arg8[%c52, %c0_46] : memref<108x1000xf32, #tpu.memory_space<vmem>>, vector<4x1000xf32>
    tpu.vector_store %arg8[%c52, %c0_46], %42 {strides = array<i32>} : memref<108x1000xf32, #tpu.memory_space<vmem>>, vector<4x1000xf32>,
    %c0_47 = arith.constant 0 : index
    %c0_48 = arith.constant 0 : index
    %c129 = arith.constant 129 : index
    %44 = vector.load %arg3[%c0_47, %c0_48, %c129] : memref<1x4x1256xf32, #tpu.memory_space<vmem>>, vector<1x4x1000xf32>
    %45 = vector.shape_cast %44 : vector<1x4x1000xf32> to vector<4x1000xf32>
    %c56 = arith.constant 56 : index
    %c0_49 = arith.constant 0 : index
    %46 = vector.load %arg8[%c56, %c0_49] : memref<108x1000xf32, #tpu.memory_space<vmem>>, vector<4x1000xf32>
    tpu.vector_store %arg8[%c56, %c0_49], %45 {strides = array<i32>} : memref<108x1000xf32, #tpu.memory_space<vmem>>, vector<4x1000xf32>,
    %c0_50 = arith.constant 0 : index
    %c0_51 = arith.constant 0 : index
    %c137 = arith.constant 137 : index
    %47 = vector.load %arg3[%c0_50, %c0_51, %c137] : memref<1x4x1256xf32, #tpu.memory_space<vmem>>, vector<1x4x1000xf32>
    %48 = vector.shape_cast %47 : vector<1x4x1000xf32> to vector<4x1000xf32>
    %c60 = arith.constant 60 : index
    %c0_52 = arith.constant 0 : index
    %49 = vector.load %arg8[%c60, %c0_52] : memref<108x1000xf32, #tpu.memory_space<vmem>>, vector<4x1000xf32>
    tpu.vector_store %arg8[%c60, %c0_52], %48 {strides = array<i32>} : memref<108x1000xf32, #tpu.memory_space<vmem>>, vector<4x1000xf32>,
    %c0_53 = arith.constant 0 : index
    %c0_54 = arith.constant 0 : index
    %c138 = arith.constant 138 : index
    %50 = vector.load %arg3[%c0_53, %c0_54, %c138] : memref<1x4x1256xf32, #tpu.memory_space<vmem>>, vector<1x4x1000xf32>
    %51 = vector.shape_cast %50 : vector<1x4x1000xf32> to vector<4x1000xf32>
    %c64 = arith.constant 64 : index
    %c0_55 = arith.constant 0 : index
    %52 = vector.load %arg8[%c64, %c0_55] : memref<108x1000xf32, #tpu.memory_space<vmem>>, vector<4x1000xf32>
    tpu.vector_store %arg8[%c64, %c0_55], %51 {strides = array<i32>} : memref<108x1000xf32, #tpu.memory_space<vmem>>, vector<4x1000xf32>,
    %c0_56 = arith.constant 0 : index
    %c0_57 = arith.constant 0 : index
    %c139 = arith.constant 139 : index
    %53 = vector.load %arg3[%c0_56, %c0_57, %c139] : memref<1x4x1256xf32, #tpu.memory_space<vmem>>, vector<1x4x1000xf32>
    %54 = vector.shape_cast %53 : vector<1x4x1000xf32> to vector<4x1000xf32>
    %c68 = arith.constant 68 : index
    %c0_58 = arith.constant 0 : index
    %55 = vector.load %arg8[%c68, %c0_58] : memref<108x1000xf32, #tpu.memory_space<vmem>>, vector<4x1000xf32>
    tpu.vector_store %arg8[%c68, %c0_58], %54 {strides = array<i32>} : memref<108x1000xf32, #tpu.memory_space<vmem>>, vector<4x1000xf32>,
    %c0_59 = arith.constant 0 : index
    %c0_60 = arith.constant 0 : index
    %c217 = arith.constant 217 : index
    %56 = vector.load %arg3[%c0_59, %c0_60, %c217] : memref<1x4x1256xf32, #tpu.memory_space<vmem>>, vector<1x4x1000xf32>
    %57 = vector.shape_cast %56 : vector<1x4x1000xf32> to vector<4x1000xf32>
    %c72 = arith.constant 72 : index
    %c0_61 = arith.constant 0 : index
    %58 = vector.load %arg8[%c72, %c0_61] : memref<108x1000xf32, #tpu.memory_space<vmem>>, vector<4x1000xf32>
    tpu.vector_store %arg8[%c72, %c0_61], %57 {strides = array<i32>} : memref<108x1000xf32, #tpu.memory_space<vmem>>, vector<4x1000xf32>,
    %c0_62 = arith.constant 0 : index
    %c0_63 = arith.constant 0 : index
    %c218 = arith.constant 218 : index
    %59 = vector.load %arg3[%c0_62, %c0_63, %c218] : memref<1x4x1256xf32, #tpu.memory_space<vmem>>, vector<1x4x1000xf32>
    %60 = vector.shape_cast %59 : vector<1x4x1000xf32> to vector<4x1000xf32>
    %c76 = arith.constant 76 : index
    %c0_64 = arith.constant 0 : index
    %61 = vector.load %arg8[%c76, %c0_64] : memref<108x1000xf32, #tpu.memory_space<vmem>>, vector<4x1000xf32>
    tpu.vector_store %arg8[%c76, %c0_64], %60 {strides = array<i32>} : memref<108x1000xf32, #tpu.memory_space<vmem>>, vector<4x1000xf32>,
    %c0_65 = arith.constant 0 : index
    %c0_66 = arith.constant 0 : index
    %c219 = arith.constant 219 : index
    %62 = vector.load %arg3[%c0_65, %c0_66, %c219] : memref<1x4x1256xf32, #tpu.memory_space<vmem>>, vector<1x4x1000xf32>
    %63 = vector.shape_cast %62 : vector<1x4x1000xf32> to vector<4x1000xf32>
    %c80 = arith.constant 80 : index
    %c0_67 = arith.constant 0 : index
    %64 = vector.load %arg8[%c80, %c0_67] : memref<108x1000xf32, #tpu.memory_space<vmem>>, vector<4x1000xf32>
    tpu.vector_store %arg8[%c80, %c0_67], %63 {strides = array<i32>} : memref<108x1000xf32, #tpu.memory_space<vmem>>, vector<4x1000xf32>,
    %c0_68 = arith.constant 0 : index
    %c0_69 = arith.constant 0 : index
    %c227 = arith.constant 227 : index
    %65 = vector.load %arg3[%c0_68, %c0_69, %c227] : memref<1x4x1256xf32, #tpu.memory_space<vmem>>, vector<1x4x1000xf32>
    %66 = vector.shape_cast %65 : vector<1x4x1000xf32> to vector<4x1000xf32>
    %c84 = arith.constant 84 : index
    %c0_70 = arith.constant 0 : index
    %67 = vector.load %arg8[%c84, %c0_70] : memref<108x1000xf32, #tpu.memory_space<vmem>>, vector<4x1000xf32>
    tpu.vector_store %arg8[%c84, %c0_70], %66 {strides = array<i32>} : memref<108x1000xf32, #tpu.memory_space<vmem>>, vector<4x1000xf32>,
    %c0_71 = arith.constant 0 : index
    %c0_72 = arith.constant 0 : index
    %c228 = arith.constant 228 : index
    %68 = vector.load %arg3[%c0_71, %c0_72, %c228] : memref<1x4x1256xf32, #tpu.memory_space<vmem>>, vector<1x4x1000xf32>
    %69 = vector.shape_cast %68 : vector<1x4x1000xf32> to vector<4x1000xf32>
    %c88 = arith.constant 88 : index
    %c0_73 = arith.constant 0 : index
    %70 = vector.load %arg8[%c88, %c0_73] : memref<108x1000xf32, #tpu.memory_space<vmem>>, vector<4x1000xf32>
    tpu.vector_store %arg8[%c88, %c0_73], %69 {strides = array<i32>} : memref<108x1000xf32, #tpu.memory_space<vmem>>, vector<4x1000xf32>,
    %c0_74 = arith.constant 0 : index
    %c0_75 = arith.constant 0 : index
    %c229 = arith.constant 229 : index
    %71 = vector.load %arg3[%c0_74, %c0_75, %c229] : memref<1x4x1256xf32, #tpu.memory_space<vmem>>, vector<1x4x1000xf32>
    %72 = vector.shape_cast %71 : vector<1x4x1000xf32> to vector<4x1000xf32>
    %c92 = arith.constant 92 : index
    %c0_76 = arith.constant 0 : index
    %73 = vector.load %arg8[%c92, %c0_76] : memref<108x1000xf32, #tpu.memory_space<vmem>>, vector<4x1000xf32>
    tpu.vector_store %arg8[%c92, %c0_76], %72 {strides = array<i32>} : memref<108x1000xf32, #tpu.memory_space<vmem>>, vector<4x1000xf32>,
    %c0_77 = arith.constant 0 : index
    %c0_78 = arith.constant 0 : index
    %c237 = arith.constant 237 : index
    %74 = vector.load %arg3[%c0_77, %c0_78, %c237] : memref<1x4x1256xf32, #tpu.memory_space<vmem>>, vector<1x4x1000xf32>
    %75 = vector.shape_cast %74 : vector<1x4x1000xf32> to vector<4x1000xf32>
    %c96 = arith.constant 96 : index
    %c0_79 = arith.constant 0 : index
    %76 = vector.load %arg8[%c96, %c0_79] : memref<108x1000xf32, #tpu.memory_space<vmem>>, vector<4x1000xf32>
    tpu.vector_store %arg8[%c96, %c0_79], %75 {strides = array<i32>} : memref<108x1000xf32, #tpu.memory_space<vmem>>, vector<4x1000xf32>,
    %c0_80 = arith.constant 0 : index
    %c0_81 = arith.constant 0 : index
    %c238 = arith.constant 238 : index
    %77 = vector.load %arg3[%c0_80, %c0_81, %c238] : memref<1x4x1256xf32, #tpu.memory_space<vmem>>, vector<1x4x1000xf32>
    %78 = vector.shape_cast %77 : vector<1x4x1000xf32> to vector<4x1000xf32>
    %c100 = arith.constant 100 : index
    %c0_82 = arith.constant 0 : index
    %79 = vector.load %arg8[%c100, %c0_82] : memref<108x1000xf32, #tpu.memory_space<vmem>>, vector<4x1000xf32>
    tpu.vector_store %arg8[%c100, %c0_82], %78 {strides = array<i32>} : memref<108x1000xf32, #tpu.memory_space<vmem>>, vector<4x1000xf32>,
    %c0_83 = arith.constant 0 : index
    %c0_84 = arith.constant 0 : index
    %c239 = arith.constant 239 : index
    %80 = vector.load %arg3[%c0_83, %c0_84, %c239] : memref<1x4x1256xf32, #tpu.memory_space<vmem>>, vector<1x4x1000xf32>
    %81 = vector.shape_cast %80 : vector<1x4x1000xf32> to vector<4x1000xf32>
    %c104 = arith.constant 104 : index
    %c0_85 = arith.constant 0 : index
    %82 = vector.load %arg8[%c104, %c0_85] : memref<108x1000xf32, #tpu.memory_space<vmem>>, vector<4x1000xf32>
    tpu.vector_store %arg8[%c104, %c0_85], %81 {strides = array<i32>} : memref<108x1000xf32, #tpu.memory_space<vmem>>, vector<4x1000xf32>,
    %c0_86 = arith.constant 0 : index
    %c0_87 = arith.constant 0 : index
    %83 = vector.load %arg4[%c0_86, %c0_87] : memref<8x108xbf16, #tpu.memory_space<vmem>>, vector<8x108xbf16>
    %c0_88 = arith.constant 0 : index
    %c0_89 = arith.constant 0 : index
    %84 = vector.load %arg8[%c0_88, %c0_89] : memref<108x1000xf32, #tpu.memory_space<vmem>>, vector<108x1000xf32>
    %85 = arith.truncf %84 : vector<108x1000xf32> to vector<108x1000xbf16>
    %cst = arith.constant dense<0.000000e+00> : vector<8x1000xf32>
    %86 = tpu.matmul %83, %85, %cst {dimension_numbers = #tpu.dot_dimension_numbers<[1], [0], [0], [1], [0, 0, 1, 1], [], []>} : vector<8x108xbf16>, vector<108x1000xbf16>, vector<8x1000xf32> -> vector<8x1000xf32>
    %87 = vector.broadcast %0 : vector<1x1000xf32> to vector<8x1000xf32>
    %88 = arith.mulf %86, %87 : vector<8x1000xf32>
    %cst_90 = arith.constant dense<0.000000e+00> : vector<8xf32>
    %89 = vector.multi_reduction <add>, %88, %cst_90 [1] : vector<8x1000xf32> to vector<8xf32>
    %90 = vector.shape_cast %89 : vector<8xf32> to vector<8x1xf32>
    %91 = arith.mulf %88, %88 : vector<8x1000xf32>
    %cst_91 = arith.constant dense<0.000000e+00> : vector<8xf32>
    %92 = vector.multi_reduction <add>, %91, %cst_91 [1] : vector<8x1000xf32> to vector<8xf32>
    %93 = vector.shape_cast %92 : vector<8xf32> to vector<8x1xf32>
    %cst_92 = arith.constant 0.001953125 : f32
    %94 = vector.broadcast %cst_92 : f32 to vector<8x1xf32>
    %95 = arith.mulf %90, %94 : vector<8x1xf32>
    %cst_93 = arith.constant 0.001953125 : f32
    %96 = vector.broadcast %cst_93 : f32 to vector<8x1xf32>
    %97 = arith.mulf %93, %96 : vector<8x1xf32>
    %98 = arith.mulf %95, %95 : vector<8x1xf32>
    %99 = arith.subf %97, %98 : vector<8x1xf32>
    %100 = vector.broadcast %95 : vector<8x1xf32> to vector<8x1000xf32>
    %101 = arith.subf %86, %100 : vector<8x1000xf32>
    %cst_94 = arith.constant 9.99999974E-6 : f32
    %102 = vector.broadcast %cst_94 : f32 to vector<8x1xf32>
    %103 = arith.addf %99, %102 : vector<8x1xf32>
    %104 = math.rsqrt %103 : vector<8x1xf32>
    %105 = vector.broadcast %104 : vector<8x1xf32> to vector<8x1000xf32>
    %106 = arith.mulf %101, %105 : vector<8x1000xf32>
    %cst_95 = arith.constant 0.000000e+00 : f32
    %107 = vector.broadcast %cst_95 : f32 to vector<8x1000xf32>
    %108 = arith.cmpf oge, %106, %107 : vector<8x1000xf32>
    %cst_96 = arith.constant 0.00999999977 : f32
    %109 = vector.broadcast %cst_96 : f32 to vector<8x1000xf32>
    %110 = arith.mulf %109, %106 : vector<8x1000xf32>
    %111 = arith.select %108, %106, %110 : vector<8x1000xi1>, vector<8x1000xf32>
    %112 = vector.broadcast %0 : vector<1x1000xf32> to vector<8x1000xf32>
    %113 = arith.mulf %111, %112 : vector<8x1000xf32>
    %cst_97 = arith.constant 0.000000e+00 : f32
    %114 = vector.broadcast %cst_97 : f32 to vector<8x128xf32>
    %c0_98 = arith.constant 0 : index
    %c0_99 = arith.constant 0 : index
    %115 = vector.load %arg9[%c0_98, %c0_99] : memref<8x1256xf32, #tpu.memory_space<vmem>>, vector<8x128xf32>
    tpu.vector_store %arg9[%c0_98, %c0_99], %114 {strides = array<i32>} : memref<8x1256xf32, #tpu.memory_space<vmem>>, vector<8x128xf32>,
    %c0_100 = arith.constant 0 : index
    %c1128 = arith.constant 1128 : index
    %116 = vector.load %arg9[%c0_100, %c1128] : memref<8x1256xf32, #tpu.memory_space<vmem>>, vector<8x128xf32>
    tpu.vector_store %arg9[%c0_100, %c1128], %114 {strides = array<i32>} : memref<8x1256xf32, #tpu.memory_space<vmem>>, vector<8x128xf32>,
    %c0_101 = arith.constant 0 : index
    %c128_102 = arith.constant 128 : index
    %117 = vector.load %arg9[%c0_101, %c128_102] : memref<8x1256xf32, #tpu.memory_space<vmem>>, vector<8x1000xf32>
    tpu.vector_store %arg9[%c0_101, %c128_102], %113 {strides = array<i32>} : memref<8x1256xf32, #tpu.memory_space<vmem>>, vector<8x1000xf32>,
    %c0_103 = arith.constant 0 : index
    %c17_104 = arith.constant 17 : index
    %118 = vector.load %arg9[%c0_103, %c17_104] : memref<8x1256xf32, #tpu.memory_space<vmem>>, vector<8x1000xf32>
    %c0_105 = arith.constant 0 : index
    %c0_106 = arith.constant 0 : index
    %119 = vector.load %arg10[%c0_105, %c0_106] : memref<216x1000xf32, #tpu.memory_space<vmem>>, vector<8x1000xf32>
    tpu.vector_store %arg10[%c0_105, %c0_106], %118 {strides = array<i32>} : memref<216x1000xf32, #tpu.memory_space<vmem>>, vector<8x1000xf32>,
    %c0_107 = arith.constant 0 : index
    %c18_108 = arith.constant 18 : index
    %120 = vector.load %arg9[%c0_107, %c18_108] : memref<8x1256xf32, #tpu.memory_space<vmem>>, vector<8x1000xf32>
    %c8_109 = arith.constant 8 : index
    %c0_110 = arith.constant 0 : index
    %121 = vector.load %arg10[%c8_109, %c0_110] : memref<216x1000xf32, #tpu.memory_space<vmem>>, vector<8x1000xf32>
    tpu.vector_store %arg10[%c8_109, %c0_110], %120 {strides = array<i32>} : memref<216x1000xf32, #tpu.memory_space<vmem>>, vector<8x1000xf32>,
    %c0_111 = arith.constant 0 : index
    %c19_112 = arith.constant 19 : index
    %122 = vector.load %arg9[%c0_111, %c19_112] : memref<8x1256xf32, #tpu.memory_space<vmem>>, vector<8x1000xf32>
    %c16_113 = arith.constant 16 : index
    %c0_114 = arith.constant 0 : index
    %123 = vector.load %arg10[%c16_113, %c0_114] : memref<216x1000xf32, #tpu.memory_space<vmem>>, vector<8x1000xf32>
    tpu.vector_store %arg10[%c16_113, %c0_114], %122 {strides = array<i32>} : memref<216x1000xf32, #tpu.memory_space<vmem>>, vector<8x1000xf32>,
    %c0_115 = arith.constant 0 : index
    %c27_116 = arith.constant 27 : index
    %124 = vector.load %arg9[%c0_115, %c27_116] : memref<8x1256xf32, #tpu.memory_space<vmem>>, vector<8x1000xf32>
    %c24_117 = arith.constant 24 : index
    %c0_118 = arith.constant 0 : index
    %125 = vector.load %arg10[%c24_117, %c0_118] : memref<216x1000xf32, #tpu.memory_space<vmem>>, vector<8x1000xf32>
    tpu.vector_store %arg10[%c24_117, %c0_118], %124 {strides = array<i32>} : memref<216x1000xf32, #tpu.memory_space<vmem>>, vector<8x1000xf32>,
    %c0_119 = arith.constant 0 : index
    %c28_120 = arith.constant 28 : index
    %126 = vector.load %arg9[%c0_119, %c28_120] : memref<8x1256xf32, #tpu.memory_space<vmem>>, vector<8x1000xf32>
    %c32_121 = arith.constant 32 : index
    %c0_122 = arith.constant 0 : index
    %127 = vector.load %arg10[%c32_121, %c0_122] : memref<216x1000xf32, #tpu.memory_space<vmem>>, vector<8x1000xf32>
    tpu.vector_store %arg10[%c32_121, %c0_122], %126 {strides = array<i32>} : memref<216x1000xf32, #tpu.memory_space<vmem>>, vector<8x1000xf32>,
    %c0_123 = arith.constant 0 : index
    %c29_124 = arith.constant 29 : index
    %128 = vector.load %arg9[%c0_123, %c29_124] : memref<8x1256xf32, #tpu.memory_space<vmem>>, vector<8x1000xf32>
    %c40_125 = arith.constant 40 : index
    %c0_126 = arith.constant 0 : index
    %129 = vector.load %arg10[%c40_125, %c0_126] : memref<216x1000xf32, #tpu.memory_space<vmem>>, vector<8x1000xf32>
    tpu.vector_store %arg10[%c40_125, %c0_126], %128 {strides = array<i32>} : memref<216x1000xf32, #tpu.memory_space<vmem>>, vector<8x1000xf32>,
    %c0_127 = arith.constant 0 : index
    %c37_128 = arith.constant 37 : index
    %130 = vector.load %arg9[%c0_127, %c37_128] : memref<8x1256xf32, #tpu.memory_space<vmem>>, vector<8x1000xf32>
    %c48_129 = arith.constant 48 : index
    %c0_130 = arith.constant 0 : index
    %131 = vector.load %arg10[%c48_129, %c0_130] : memref<216x1000xf32, #tpu.memory_space<vmem>>, vector<8x1000xf32>
    tpu.vector_store %arg10[%c48_129, %c0_130], %130 {strides = array<i32>} : memref<216x1000xf32, #tpu.memory_space<vmem>>, vector<8x1000xf32>,
    %c0_131 = arith.constant 0 : index
    %c38_132 = arith.constant 38 : index
    %132 = vector.load %arg9[%c0_131, %c38_132] : memref<8x1256xf32, #tpu.memory_space<vmem>>, vector<8x1000xf32>
    %c56_133 = arith.constant 56 : index
    %c0_134 = arith.constant 0 : index
    %133 = vector.load %arg10[%c56_133, %c0_134] : memref<216x1000xf32, #tpu.memory_space<vmem>>, vector<8x1000xf32>
    tpu.vector_store %arg10[%c56_133, %c0_134], %132 {strides = array<i32>} : memref<216x1000xf32, #tpu.memory_space<vmem>>, vector<8x1000xf32>,
    %c0_135 = arith.constant 0 : index
    %c39_136 = arith.constant 39 : index
    %134 = vector.load %arg9[%c0_135, %c39_136] : memref<8x1256xf32, #tpu.memory_space<vmem>>, vector<8x1000xf32>
    %c64_137 = arith.constant 64 : index
    %c0_138 = arith.constant 0 : index
    %135 = vector.load %arg10[%c64_137, %c0_138] : memref<216x1000xf32, #tpu.memory_space<vmem>>, vector<8x1000xf32>
    tpu.vector_store %arg10[%c64_137, %c0_138], %134 {strides = array<i32>} : memref<216x1000xf32, #tpu.memory_space<vmem>>, vector<8x1000xf32>,
    %c0_139 = arith.constant 0 : index
    %c117_140 = arith.constant 117 : index
    %136 = vector.load %arg9[%c0_139, %c117_140] : memref<8x1256xf32, #tpu.memory_space<vmem>>, vector<8x1000xf32>
    %c72_141 = arith.constant 72 : index
    %c0_142 = arith.constant 0 : index
    %137 = vector.load %arg10[%c72_141, %c0_142] : memref<216x1000xf32, #tpu.memory_space<vmem>>, vector<8x1000xf32>
    tpu.vector_store %arg10[%c72_141, %c0_142], %136 {strides = array<i32>} : memref<216x1000xf32, #tpu.memory_space<vmem>>, vector<8x1000xf32>,
    %c0_143 = arith.constant 0 : index
    %c118_144 = arith.constant 118 : index
    %138 = vector.load %arg9[%c0_143, %c118_144] : memref<8x1256xf32, #tpu.memory_space<vmem>>, vector<8x1000xf32>
    %c80_145 = arith.constant 80 : index
    %c0_146 = arith.constant 0 : index
    %139 = vector.load %arg10[%c80_145, %c0_146] : memref<216x1000xf32, #tpu.memory_space<vmem>>, vector<8x1000xf32>
    tpu.vector_store %arg10[%c80_145, %c0_146], %138 {strides = array<i32>} : memref<216x1000xf32, #tpu.memory_space<vmem>>, vector<8x1000xf32>,
    %c0_147 = arith.constant 0 : index
    %c119_148 = arith.constant 119 : index
    %140 = vector.load %arg9[%c0_147, %c119_148] : memref<8x1256xf32, #tpu.memory_space<vmem>>, vector<8x1000xf32>
    %c88_149 = arith.constant 88 : index
    %c0_150 = arith.constant 0 : index
    %141 = vector.load %arg10[%c88_149, %c0_150] : memref<216x1000xf32, #tpu.memory_space<vmem>>, vector<8x1000xf32>
    tpu.vector_store %arg10[%c88_149, %c0_150], %140 {strides = array<i32>} : memref<216x1000xf32, #tpu.memory_space<vmem>>, vector<8x1000xf32>,
    %c0_151 = arith.constant 0 : index
    %c127_152 = arith.constant 127 : index
    %142 = vector.load %arg9[%c0_151, %c127_152] : memref<8x1256xf32, #tpu.memory_space<vmem>>, vector<8x1000xf32>
    %c96_153 = arith.constant 96 : index
    %c0_154 = arith.constant 0 : index
    %143 = vector.load %arg10[%c96_153, %c0_154] : memref<216x1000xf32, #tpu.memory_space<vmem>>, vector<8x1000xf32>
    tpu.vector_store %arg10[%c96_153, %c0_154], %142 {strides = array<i32>} : memref<216x1000xf32, #tpu.memory_space<vmem>>, vector<8x1000xf32>,
    %c0_155 = arith.constant 0 : index
    %c128_156 = arith.constant 128 : index
    %144 = vector.load %arg9[%c0_155, %c128_156] : memref<8x1256xf32, #tpu.memory_space<vmem>>, vector<8x1000xf32>
    %c104_157 = arith.constant 104 : index
    %c0_158 = arith.constant 0 : index
    %145 = vector.load %arg10[%c104_157, %c0_158] : memref<216x1000xf32, #tpu.memory_space<vmem>>, vector<8x1000xf32>
    tpu.vector_store %arg10[%c104_157, %c0_158], %144 {strides = array<i32>} : memref<216x1000xf32, #tpu.memory_space<vmem>>, vector<8x1000xf32>,
    %c0_159 = arith.constant 0 : index
    %c129_160 = arith.constant 129 : index
    %146 = vector.load %arg9[%c0_159, %c129_160] : memref<8x1256xf32, #tpu.memory_space<vmem>>, vector<8x1000xf32>
    %c112 = arith.constant 112 : index
    %c0_161 = arith.constant 0 : index
    %147 = vector.load %arg10[%c112, %c0_161] : memref<216x1000xf32, #tpu.memory_space<vmem>>, vector<8x1000xf32>
    tpu.vector_store %arg10[%c112, %c0_161], %146 {strides = array<i32>} : memref<216x1000xf32, #tpu.memory_space<vmem>>, vector<8x1000xf32>,
    %c0_162 = arith.constant 0 : index
    %c137_163 = arith.constant 137 : index
    %148 = vector.load %arg9[%c0_162, %c137_163] : memref<8x1256xf32, #tpu.memory_space<vmem>>, vector<8x1000xf32>
    %c120 = arith.constant 120 : index
    %c0_164 = arith.constant 0 : index
    %149 = vector.load %arg10[%c120, %c0_164] : memref<216x1000xf32, #tpu.memory_space<vmem>>, vector<8x1000xf32>
    tpu.vector_store %arg10[%c120, %c0_164], %148 {strides = array<i32>} : memref<216x1000xf32, #tpu.memory_space<vmem>>, vector<8x1000xf32>,
    %c0_165 = arith.constant 0 : index
    %c138_166 = arith.constant 138 : index
    %150 = vector.load %arg9[%c0_165, %c138_166] : memref<8x1256xf32, #tpu.memory_space<vmem>>, vector<8x1000xf32>
    %c128_167 = arith.constant 128 : index
    %c0_168 = arith.constant 0 : index
    %151 = vector.load %arg10[%c128_167, %c0_168] : memref<216x1000xf32, #tpu.memory_space<vmem>>, vector<8x1000xf32>
    tpu.vector_store %arg10[%c128_167, %c0_168], %150 {strides = array<i32>} : memref<216x1000xf32, #tpu.memory_space<vmem>>, vector<8x1000xf32>,
    %c0_169 = arith.constant 0 : index
    %c139_170 = arith.constant 139 : index
    %152 = vector.load %arg9[%c0_169, %c139_170] : memref<8x1256xf32, #tpu.memory_space<vmem>>, vector<8x1000xf32>
    %c136 = arith.constant 136 : index
    %c0_171 = arith.constant 0 : index
    %153 = vector.load %arg10[%c136, %c0_171] : memref<216x1000xf32, #tpu.memory_space<vmem>>, vector<8x1000xf32>
    tpu.vector_store %arg10[%c136, %c0_171], %152 {strides = array<i32>} : memref<216x1000xf32, #tpu.memory_space<vmem>>, vector<8x1000xf32>,
    %c0_172 = arith.constant 0 : index
    %c217_173 = arith.constant 217 : index
    %154 = vector.load %arg9[%c0_172, %c217_173] : memref<8x1256xf32, #tpu.memory_space<vmem>>, vector<8x1000xf32>
    %c144 = arith.constant 144 : index
    %c0_174 = arith.constant 0 : index
    %155 = vector.load %arg10[%c144, %c0_174] : memref<216x1000xf32, #tpu.memory_space<vmem>>, vector<8x1000xf32>
    tpu.vector_store %arg10[%c144, %c0_174], %154 {strides = array<i32>} : memref<216x1000xf32, #tpu.memory_space<vmem>>, vector<8x1000xf32>,
    %c0_175 = arith.constant 0 : index
    %c218_176 = arith.constant 218 : index
    %156 = vector.load %arg9[%c0_175, %c218_176] : memref<8x1256xf32, #tpu.memory_space<vmem>>, vector<8x1000xf32>
    %c152 = arith.constant 152 : index
    %c0_177 = arith.constant 0 : index
    %157 = vector.load %arg10[%c152, %c0_177] : memref<216x1000xf32, #tpu.memory_space<vmem>>, vector<8x1000xf32>
    tpu.vector_store %arg10[%c152, %c0_177], %156 {strides = array<i32>} : memref<216x1000xf32, #tpu.memory_space<vmem>>, vector<8x1000xf32>,
    %c0_178 = arith.constant 0 : index
    %c219_179 = arith.constant 219 : index
    %158 = vector.load %arg9[%c0_178, %c219_179] : memref<8x1256xf32, #tpu.memory_space<vmem>>, vector<8x1000xf32>
    %c160 = arith.constant 160 : index
    %c0_180 = arith.constant 0 : index
    %159 = vector.load %arg10[%c160, %c0_180] : memref<216x1000xf32, #tpu.memory_space<vmem>>, vector<8x1000xf32>
    tpu.vector_store %arg10[%c160, %c0_180], %158 {strides = array<i32>} : memref<216x1000xf32, #tpu.memory_space<vmem>>, vector<8x1000xf32>,
    %c0_181 = arith.constant 0 : index
    %c227_182 = arith.constant 227 : index
    %160 = vector.load %arg9[%c0_181, %c227_182] : memref<8x1256xf32, #tpu.memory_space<vmem>>, vector<8x1000xf32>
    %c168 = arith.constant 168 : index
    %c0_183 = arith.constant 0 : index
    %161 = vector.load %arg10[%c168, %c0_183] : memref<216x1000xf32, #tpu.memory_space<vmem>>, vector<8x1000xf32>
    tpu.vector_store %arg10[%c168, %c0_183], %160 {strides = array<i32>} : memref<216x1000xf32, #tpu.memory_space<vmem>>, vector<8x1000xf32>,
    %c0_184 = arith.constant 0 : index
    %c228_185 = arith.constant 228 : index
    %162 = vector.load %arg9[%c0_184, %c228_185] : memref<8x1256xf32, #tpu.memory_space<vmem>>, vector<8x1000xf32>
    %c176 = arith.constant 176 : index
    %c0_186 = arith.constant 0 : index
    %163 = vector.load %arg10[%c176, %c0_186] : memref<216x1000xf32, #tpu.memory_space<vmem>>, vector<8x1000xf32>
    tpu.vector_store %arg10[%c176, %c0_186], %162 {strides = array<i32>} : memref<216x1000xf32, #tpu.memory_space<vmem>>, vector<8x1000xf32>,
    %c0_187 = arith.constant 0 : index
    %c229_188 = arith.constant 229 : index
    %164 = vector.load %arg9[%c0_187, %c229_188] : memref<8x1256xf32, #tpu.memory_space<vmem>>, vector<8x1000xf32>
    %c184 = arith.constant 184 : index
    %c0_189 = arith.constant 0 : index
    %165 = vector.load %arg10[%c184, %c0_189] : memref<216x1000xf32, #tpu.memory_space<vmem>>, vector<8x1000xf32>
    tpu.vector_store %arg10[%c184, %c0_189], %164 {strides = array<i32>} : memref<216x1000xf32, #tpu.memory_space<vmem>>, vector<8x1000xf32>,
    %c0_190 = arith.constant 0 : index
    %c237_191 = arith.constant 237 : index
    %166 = vector.load %arg9[%c0_190, %c237_191] : memref<8x1256xf32, #tpu.memory_space<vmem>>, vector<8x1000xf32>
    %c192 = arith.constant 192 : index
    %c0_192 = arith.constant 0 : index
    %167 = vector.load %arg10[%c192, %c0_192] : memref<216x1000xf32, #tpu.memory_space<vmem>>, vector<8x1000xf32>
    tpu.vector_store %arg10[%c192, %c0_192], %166 {strides = array<i32>} : memref<216x1000xf32, #tpu.memory_space<vmem>>, vector<8x1000xf32>,
    %c0_193 = arith.constant 0 : index
    %c238_194 = arith.constant 238 : index
    %168 = vector.load %arg9[%c0_193, %c238_194] : memref<8x1256xf32, #tpu.memory_space<vmem>>, vector<8x1000xf32>
    %c200 = arith.constant 200 : index
    %c0_195 = arith.constant 0 : index
    %169 = vector.load %arg10[%c200, %c0_195] : memref<216x1000xf32, #tpu.memory_space<vmem>>, vector<8x1000xf32>
    tpu.vector_store %arg10[%c200, %c0_195], %168 {strides = array<i32>} : memref<216x1000xf32, #tpu.memory_space<vmem>>, vector<8x1000xf32>,
    %c0_196 = arith.constant 0 : index
    %c239_197 = arith.constant 239 : index
    %170 = vector.load %arg9[%c0_196, %c239_197] : memref<8x1256xf32, #tpu.memory_space<vmem>>, vector<8x1000xf32>
    %c208 = arith.constant 208 : index
    %c0_198 = arith.constant 0 : index
    %171 = vector.load %arg10[%c208, %c0_198] : memref<216x1000xf32, #tpu.memory_space<vmem>>, vector<8x1000xf32>
    tpu.vector_store %arg10[%c208, %c0_198], %170 {strides = array<i32>} : memref<216x1000xf32, #tpu.memory_space<vmem>>, vector<8x1000xf32>,
    %c0_199 = arith.constant 0 : index
    %c0_200 = arith.constant 0 : index
    %172 = vector.load %arg5[%c0_199, %c0_200] : memref<8x216xbf16, #tpu.memory_space<vmem>>, vector<8x216xbf16>
    %c0_201 = arith.constant 0 : index
    %c0_202 = arith.constant 0 : index
    %173 = vector.load %arg10[%c0_201, %c0_202] : memref<216x1000xf32, #tpu.memory_space<vmem>>, vector<216x1000xf32>
    %174 = arith.truncf %173 : vector<216x1000xf32> to vector<216x1000xbf16>
    %cst_203 = arith.constant dense<0.000000e+00> : vector<8x1000xf32>
    %175 = tpu.matmul %172, %174, %cst_203 {dimension_numbers = #tpu.dot_dimension_numbers<[1], [0], [0], [1], [0, 0, 1, 1], [], []>} : vector<8x216xbf16>, vector<216x1000xbf16>, vector<8x1000xf32> -> vector<8x1000xf32>
    %c0_204 = arith.constant 0 : index
    %c0_205 = arith.constant 0 : index
    %c128_206 = arith.constant 128 : index
    %176 = vector.load %arg3[%c0_204, %c0_205, %c128_206] : memref<1x4x1256xf32, #tpu.memory_space<vmem>>, vector<1x4x1000xf32>
    %177 = vector.shape_cast %176 : vector<1x4x1000xf32> to vector<4x1000xf32>
    %c0_207 = arith.constant 0 : index
    %c0_208 = arith.constant 0 : index
    %178 = vector.load %arg6[%c0_207, %c0_208] : memref<8x4xf32, #tpu.memory_space<vmem>>, vector<8x4xf32>
    %cst_209 = arith.constant dense<0.000000e+00> : vector<8x1000xf32>
    %179 = tpu.matmul %178, %177, %cst_209 {dimension_numbers = #tpu.dot_dimension_numbers<[1], [0], [0], [1], [0, 0, 1, 1], [], []>} : vector<8x4xf32>, vector<4x1000xf32>, vector<8x1000xf32> -> vector<8x1000xf32>
    %180 = vector.broadcast %1 : vector<1x1000xf32> to vector<8x1000xf32>
    %181 = arith.mulf %175, %180 : vector<8x1000xf32>
    %cst_210 = arith.constant dense<0.000000e+00> : vector<8xf32>
    %182 = vector.multi_reduction <add>, %181, %cst_210 [1] : vector<8x1000xf32> to vector<8xf32>
    %183 = vector.shape_cast %182 : vector<8xf32> to vector<8x1xf32>
    %184 = arith.mulf %181, %181 : vector<8x1000xf32>
    %cst_211 = arith.constant dense<0.000000e+00> : vector<8xf32>
    %185 = vector.multi_reduction <add>, %184, %cst_211 [1] : vector<8x1000xf32> to vector<8xf32>
    %186 = vector.shape_cast %185 : vector<8xf32> to vector<8x1xf32>
    %cst_212 = arith.constant 0.001953125 : f32
    %187 = vector.broadcast %cst_212 : f32 to vector<8x1xf32>
    %188 = arith.mulf %183, %187 : vector<8x1xf32>
    %cst_213 = arith.constant 0.001953125 : f32
    %189 = vector.broadcast %cst_213 : f32 to vector<8x1xf32>
    %190 = arith.mulf %186, %189 : vector<8x1xf32>
    %191 = arith.mulf %188, %188 : vector<8x1xf32>
    %192 = arith.subf %190, %191 : vector<8x1xf32>
    %193 = vector.broadcast %188 : vector<8x1xf32> to vector<8x1000xf32>
    %194 = arith.subf %175, %193 : vector<8x1000xf32>
    %cst_214 = arith.constant 9.99999974E-6 : f32
    %195 = vector.broadcast %cst_214 : f32 to vector<8x1xf32>
    %196 = arith.addf %192, %195 : vector<8x1xf32>
    %197 = math.rsqrt %196 : vector<8x1xf32>
    %198 = vector.broadcast %197 : vector<8x1xf32> to vector<8x1000xf32>
    %199 = arith.mulf %194, %198 : vector<8x1000xf32>
    %200 = vector.broadcast %1 : vector<1x1000xf32> to vector<8x1000xf32>
    %201 = arith.mulf %179, %200 : vector<8x1000xf32>
    %cst_215 = arith.constant dense<0.000000e+00> : vector<8xf32>
    %202 = vector.multi_reduction <add>, %201, %cst_215 [1] : vector<8x1000xf32> to vector<8xf32>
    %203 = vector.shape_cast %202 : vector<8xf32> to vector<8x1xf32>
    %204 = arith.mulf %201, %201 : vector<8x1000xf32>
    %cst_216 = arith.constant dense<0.000000e+00> : vector<8xf32>
    %205 = vector.multi_reduction <add>, %204, %cst_216 [1] : vector<8x1000xf32> to vector<8xf32>
    %206 = vector.shape_cast %205 : vector<8xf32> to vector<8x1xf32>
    %cst_217 = arith.constant 0.001953125 : f32
    %207 = vector.broadcast %cst_217 : f32 to vector<8x1xf32>
    %208 = arith.mulf %203, %207 : vector<8x1xf32>
    %cst_218 = arith.constant 0.001953125 : f32
    %209 = vector.broadcast %cst_218 : f32 to vector<8x1xf32>
    %210 = arith.mulf %206, %209 : vector<8x1xf32>
    %211 = arith.mulf %208, %208 : vector<8x1xf32>
    %212 = arith.subf %210, %211 : vector<8x1xf32>
    %213 = vector.broadcast %208 : vector<8x1xf32> to vector<8x1000xf32>
    %214 = arith.subf %179, %213 : vector<8x1000xf32>
    %cst_219 = arith.constant 9.99999974E-6 : f32
    %215 = vector.broadcast %cst_219 : f32 to vector<8x1xf32>
    %216 = arith.addf %212, %215 : vector<8x1xf32>
    %217 = math.rsqrt %216 : vector<8x1xf32>
    %218 = vector.broadcast %217 : vector<8x1xf32> to vector<8x1000xf32>
    %219 = arith.mulf %214, %218 : vector<8x1000xf32>
    %220 = arith.addf %199, %219 : vector<8x1000xf32>
    %cst_220 = arith.constant 0.000000e+00 : f32
    %221 = vector.broadcast %cst_220 : f32 to vector<8x1000xf32>
    %222 = arith.cmpf oge, %220, %221 : vector<8x1000xf32>
    %cst_221 = arith.constant 0.00999999977 : f32
    %223 = vector.broadcast %cst_221 : f32 to vector<8x1000xf32>
    %224 = arith.mulf %223, %220 : vector<8x1000xf32>
    %225 = arith.select %222, %220, %224 : vector<8x1000xi1>, vector<8x1000xf32>
    %c0_222 = arith.constant 0 : index
    %c0_223 = arith.constant 0 : index
    %c0_224 = arith.constant 0 : index
    %226 = vector.load %arg7[%c0_222, %c0_223, %c0_224] : memref<1x8x1000xf32, #tpu.memory_space<vmem>>, vector<1x8x1000xf32>
    %227 = vector.shape_cast %226 : vector<1x8x1000xf32> to vector<8x1000xf32>
    %228 = vector.shape_cast %225 : vector<8x1000xf32> to vector<1x8x1000xf32>
    tpu.vector_store %arg7[%c0_222, %c0_223, %c0_224], %228 {strides = array<i32>} : memref<1x8x1000xf32, #tpu.memory_space<vmem>>, vector<1x8x1000xf32>,
    return
  }
  func.func @transform_0(%arg0: i32) -> (i32, i32) {
    %c0_i32 = arith.constant 0 : i32
    %c0_i32_0 = arith.constant 0 : i32
    %c0_i32_1 = arith.constant 0 : i32
    return %c0_i32, %c0_i32_0 : i32, i32
  }
  func.func @transform_1(%arg0: i32) -> (i32, i32) {
    %c0_i32 = arith.constant 0 : i32
    %c0_i32_0 = arith.constant 0 : i32
    %c0_i32_1 = arith.constant 0 : i32
    return %c0_i32, %c0_i32_0 : i32, i32
  }
  func.func @transform_2(%arg0: i32) -> (i32, i32, i32) {
    %c0_i32 = arith.constant 0 : i32
    %c0_i32_0 = arith.constant 0 : i32
    %c0_i32_1 = arith.constant 0 : i32
    return %arg0, %c0_i32, %c0_i32_0 : i32, i32, i32
  }
  func.func @transform_3(%arg0: i32) -> (i32, i32) {
    %c0_i32 = arith.constant 0 : i32
    %c0_i32_0 = arith.constant 0 : i32
    %c0_i32_1 = arith.constant 0 : i32
    return %c0_i32, %c0_i32_0 : i32, i32
  }
  func.func @transform_4(%arg0: i32) -> (i32, i32) {
    %c0_i32 = arith.constant 0 : i32
    %c0_i32_0 = arith.constant 0 : i32
    %c0_i32_1 = arith.constant 0 : i32
    return %c0_i32, %c0_i32_0 : i32, i32
  }
  func.func @transform_5(%arg0: i32) -> (i32, i32) {
    %c0_i32 = arith.constant 0 : i32
    %c0_i32_0 = arith.constant 0 : i32
    %c0_i32_1 = arith.constant 0 : i32
    return %c0_i32, %c0_i32_0 : i32, i32
  }
  func.func @transform_6(%arg0: i32) -> (i32, i32, i32) {
    %c0_i32 = arith.constant 0 : i32
    %c0_i32_0 = arith.constant 0 : i32
    %c0_i32_1 = arith.constant 0 : i32
    return %arg0, %c0_i32, %c0_i32_0 : i32, i32, i32
  }
}

</mosaic_0001>

<bundles_post_ra>
// kernel: res_two_layer_conv_block.1
= control target key start
LH: loop header
LB: loop body
LE: loop exit
PB: predicated region body
PF: predicated region fallthrough
CT: control target
= control target key end

     0   :  { %s5076_s21 = smov 0   ;;  %s7124_s0 = inlined_call_operand.vmem [shape: f32[1,1000], index: 0, kind: input, shape index: {}, may-alias: {0,1}]   ;;  %s7125_s1 = inlined_call_operand.vmem [shape: f32[1,1000], index: 1, kind: input, shape index: {}, may-alias: {0,1}]   ;;  %s7126_s2 = inlined_call_operand.vmem [shape: f32[2,4,1256], index: 2, kind: input, shape index: {}]   ;;  %s7127_s3 = inlined_call_operand.vmem [shape: bf16[8,108], index: 3, kind: input, shape index: {}]   ;;  %s7128_s4 = inlined_call_operand.vmem [shape: bf16[8,216], index: 4, kind: input, shape index: {}]   ;;  %s7129_s5 = inlined_call_operand.vmem [shape: f32[8,4], index: 5, kind: input, shape index: {}]   ;;  %s7130_s6 = inlined_call_operand.vmem [shape: f32[2,8,1000], index: 6, kind: output, shape index: {}]  }
   0x1 LB: > { %s4881_s22 = sadd.s32 4294967295, %s5011_s21   ;;  %p4885_p0 = scmp.ge.s32.totalorder %s5011_s21, 1  ;;  %s5011_s21 = sphi %s5076_s21, %s16_s21  }
   0x2   : > { %p212_p1 = scmp.lt.s32.totalorder %s5011_s21, 3 }
   0x4   : > { %p213_p2 = pnand %p4885_p0, %p212_p1 }
   0x5   : > { %p242_p3 = scmp.lt.s32.totalorder (!%p213_p2), %s4881_s22, 1  ;;  %s5013_s27 = smov (!%p213_p2), 110   ;;  %vm283_vm0 = vcmask (!%p213_p2), 908288   ;;  %vm336_vm1 = vcmask (!%p213_p2), 900096   ;;  %vm389_vm2 = vcmask (!%p213_p2), 891904   ;;  %vm7164_vm3 = vcmask (!%p213_p2), 826368  }
   0x6   : > { %216 = sbr.rel (%p213_p2) target bundleno = 1957 (0x7a5), region = 44  ;;  %s5014_s28 = smov (!%p213_p2), 111   ;;  %vm7170_vm4 = vcmask (!%p213_p2), 818176   ;;  %vm7167_vm5 = vcmask (!%p213_p2), 809984   ;;  %vm7166_vm6 = vcmask (!%p213_p2), 744448   ;;  %vm7165_vm7 = vcmask (!%p213_p2), 736256  }
   0x7   : > { %s5015_s29 = smov (!%p213_p2), 109   ;;  %s5016_s30 = smov (!%p213_p2), 101   ;;  %vm7169_vm8 = vcmask (!%p213_p2), 728064   ;;  %vm7168_vm9 = vcmask (!%p213_p2), 89088   ;;  %vm7157_vm10 = vcmask (!%p213_p2), 80896   ;;  %vm7144_vm11 = vcmask (!%p213_p2), 72704  }
   0x8   : > { %s5017_s7 = smov (!%p213_p2), 100   ;;  %s5018_s8 = smov (!%p213_p2), 99   ;;  %vm7143_vm12 = vcmask (!%p213_p2), 7168   ;;  %vm7141_vm13 = vcmask (!%p213_p2), 1039360   ;;  %vm7142_vm14 = vcmask (!%p213_p2), 973824   ;;  %vm359_vm15 = vcmask (!%p213_p2), 850948  }
   0x9   : > { %s5019_s9 = smov (!%p213_p2), 91   ;;  %s7179_s10 = smov (!%p213_p2), 90  }
   0xa   : > { %s7177_s11 = smov (!%p213_p2), 89   ;;  %s7175_s12 = smov (!%p213_p2), 11  }
   0xb   : > { %s7158_s13 = smov (!%p213_p2), 10   ;;  %s7155_s14 = smov (!%p213_p2), 9  }
   0xc   : > { %s7153_s15 = smov (!%p213_p2), 1   ;;  %s7162_s16 = smov (!%p213_p2), 127  }
   0xd   : > { %s7411_s22 = smov (!%p242_p3, %s4881_s22), 1  ;;  %s7160_s17 = smov 119  }
   0xe   : > { %s4922_s23 = smul.u32 40, %s7411_s22  ;;  %s7187_s18 = smov 118  }
   0xf   : > { %s7185_s19 = smov 117   ;;  %s7133_s20 = smov 39  }
  0x10   : > { %s5090_s26 = scalar_lea.vmem %s7126_s2, %s4922_s23  ;;  %s7131_s23 = smov 38  }
  0x11   : > { %v5093_v0 = vld [vmem:[%s5090_s26] sm:$0xff]  ;;  %v5096_v1 = vld [vmem:[%s5090_s26 + $0x8] sm:$0xff]  ;;  %v5149_v10 = vld [vmem:[%s5090_s26 + $0x10] sm:$0xff]  ;;  %s7181_s24 = smov 37   ;;  %s7135_s25 = smov 29  }
  0x12   : > { %322 = vrot.lane.b32.xlu1 %v5093_v0, %s5013_s27  ;;  %271 = vrot.lane.b32.xlu0 %v5096_v1, %s5014_s28  ;;  %v5104_v2 = vcombine.high %v5093_v0, %v5093_v0  ;;  %v5107_v3 = vld [vmem:[%s5090_s26 + $0xc] sm:$0xff]  ;;  %v5110_v4 = vld [vmem:[%s5090_s26 + $0x4] sm:$0xff]  ;;  %v317_v7 = vcombine.low %v5096_v1, %v5096_v1  ;;  %v316_v8 = vcombine.low %v5093_v0, %v5093_v0 }
  0x13   : > { %1005 = vst [vmem:[#allocation2 + $0x188] sm:$0xf0] %v5110_v4  ;;  %1007 = vst [vmem:[#allocation2 + $0x198] sm:$0xf0] %v5107_v3  ;;  %v5116_v5 = vcombine.low %v5107_v3, %v5107_v3  ;;  %v5120_v6 = vcombine.low %v5110_v4, %v5110_v4  ;;  %v5143_v9 = vcombine.high %v5096_v1, %v5096_v1  ;;  %v5284_v41 = vld [vmem:[%s5090_s26 + $0x14] sm:$0xff] }
  0x14   : > { %v318_v11 = vcombine.low %v5149_v10, %v5149_v10  ;;  %v5244_v17 = vcombine.high %v5110_v4, %v5110_v4  ;;  %v5268_v35 = vcombine.high %v5107_v3, %v5107_v3  ;;  %v5297_v49 = vcombine.low %v5284_v41, %v5284_v41 }
  0x15   : > { %1004 = vst [vmem:[#allocation2 + $0x180] sm:$0xf0] %v5120_v6  ;;  %1006 = vst [vmem:[#allocation2 + $0x190] sm:$0xf0] %v5116_v5 }
  0x16   : > { %377 = vrot.lane.b32.xlu1 %v5096_v1, %s5015_s29  ;;  %269 = vrot.lane.b32.xlu0 %v5104_v2, %s5014_s28 }
  0x1a   : > { %324 = vrot.lane.b32.xlu1 %v317_v7, %s5013_s27  ;;  %375 = vrot.lane.b32.xlu0 %v5104_v2, %s5015_s29 }
  0x1e   : > { %432 = vrot.lane.b32.xlu1 %v317_v7, %s5016_s30  ;;  %430 = vrot.lane.b32.xlu0 %v5093_v0, %s5016_s30 }
  0x22   : > { %320 = vrot.lane.b32.xlu1 %v316_v8, %s5013_s27  ;;  %267 = vrot.lane.b32.xlu0 %v5093_v0, %s5014_s28 }
  0x26   : > { %428 = vrot.lane.b32.xlu1 %v316_v8, %s5016_s30  ;;  %373 = vrot.lane.b32.xlu0 %v5093_v0, %s5015_s29 }
  0x2a   : > { %275 = vrot.lane.b32.xlu1 %v5149_v10, %s5014_s28  ;;  %273 = vrot.lane.b32.xlu0 %v5143_v9, %s5014_s28 }
  0x2e   : > { %328 = vrot.lane.b32.xlu1 %v318_v11, %s5013_s27  ;;  %326 = vrot.lane.b32.xlu0 %v5096_v1, %s5013_s27 }
  0x32   : > { %381 = vrot.lane.b32.xlu1 %v5149_v10, %s5015_s29  ;;  %379 = vrot.lane.b32.xlu0 %v5143_v9, %s5015_s29 }
  0x36   : > { %436 = vrot.lane.b32.xlu1 %v318_v11, %s5016_s30  ;;  %434 = vrot.lane.b32.xlu0 %v5096_v1, %s5016_s30 }
  0x3a   : > { %489 = vrot.lane.b32.xlu1 %v5096_v1, %s5017_s7  ;;  %487 = vrot.lane.b32.xlu0 %v5104_v2, %s5017_s7 }
  0x3e   : > { %547 = vrot.lane.b32.xlu1 %v317_v7, %s5018_s8  ;;  %545 = vrot.lane.b32.xlu0 %v5093_v0, %s5018_s8 }
  0x42   : > { %604 = vrot.lane.b32.xlu1 %v5096_v1, %s5019_s9  ;;  %602 = vrot.lane.b32.xlu0 %v5104_v2, %s5019_s9 }
  0x46   : > { %662 = vrot.lane.b32.xlu1 %v317_v7, %s7179_s10  ;;  %660 = vrot.lane.b32.xlu0 %v5093_v0, %s7179_s10 }
  0x4a   : > { %543 = vrot.lane.b32.xlu1 %v316_v8, %s5018_s8  ;;  %485 = vrot.lane.b32.xlu0 %v5093_v0, %s5017_s7 }
  0x4e   : > { %658 = vrot.lane.b32.xlu1 %v316_v8, %s7179_s10  ;;  %600 = vrot.lane.b32.xlu0 %v5093_v0, %s5019_s9 }
  0x52   : > { %493 = vrot.lane.b32.xlu1 %v5149_v10, %s5017_s7  ;;  %491 = vrot.lane.b32.xlu0 %v5143_v9, %s5017_s7 }
  0x56   : > { %551 = vrot.lane.b32.xlu1 %v318_v11, %s5018_s8  ;;  %549 = vrot.lane.b32.xlu0 %v5096_v1, %s5018_s8 }
  0x5a   : > { %608 = vrot.lane.b32.xlu1 %v5149_v10, %s5019_s9  ;;  %606 = vrot.lane.b32.xlu0 %v5143_v9, %s5019_s9 }
  0x5e   : > { %666 = vrot.lane.b32.xlu1 %v318_v11, %s7179_s10  ;;  %664 = vrot.lane.b32.xlu0 %v5096_v1, %s7179_s10 }
  0x62   : > { %719 = vrot.lane.b32.xlu1 %v5096_v1, %s7177_s11  ;;  %717 = vrot.lane.b32.xlu0 %v5104_v2, %s7177_s11 }
  0x66   : > { %777 = vrot.lane.b32.xlu1 %v317_v7, %s7175_s12  ;;  %775 = vrot.lane.b32.xlu0 %v5093_v0, %s7175_s12 }
  0x6a   : > { %834 = vrot.lane.b32.xlu1 %v5096_v1, %s7158_s13  ;;  %832 = vrot.lane.b32.xlu0 %v5104_v2, %s7158_s13 }
  0x6e   : > { %892 = vrot.lane.b32.xlu1 %v317_v7, %s7155_s14  ;;  %890 = vrot.lane.b32.xlu0 %v5093_v0, %s7155_s14 }
  0x72   : > { %773 = vrot.lane.b32.xlu1 %v316_v8, %s7175_s12  ;;  %715 = vrot.lane.b32.xlu0 %v5093_v0, %s7177_s11 }
  0x76   : > { %888 = vrot.lane.b32.xlu1 %v316_v8, %s7155_s14  ;;  %830 = vrot.lane.b32.xlu0 %v5093_v0, %s7158_s13 }
  0x7a   : > { %723 = vrot.lane.b32.xlu1 %v5149_v10, %s7177_s11  ;;  %721 = vrot.lane.b32.xlu0 %v5143_v9, %s7177_s11 }
  0x7e   : > { %781 = vrot.lane.b32.xlu1 %v318_v11, %s7175_s12  ;;  %779 = vrot.lane.b32.xlu0 %v5096_v1, %s7175_s12 }
  0x82   : > { %838 = vrot.lane.b32.xlu1 %v5149_v10, %s7158_s13  ;;  %836 = vrot.lane.b32.xlu0 %v5143_v9, %s7158_s13 }
  0x84   : > { %v323_v12 = vpop.permute.xlu1 %322  ;;  %v272_v13 = vpop.permute.xlu0 %271 }
  0x86   : > { %896 = vrot.lane.b32.xlu1 %v318_v11, %s7155_s14  ;;  %894 = vrot.lane.b32.xlu0 %v5096_v1, %s7155_s14 }
  0x88   : > { %v5235_v14 = vpop.permute.xlu1 %377  ;;  %v270_v15 = vpop.permute.xlu0 %269 }
  0x89   : > { %v285_v16 = vsel %vm283_vm0, %v270_v15, %v272_v13 }
  0x8a   : > { %300 = vst [vmem:[#allocation2 + $0x8] sm:$0xf] %v285_v16  ;;  %949 = vrot.lane.b32.xlu1 %v5096_v1, %s7153_s15  ;;  %947 = vrot.lane.b32.xlu0 %v5104_v2, %s7153_s15 }
  0x8c   : > { %v325_v18 = vpop.permute.xlu1 %324  ;;  %v376_v19 = vpop.permute.xlu0 %375 }
  0x8d   : > { %v338_v20 = vsel %vm336_vm1, %v323_v12, %v325_v18  ;;  %v391_v21 = vsel %vm389_vm2, %v376_v19, %v5235_v14 }
  0x8e   : > { %353 = vst [vmem:[#allocation2 + $0x8] sm:$0xf0] %v338_v20  ;;  %406 = vst [vmem:[#allocation2 + $0x48] sm:$0xf] %v391_v21  ;;  %1028 = vrot.lane.b32.xlu1 %v5107_v3, %s7162_s16  ;;  %1026 = vrot.lane.b32.xlu0 %v5244_v17, %s7162_s16 }
  0x90   : > { %v433_v22 = vpop.permute.xlu1 %432  ;;  %v431_v23 = vpop.permute.xlu0 %430 }
  0x91   : > { %v448_v24 = vsel %vm7164_vm3, %v431_v23, %v433_v22 }
  0x92   : > { %464 = vst [vmem:[#allocation2 + $0x48] sm:$0xf0] %v448_v24  ;;  %1080 = vrot.lane.b32.xlu1 %v5116_v5, %s7160_s17  ;;  %1078 = vrot.lane.b32.xlu0 %v5110_v4, %s7160_s17 }
  0x94   : > { %v321_v25 = vpop.permute.xlu1 %320  ;;  %v268_v26 = vpop.permute.xlu0 %267 }
  0x95   : > { %v337_v27 = vsel %vm336_vm1, %v321_v25, %v323_v12  ;;  %v284_v28 = vsel %vm283_vm0, %v268_v26, %v270_v15  ;;  %v1739_v33 = vld [vmem:[#allocation2 + $0x8] sm:$0xff] }
  0x96   : > { %352 = vst [vmem:[#allocation2] sm:$0xf0] %v337_v27  ;;  %299 = vst [vmem:[#allocation2] sm:$0xf] %v284_v28  ;;  %1024 = vrot.lane.b32.xlu1 %v5110_v4, %s7162_s16  ;;  %945 = vrot.lane.b32.xlu0 %v5093_v0, %s7153_s15 }
  0x98   : > { %v429_v29 = vpop.permute.xlu1 %428  ;;  %v374_v30 = vpop.permute.xlu0 %373 }
  0x99   : > { %v447_v31 = vsel %vm7164_vm3, %v429_v29, %v431_v23  ;;  %v390_v32 = vsel %vm389_vm2, %v374_v30, %v376_v19  ;;  %v1747_v34 = vld [vmem:[#allocation2 + $0x48] sm:$0xff] }
  0x9a   : > { %463 = vst [vmem:[#allocation2 + $0x40] sm:$0xf0] %v447_v31  ;;  %405 = vst [vmem:[#allocation2 + $0x40] sm:$0xf] %v390_v32  ;;  %951 = vrot.lane.b32.xlu1 %v5143_v9, %s7153_s15  ;;  %1076 = vrot.lane.b32.xlu0 %v5120_v6, %s7160_s17  ;;  %v1851_v36 = vpack.c.bf16 %v1747_v34, %v1739_v33 }
  0x9c   : > { %v5274_v37 = vpop.permute.xlu1 %275  ;;  %1935 = vmatprep.subr.bf16.mxu0 %v1851_v36  ;;  %v274_v38 = vpop.permute.xlu0 %273 }
  0x9d   : > { %v286_v39 = vsel %vm283_vm0, %v272_v13, %v274_v38  ;;  %v287_v40 = vsel %vm283_vm0, %v274_v38, %v5274_v37  ;;  %v1738_v46 = vld [vmem:[#allocation2] sm:$0xff] }
  0x9e   : > { %301 = vst [vmem:[#allocation2 + $0x10] sm:$0xf] %v286_v39  ;;  %302 = vst [vmem:[#allocation2 + $0x18] sm:$0xf] %v287_v40  ;;  %1030 = vrot.lane.b32.xlu1 %v5268_v35, %s7162_s16  ;;  %953 = vrot.lane.b32.xlu0 %v5149_v10, %s7153_s15 }
  0xa0   : > { %v5286_v42 = vpop.permute.xlu1 %328  ;;  %v327_v43 = vpop.permute.xlu0 %326 }
  0xa1   : > { %v339_v44 = vsel %vm336_vm1, %v325_v18, %v327_v43  ;;  %v340_v45 = vsel %vm336_vm1, %v327_v43, %v5286_v42  ;;  %v1746_v47 = vld [vmem:[#allocation2 + $0x40] sm:$0xff] }
  0xa2   : > { %354 = vst [vmem:[#allocation2 + $0x10] sm:$0xf0] %v339_v44  ;;  %355 = vst [vmem:[#allocation2 + $0x18] sm:$0xf0] %v340_v45  ;;  %1082 = vrot.lane.b32.xlu1 %v5107_v3, %s7160_s17  ;;  %1032 = vrot.lane.b32.xlu0 %v5284_v41, %s7162_s16  ;;  %v1850_v48 = vpack.c.bf16 %v1746_v47, %v1738_v46 }
  0xa4   : > { %v5299_v50 = vpop.permute.xlu1 %381  ;;  %1936 = vmatpush1.bf16.msra.mxu0 %v1850_v48  ;;  %v380_v51 = vpop.permute.xlu0 %379 }
  0xa5   : > { %v392_v52 = vsel %vm389_vm2, %v5235_v14, %v380_v51  ;;  %v393_v53 = vsel %vm389_vm2, %v380_v51, %v5299_v50 }
  0xa6   : > { %407 = vst [vmem:[#allocation2 + $0x50] sm:$0xf] %v392_v52  ;;  %408 = vst [vmem:[#allocation2 + $0x58] sm:$0xf] %v393_v53  ;;  %1130 = vrot.lane.b32.xlu1 %v5244_v17, %s7187_s18  ;;  %1084 = vrot.lane.b32.xlu0 %v5297_v49, %s7160_s17 }
  0xa8   : > { %v5309_v54 = vpop.permute.xlu1 %436  ;;  %v435_v55 = vpop.permute.xlu0 %434 }
  0xa9   : > { %v449_v56 = vsel %vm7164_vm3, %v433_v22, %v435_v55  ;;  %v450_v57 = vsel %vm7164_vm3, %v435_v55, %v5309_v54  ;;  %v1741_v63 = vld [vmem:[#allocation2 + $0x18] sm:$0xff]  ;;  %v1740_v2 = vld [vmem:[#allocation2 + $0x10] sm:$0xff] }
  0xaa   : > { %465 = vst [vmem:[#allocation2 + $0x50] sm:$0xf0] %v449_v56  ;;  %466 = vst [vmem:[#allocation2 + $0x58] sm:$0xf0] %v450_v57  ;;  %1182 = vrot.lane.b32.xlu1 %v5110_v4, %s7185_s19  ;;  %1132 = vrot.lane.b32.xlu0 %v5107_v3, %s7187_s18 }
  0xac   : > { %v490_v58 = vpop.permute.xlu1 %489  ;;  %v488_v59 = vpop.permute.xlu0 %487 }
  0xad   : > { %v505_v60 = vsel %vm7170_vm4, %v488_v59, %v490_v58 }
  0xae   : > { %521 = vst [vmem:[#allocation2 + $0x88] sm:$0xf] %v505_v60  ;;  %1236 = vrot.lane.b32.xlu1 %v5244_v17, %s7133_s20  ;;  %1184 = vrot.lane.b32.xlu0 %v5116_v5, %s7185_s19 }
  0xb0   : > { %v548_v61 = vpop.permute.xlu1 %547  ;;  %v546_v62 = vpop.permute.xlu0 %545 }
  0xb1   : > { %v563_v0 = vsel %vm7167_vm5, %v546_v62, %v548_v61  ;;  %v1749_v1 = vld [vmem:[#allocation2 + $0x58] sm:$0xff]  ;;  %v1748_v7 = vld [vmem:[#allocation2 + $0x50] sm:$0xff] }
  0xb2   : > { %579 = vst [vmem:[#allocation2 + $0x88] sm:$0xf0] %v563_v0  ;;  %1294 = vrot.lane.b32.xlu1 %v5110_v4, %s7131_s23  ;;  %1238 = vrot.lane.b32.xlu0 %v5107_v3, %s7133_s20  ;;  %v1853_v8 = vpack.c.bf16 %v1749_v1, %v1741_v63  ;;  %v1852_v9 = vpack.c.bf16 %v1748_v7, %v1740_v2 }
  0xb4   : > { %v605_v11 = vpop.permute.xlu1 %604  ;;  %1976 = vmatprep.subr.bf16.mxu1 %v1853_v8  ;;  %v603_v12 = vpop.permute.xlu0 %602 }
  0xb5   : > { %v620_v13 = vsel %vm7166_vm6, %v603_v12, %v605_v11  ;;  %1977 = vmatpush1.bf16.msra.mxu1 %v1852_v9 }
  0xb6   : > { %636 = vst [vmem:[#allocation2 + $0xc8] sm:$0xf] %v620_v13  ;;  %1128 = vrot.lane.b32.xlu1 %v5110_v4, %s7187_s18  ;;  %1296 = vrot.lane.b32.xlu0 %v5116_v5, %s7131_s23 }
  0xb8   : > { %v663_v14 = vpop.permute.xlu1 %662  ;;  %v661_v15 = vpop.permute.xlu0 %660 }
  0xb9   : > { %v678_v16 = vsel %vm7165_vm7, %v661_v15, %v663_v14  ;;  %v1755_v26 = vld [vmem:[#allocation2 + $0x88] sm:$0xff] }
  0xba   : > { %694 = vst [vmem:[#allocation2 + $0xc8] sm:$0xf0] %v678_v16  ;;  %1234 = vrot.lane.b32.xlu1 %v5110_v4, %s7133_s20  ;;  %1180 = vrot.lane.b32.xlu0 %v5120_v6, %s7185_s19 }
  0xbc   : > { %v544_v18 = vpop.permute.xlu1 %543  ;;  %v486_v19 = vpop.permute.xlu0 %485 }
  0xbd   : > { %v562_v20 = vsel %vm7167_vm5, %v544_v18, %v546_v62  ;;  %v504_v21 = vsel %vm7170_vm4, %v486_v19, %v488_v59 }
  0xbe   : > { %578 = vst [vmem:[#allocation2 + $0x80] sm:$0xf0] %v562_v20  ;;  %520 = vst [vmem:[#allocation2 + $0x80] sm:$0xf] %v504_v21  ;;  %1134 = vrot.lane.b32.xlu1 %v5268_v35, %s7187_s18  ;;  %1292 = vrot.lane.b32.xlu0 %v5120_v6, %s7131_s23 }
  0xc0   : > { %v659_v22 = vpop.permute.xlu1 %658  ;;  %v601_v23 = vpop.permute.xlu0 %600 }
  0xc1   : > { %v677_v24 = vsel %vm7165_vm7, %v659_v22, %v661_v15  ;;  %v619_v25 = vsel %vm7166_vm6, %v601_v23, %v603_v12  ;;  %v1763_v27 = vld [vmem:[#allocation2 + $0xc8] sm:$0xff] }
  0xc2   : > { %693 = vst [vmem:[#allocation2 + $0xc0] sm:$0xf0] %v677_v24  ;;  %635 = vst [vmem:[#allocation2 + $0xc0] sm:$0xf] %v619_v25  ;;  %1186 = vrot.lane.b32.xlu1 %v5107_v3, %s7185_s19  ;;  %1136 = vrot.lane.b32.xlu0 %v5284_v41, %s7187_s18  ;;  %v1859_v28 = vpack.c.bf16 %v1763_v27, %v1755_v26 }
  0xc4   : > { %v5350_v29 = vpop.permute.xlu1 %493  ;;  %1937 = vmatprep.subr.bf16.mxu0 %v1859_v28  ;;  %v492_v30 = vpop.permute.xlu0 %491 }
  0xc5   : > { %v506_v31 = vsel %vm7170_vm4, %v490_v58, %v492_v30  ;;  %v507_v32 = vsel %vm7170_vm4, %v492_v30, %v5350_v29  ;;  %v1754_v39 = vld [vmem:[#allocation2 + $0x80] sm:$0xff] }
  0xc6   : > { %522 = vst [vmem:[#allocation2 + $0x90] sm:$0xf] %v506_v31  ;;  %523 = vst [vmem:[#allocation2 + $0x98] sm:$0xf] %v507_v32  ;;  %1240 = vrot.lane.b32.xlu1 %v5268_v35, %s7133_s20  ;;  %1188 = vrot.lane.b32.xlu0 %v5297_v49, %s7185_s19 }
  0xc8   : > { %v5359_v33 = vpop.permute.xlu1 %551  ;;  %v550_v34 = vpop.permute.xlu0 %549 }
  0xc9   : > { %v564_v36 = vsel %vm7167_vm5, %v548_v61, %v550_v34  ;;  %v565_v38 = vsel %vm7167_vm5, %v550_v34, %v5359_v33  ;;  %v1762_v40 = vld [vmem:[#allocation2 + $0xc0] sm:$0xff] }
  0xca   : > { %580 = vst [vmem:[#allocation2 + $0x90] sm:$0xf0] %v564_v36  ;;  %581 = vst [vmem:[#allocation2 + $0x98] sm:$0xf0] %v565_v38  ;;  %1298 = vrot.lane.b32.xlu1 %v5107_v3, %s7131_s23  ;;  %1242 = vrot.lane.b32.xlu0 %v5284_v41, %s7133_s20  ;;  %v1858_v43 = vpack.c.bf16 %v1762_v40, %v1754_v39  ;;  %s7137_s20 = smov 27  }
  0xcc   : > { %v5368_v44 = vpop.permute.xlu1 %608  ;;  %1938 = vmatpush1.bf16.msra.mxu0 %v1858_v43  ;;  %v607_v45 = vpop.permute.xlu0 %606 }
  0xcd   : > { %v621_v46 = vsel %vm7166_vm6, %v605_v11, %v607_v45  ;;  %v622_v47 = vsel %vm7166_vm6, %v607_v45, %v5368_v44 }
  0xce   : > { %637 = vst [vmem:[#allocation2 + $0xd0] sm:$0xf] %v621_v46  ;;  %638 = vst [vmem:[#allocation2 + $0xd8] sm:$0xf] %v622_v47  ;;  %1351 = vrot.lane.b32.xlu1 %v5244_v17, %s7181_s24  ;;  %1300 = vrot.lane.b32.xlu0 %v5297_v49, %s7131_s23  ;;  %s7139_s23 = smov 28  }
  0xd0   : > { %v5377_v48 = vpop.permute.xlu1 %666  ;;  %v665_v51 = vpop.permute.xlu0 %664 }
  0xd1   : > { %v679_v52 = vsel %vm7165_vm7, %v663_v14, %v665_v51  ;;  %v680_v53 = vsel %vm7165_vm7, %v665_v51, %v5377_v48  ;;  %v1757_v60 = vld [vmem:[#allocation2 + $0x98] sm:$0xff]  ;;  %v1756_v63 = vld [vmem:[#allocation2 + $0x90] sm:$0xff] }
  0xd2   : > { %695 = vst [vmem:[#allocation2 + $0xd0] sm:$0xf0] %v679_v52  ;;  %696 = vst [vmem:[#allocation2 + $0xd8] sm:$0xf0] %v680_v53  ;;  %1409 = vrot.lane.b32.xlu1 %v5110_v4, %s7135_s25  ;;  %1353 = vrot.lane.b32.xlu0 %v5107_v3, %s7181_s24  ;;  %v5446_v51 = vld [vmem:[%s5090_s26 + $0x1c] sm:$0xff] }
  0xd3   : > { %1011 = vst.msk [vmem:[#allocation2 + $0x1b8] sm:$0xf0] %vm359_vm15, %v5446_v51 }
  0xd4   : > { %v720_v55 = vpop.permute.xlu1 %719  ;;  %v718_v56 = vpop.permute.xlu0 %717 }
  0xd5   : > { %v735_v57 = vsel %vm7169_vm8, %v718_v56, %v720_v55 }
  0xd6   : > { %751 = vst [vmem:[#allocation2 + $0x108] sm:$0xf] %v735_v57  ;;  %1466 = vrot.lane.b32.xlu1 %v5244_v17, %s7139_s23  ;;  %1411 = vrot.lane.b32.xlu0 %v5116_v5, %s7135_s25 }
  0xd8   : > { %v778_v58 = vpop.permute.xlu1 %777  ;;  %v776_v59 = vpop.permute.xlu0 %775 }
  0xd9   : > { %v793_v61 = vsel %vm7168_vm9, %v776_v59, %v778_v58  ;;  %v1765_v62 = vld [vmem:[#allocation2 + $0xd8] sm:$0xff]  ;;  %v1764_v0 = vld [vmem:[#allocation2 + $0xd0] sm:$0xff] }
  0xda   : > { %809 = vst [vmem:[#allocation2 + $0x108] sm:$0xf0] %v793_v61  ;;  %1524 = vrot.lane.b32.xlu1 %v5110_v4, %s7137_s20  ;;  %1468 = vrot.lane.b32.xlu0 %v5107_v3, %s7139_s23  ;;  %v1861_v1 = vpack.c.bf16 %v1765_v62, %v1757_v60  ;;  %v1860_v2 = vpack.c.bf16 %v1764_v0, %v1756_v63 }
  0xdc   : > { %v835_v7 = vpop.permute.xlu1 %834  ;;  %1978 = vmatprep.subr.bf16.mxu1 %v1861_v1  ;;  %v833_v8 = vpop.permute.xlu0 %832 }
  0xdd   : > { %v850_v9 = vsel %vm7157_vm10, %v833_v8, %v835_v7  ;;  %1979 = vmatpush1.bf16.msra.mxu1 %v1860_v2 }
  0xde   : > { %866 = vst [vmem:[#allocation2 + $0x148] sm:$0xf] %v850_v9  ;;  %1349 = vrot.lane.b32.xlu1 %v5110_v4, %s7181_s24  ;;  %1526 = vrot.lane.b32.xlu0 %v5116_v5, %s7137_s20 }
  0xe0   : > { %v893_v11 = vpop.permute.xlu1 %892  ;;  %v891_v12 = vpop.permute.xlu0 %890 }
  0xe1   : > { %v908_v13 = vsel %vm7144_vm11, %v891_v12, %v893_v11  ;;  %v1771_v23 = vld [vmem:[#allocation2 + $0x108] sm:$0xff] }
  0xe2   : > { %924 = vst [vmem:[#allocation2 + $0x148] sm:$0xf0] %v908_v13  ;;  %1464 = vrot.lane.b32.xlu1 %v5110_v4, %s7139_s23  ;;  %1407 = vrot.lane.b32.xlu0 %v5120_v6, %s7135_s25  ;;  %v5475_v13 = vcombine.high %v5149_v10, %v5149_v10 }
  0xe4   : > { %v774_v14 = vpop.permute.xlu1 %773  ;;  %v716_v15 = vpop.permute.xlu0 %715 }
  0xe5   : > { %v792_v16 = vsel %vm7168_vm9, %v774_v14, %v776_v59  ;;  %v734_v18 = vsel %vm7169_vm8, %v716_v15, %v718_v56 }
  0xe6   : > { %808 = vst [vmem:[#allocation2 + $0x100] sm:$0xf0] %v792_v16  ;;  %750 = vst [vmem:[#allocation2 + $0x100] sm:$0xf] %v734_v18  ;;  %1355 = vrot.lane.b32.xlu1 %v5268_v35, %s7181_s24  ;;  %1522 = vrot.lane.b32.xlu0 %v5120_v6, %s7137_s20 }
  0xe8   : > { %v889_v19 = vpop.permute.xlu1 %888  ;;  %v831_v20 = vpop.permute.xlu0 %830 }
  0xe9   : > { %v907_v21 = vsel %vm7144_vm11, %v889_v19, %v891_v12  ;;  %v849_v22 = vsel %vm7157_vm10, %v831_v20, %v833_v8  ;;  %v1779_v24 = vld [vmem:[#allocation2 + $0x148] sm:$0xff] }
  0xea   : > { %923 = vst [vmem:[#allocation2 + $0x140] sm:$0xf0] %v907_v21  ;;  %865 = vst [vmem:[#allocation2 + $0x140] sm:$0xf] %v849_v22  ;;  %1413 = vrot.lane.b32.xlu1 %v5107_v3, %s7135_s25  ;;  %1357 = vrot.lane.b32.xlu0 %v5284_v41, %s7181_s24  ;;  %v1867_v25 = vpack.c.bf16 %v1779_v24, %v1771_v23 }
  0xec   : > { %v5418_v26 = vpop.permute.xlu1 %723  ;;  %1939 = vmatprep.subr.bf16.mxu0 %v1867_v25  ;;  %v722_v27 = vpop.permute.xlu0 %721 }
  0xed   : > { %v736_v28 = vsel %vm7169_vm8, %v720_v55, %v722_v27  ;;  %v737_v30 = vsel %vm7169_vm8, %v722_v27, %v5418_v26  ;;  %v1770_v38 = vld [vmem:[#allocation2 + $0x100] sm:$0xff]  ;;  %v5452_v55 = vcombine.low %v5446_v51, %v5446_v51 }
  0xee   : > { %752 = vst [vmem:[#allocation2 + $0x110] sm:$0xf] %v736_v28  ;;  %753 = vst [vmem:[#allocation2 + $0x118] sm:$0xf] %v737_v30  ;;  %1470 = vrot.lane.b32.xlu1 %v5268_v35, %s7139_s23  ;;  %1415 = vrot.lane.b32.xlu0 %v5297_v49, %s7135_s25  ;;  %s7183_s25 = smov 19  }
  0xef   : > { %1010 = vst [vmem:[#allocation2 + $0x1b0] sm:$0xf0] %v5452_v55 }
  0xf0   : > { %v5427_v31 = vpop.permute.xlu1 %781  ;;  %v780_v32 = vpop.permute.xlu0 %779 }
  0xf1   : > { %v794_v34 = vsel %vm7168_vm9, %v778_v58, %v780_v32  ;;  %v795_v36 = vsel %vm7168_vm9, %v780_v32, %v5427_v31  ;;  %v1778_v39 = vld [vmem:[#allocation2 + $0x140] sm:$0xff]  ;;  %v5039_v32 = vmov 0  }
  0xf2   : > { %810 = vst [vmem:[#allocation2 + $0x110] sm:$0xf0] %v794_v34  ;;  %811 = vst [vmem:[#allocation2 + $0x118] sm:$0xf0] %v795_v36  ;;  %1528 = vrot.lane.b32.xlu1 %v5107_v3, %s7137_s20  ;;  %1472 = vrot.lane.b32.xlu0 %v5284_v41, %s7139_s23  ;;  %v1866_v40 = vpack.c.bf16 %v1778_v39, %v1770_v38  ;;  %s7171_s23 = smov 17  }
  0xf3   : > { %1967 = vmatprep.mubr.bf16.mxu0 %v5039_v32  ;;  %2008 = vmatprep.mubr.bf16.mxu1 %v5039_v32 }
  0xf4   : > { %v5436_v43 = vpop.permute.xlu1 %838  ;;  %1940 = vmatpush1.bf16.msra.mxu0 %v1866_v40  ;;  %v837_v45 = vpop.permute.xlu0 %836 }
  0xf5   : > { %v851_v46 = vsel %vm7157_vm10, %v835_v7, %v837_v45  ;;  %v852_v47 = vsel %vm7157_vm10, %v837_v45, %v5436_v43  ;;  %vm1906_vm10 = vcmask 883712  }
  0xf6   : > { %867 = vst [vmem:[#allocation2 + $0x150] sm:$0xf] %v851_v46  ;;  %868 = vst [vmem:[#allocation2 + $0x158] sm:$0xf] %v852_v47  ;;  %1579 = vrot.lane.b32.xlu1 %v5110_v4, %s7183_s25  ;;  %1530 = vrot.lane.b32.xlu0 %v5297_v49, %s7137_s20  ;;  %s7173_s20 = smov 18  }
  0xf8   : > { %v5448_v52 = vpop.permute.xlu1 %896  ;;  %v895_v53 = vpop.permute.xlu0 %894 }
  0xf9   : > { %v909_v56 = vsel %vm7144_vm11, %v893_v11, %v895_v53  ;;  %v910_v57 = vsel %vm7144_vm11, %v895_v53, %v5448_v52  ;;  %v1773_v63 = vld [vmem:[#allocation2 + $0x118] sm:$0xff]  ;;  %v1772_v2 = vld [vmem:[#allocation2 + $0x110] sm:$0xff]  ;;  %vm7146_vm11 = vcmask 310272  }
  0xfa   : > { %925 = vst [vmem:[#allocation2 + $0x150] sm:$0xf0] %v909_v56  ;;  %926 = vst [vmem:[#allocation2 + $0x158] sm:$0xf0] %v910_v57  ;;  %1583 = vrot.lane.b32.xlu1 %v5107_v3, %s7183_s25  ;;  %1581 = vrot.lane.b32.xlu0 %v5244_v17, %s7183_s25 }
  0xfc   : > { %v950_v58 = vpop.permute.xlu1 %949  ;;  %v948_v59 = vpop.permute.xlu0 %947 }
  0xfd   : > { %v965_v60 = vsel %vm7143_vm12, %v948_v59, %v950_v58 }
  0xfe   : > { %981 = vst [vmem:[#allocation2 + $0x188] sm:$0xf] %v965_v60  ;;  %1639 = vrot.lane.b32.xlu1 %v5110_v4, %s7173_s20  ;;  %1637 = vrot.lane.b32.xlu0 %v5120_v6, %s7173_s20 }
 0x100   : > { %v1029_v61 = vpop.permute.xlu1 %1028  ;;  %v1027_v62 = vpop.permute.xlu0 %1026 }
 0x101   : > { %v1042_v0 = vsel %vm7141_vm13, %v1027_v62, %v1029_v61  ;;  %v1781_v1 = vld [vmem:[#allocation2 + $0x158] sm:$0xff]  ;;  %v1780_v7 = vld [vmem:[#allocation2 + $0x150] sm:$0xff] }
 0x102   : > { %1057 = vst [vmem:[#allocation2 + $0x1c8] sm:$0xf] %v1042_v0  ;;  %1694 = vrot.lane.b32.xlu1 %v5110_v4, %s7171_s23  ;;  %1641 = vrot.lane.b32.xlu0 %v5116_v5, %s7173_s20  ;;  %v1869_v8 = vpack.c.bf16 %v1781_v1, %v1773_v63  ;;  %v1868_v6 = vpack.c.bf16 %v1780_v7, %v1772_v2  ;;  %v5482_v4 = vld [vmem:[%s5090_s26 + $0x18] sm:$0xff]  ;;  %v4973_v7 = vld [vmem:[%s5090_s26 + $0x20] ss:$0 sps:$4 sm:$0xff]  }
 0x103   : > { %v5492_v18 = vcombine.low %v5482_v4, %v5482_v4 }
 0x104   : > { %v1081_v9 = vpop.permute.xlu1 %1080  ;;  %1980 = vmatprep.subr.bf16.mxu1 %v1869_v8  ;;  %v1079_v11 = vpop.permute.xlu0 %1078 }
 0x105   : > { %v1094_v12 = vsel %vm7142_vm14, %v1079_v11, %v1081_v9  ;;  %1981 = vmatpush1.bf16.msra.mxu1 %v1868_v6  ;;  %v1787_v22 = vld [vmem:[#allocation2 + $0x188] sm:$0xff] }
 0x106   : > { %1109 = vst [vmem:[#allocation2 + $0x1c8] sm:$0xf0] %v1094_v12  ;;  %1698 = vrot.lane.b32.xlu1 %v5107_v3, %s7171_s23  ;;  %1696 = vrot.lane.b32.xlu0 %v5244_v17, %s7171_s23 }
 0x108   : > { %v1025_v5 = vpop.permute.xlu1 %1024  ;;  %v946_v14 = vpop.permute.xlu0 %945 }
 0x109   : > { %v1041_v15 = vsel %vm7141_vm13, %v1025_v5, %v1027_v62  ;;  %v964_v16 = vsel %vm7143_vm12, %v946_v14, %v948_v59 }
 0x10a   : > { %1056 = vst [vmem:[#allocation2 + $0x1c0] sm:$0xf] %v1041_v15  ;;  %980 = vst [vmem:[#allocation2 + $0x180] sm:$0xf] %v964_v16  ;;  %279 = vrot.lane.b32.xlu1 %v5482_v4, %s5014_s28  ;;  %277 = vrot.lane.b32.xlu0 %v5475_v13, %s5014_s28 }
 0x10c   : > { %v952_v17 = vpop.permute.xlu1 %951  ;;  %v1077_v19 = vpop.permute.xlu0 %1076 }
 0x10d   : > { %v966_v20 = vsel %vm7143_vm12, %v950_v58, %v952_v17  ;;  %v1093_v21 = vsel %vm7142_vm14, %v1077_v19, %v1079_v11  ;;  %v1795_v23 = vld [vmem:[#allocation2 + $0x1c8] sm:$0xff] }
 0x10e   : > { %982 = vst [vmem:[#allocation2 + $0x190] sm:$0xf] %v966_v20  ;;  %1108 = vst [vmem:[#allocation2 + $0x1c0] sm:$0xf0] %v1093_v21  ;;  %332 = vrot.lane.b32.xlu1 %v5492_v18, %s5013_s27  ;;  %330 = vrot.lane.b32.xlu0 %v5149_v10, %s5013_s27  ;;  %v1875_v24 = vpack.c.bf16 %v1795_v23, %v1787_v22 }
 0x110   : > { %v1031_v25 = vpop.permute.xlu1 %1030  ;;  %1941 = vmatprep.subr.bf16.mxu0 %v1875_v24  ;;  %v5500_v27 = vpop.permute.xlu0 %953 }
 0x111   : > { %v1043_v28 = vsel %vm7141_vm13, %v1029_v61, %v1031_v25  ;;  %v967_v30 = vsel %vm7143_vm12, %v952_v17, %v5500_v27  ;;  %v1786_v40 = vld [vmem:[#allocation2 + $0x180] sm:$0xff]  ;;  %vm7145_vm12 = vcmask 318464  }
 0x112   : > { %1058 = vst [vmem:[#allocation2 + $0x1d0] sm:$0xf] %v1043_v28  ;;  %983 = vst [vmem:[#allocation2 + $0x198] sm:$0xf] %v967_v30  ;;  %385 = vrot.lane.b32.xlu1 %v5482_v4, %s5015_s29  ;;  %383 = vrot.lane.b32.xlu0 %v5475_v13, %s5015_s29 }
 0x114   : > { %v1083_v34 = vpop.permute.xlu1 %1082  ;;  %v5511_v36 = vpop.permute.xlu0 %1032 }
 0x115   : > { %v1095_v38 = vsel %vm7142_vm14, %v1081_v9, %v1083_v34  ;;  %v1044_v39 = vsel %vm7141_vm13, %v1031_v25, %v5511_v36  ;;  %v1794_v45 = vld [vmem:[#allocation2 + $0x1c0] sm:$0xff]  ;;  %vm7148_vm13 = vcmask 965632  }
 0x116   : > { %1110 = vst [vmem:[#allocation2 + $0x1d0] sm:$0xf0] %v1095_v38  ;;  %1059 = vst [vmem:[#allocation2 + $0x1d8] sm:$0xf] %v1044_v39  ;;  %440 = vrot.lane.b32.xlu1 %v5492_v18, %s5016_s30  ;;  %438 = vrot.lane.b32.xlu0 %v5149_v10, %s5016_s30  ;;  %v1874_v46 = vpack.c.bf16 %v1794_v45, %v1786_v40  ;;  %v5570_v38 = vcombine.high %v5482_v4, %v5482_v4 }
 0x118   : > { %v1131_v47 = vpop.permute.xlu1 %1130  ;;  %1942 = vmatpush1.bf16.msra.mxu0 %v1874_v46  ;;  %v5520_v53 = vpop.permute.xlu0 %1084 }
 0x119   : > { %v1096_v56 = vsel %vm7142_vm14, %v1083_v34, %v5520_v53  ;;  %vm7147_vm14 = vcmask 957440   ;;  %v1789_v0 = vld [vmem:[#allocation2 + $0x198] sm:$0xff] }
 0x11a   : > { %1111 = vst [vmem:[#allocation2 + $0x1d8] sm:$0xf0] %v1096_v56  ;;  %1587 = vrot.lane.b32.xlu1 %v5284_v41, %s7183_s25  ;;  %1585 = vrot.lane.b32.xlu0 %v5268_v35, %s7183_s25 }
 0x11c   : > { %v1183_v57 = vpop.permute.xlu1 %1182  ;;  %v1133_v58 = vpop.permute.xlu0 %1132 }
 0x11d   : > { %v1146_v59 = vsel %vm7148_vm13, %v1131_v47, %v1133_v58  ;;  %v1796_v62 = vld [vmem:[#allocation2 + $0x1d0] sm:$0xff] }
 0x11e   : > { %1161 = vst [vmem:[#allocation2 + $0x208] sm:$0xf] %v1146_v59  ;;  %1645 = vrot.lane.b32.xlu1 %v5297_v49, %s7173_s20  ;;  %1643 = vrot.lane.b32.xlu0 %v5107_v3, %s7173_s20  ;;  %v1788_v49 = vld [vmem:[#allocation2 + $0x190] sm:$0xff] }
 0x11f   : > { %v1876_v3 = vpack.c.bf16 %v1796_v62, %v1788_v49 }
 0x120   : > { %v1237_v60 = vpop.permute.xlu1 %1236  ;;  %v1185_v61 = vpop.permute.xlu0 %1184 }
 0x121   : > { %v1198_v63 = vsel %vm7147_vm14, %v1183_v57, %v1185_v61  ;;  %v1797_v1 = vld [vmem:[#allocation2 + $0x1d8] sm:$0xff] }
 0x122   : > { %1213 = vst [vmem:[#allocation2 + $0x208] sm:$0xf0] %v1198_v63  ;;  %1702 = vrot.lane.b32.xlu1 %v5284_v41, %s7171_s23  ;;  %1700 = vrot.lane.b32.xlu0 %v5268_v35, %s7171_s23  ;;  %v1877_v2 = vpack.c.bf16 %v1797_v1, %v1789_v0  ;;  %v4974_v1 = vld [vmem:[%s5090_s26 + $0x20] ss:$0 sps:$4 sm:$0xff]  }
 0x124   : > { %v1295_v8 = vpop.permute.xlu1 %1294  ;;  %1982 = vmatprep.subr.bf16.mxu1 %v1877_v2  ;;  %v1239_v6 = vpop.permute.xlu0 %1238 }
 0x125   : > { %v1254_v9 = vsel %vm7145_vm12, %v1237_v60, %v1239_v6  ;;  %1983 = vmatpush1.bf16.msra.mxu1 %v1876_v3  ;;  %v590_v3 = vld [vmem:[%s5090_s26 + $0x20] sm:$0xf] }
 0x126   : > { %1270 = vst [vmem:[#allocation2 + $0x248] sm:$0xf] %v1254_v9  ;;  %444 = vrot.lane.b32.xlu1 %v4973_v7, %s5016_s30  ;;  %442 = vrot.lane.b32.xlu0 %v5482_v4, %s5016_s30 }
 0x128   : > { %v1129_v41 = vpop.permute.xlu1 %1128  ;;  %v1297_v35 = vpop.permute.xlu0 %1296 }
 0x129   : > { %v1145_v11 = vsel %vm7148_vm13, %v1129_v41, %v1131_v47  ;;  %v1312_v12 = vsel %vm7146_vm11, %v1295_v8, %v1297_v35  ;;  %v1803_v22 = vld [vmem:[#allocation2 + $0x208] sm:$0xff] }
 0x12a   : > { %1160 = vst [vmem:[#allocation2 + $0x200] sm:$0xf] %v1145_v11  ;;  %1328 = vst [vmem:[#allocation2 + $0x248] sm:$0xf0] %v1312_v12  ;;  %497 = vrot.lane.b32.xlu1 %v5482_v4, %s5017_s7  ;;  %495 = vrot.lane.b32.xlu0 %v5475_v13, %s5017_s7 }
 0x12c   : > { %v1235_v5 = vpop.permute.xlu1 %1234  ;;  %v1181_v14 = vpop.permute.xlu0 %1180 }
 0x12d   : > { %v1253_v15 = vsel %vm7145_vm12, %v1235_v5, %v1237_v60  ;;  %v1197_v16 = vsel %vm7147_vm14, %v1181_v14, %v1183_v57  ;;  %v4975_v14 = vld [vmem:[%s5090_s26 + $0x20] ss:$0 sps:$4 sm:$0xff]  }
 0x12e   : > { %1269 = vst [vmem:[#allocation2 + $0x240] sm:$0xf] %v1253_v15  ;;  %1212 = vst [vmem:[#allocation2 + $0x200] sm:$0xf0] %v1197_v16  ;;  %555 = vrot.lane.b32.xlu1 %v5492_v18, %s5018_s8  ;;  %553 = vrot.lane.b32.xlu0 %v5149_v10, %s5018_s8 }
 0x130   : > { %v1135_v17 = vpop.permute.xlu1 %1134  ;;  %v1293_v19 = vpop.permute.xlu0 %1292 }
 0x131   : > { %v1147_v20 = vsel %vm7148_vm13, %v1133_v58, %v1135_v17  ;;  %v1311_v21 = vsel %vm7146_vm11, %v1293_v19, %v1295_v8  ;;  %v1811_v23 = vld [vmem:[#allocation2 + $0x248] sm:$0xff] }
 0x132   : > { %1162 = vst [vmem:[#allocation2 + $0x210] sm:$0xf] %v1147_v20  ;;  %1327 = vst [vmem:[#allocation2 + $0x240] sm:$0xf0] %v1311_v21  ;;  %612 = vrot.lane.b32.xlu1 %v5482_v4, %s5019_s9  ;;  %610 = vrot.lane.b32.xlu0 %v5475_v13, %s5019_s9  ;;  %v1883_v24 = vpack.c.bf16 %v1811_v23, %v1803_v22 }
 0x134   : > { %v1187_v25 = vpop.permute.xlu1 %1186  ;;  %1943 = vmatprep.subr.bf16.mxu0 %v1883_v24  ;;  %v5563_v28 = vpop.permute.xlu0 %1136  ;;  %v4997_v24 = vld [vmem:[%s5090_s26 + $0x10] sm:$0xff] }
 0x135   : > { %v1199_v30 = vsel %vm7147_vm14, %v1185_v61, %v1187_v25  ;;  %v1148_v34 = vsel %vm7148_vm13, %v1135_v17, %v5563_v28  ;;  %v1802_v47 = vld [vmem:[#allocation2 + $0x200] sm:$0xff]  ;;  %vm7150_vm13 = vcmask 220160  }
 0x136   : > { %1214 = vst [vmem:[#allocation2 + $0x210] sm:$0xf0] %v1199_v30  ;;  %1163 = vst [vmem:[#allocation2 + $0x218] sm:$0xf] %v1148_v34  ;;  %670 = vrot.lane.b32.xlu1 %v5492_v18, %s7179_s10  ;;  %668 = vrot.lane.b32.xlu0 %v5149_v10, %s7179_s10  ;;  %v475_v61 = vld [vmem:[%s5090_s26 + $0x20] sm:$0xf] }
 0x138   : > { %v1241_v39 = vpop.permute.xlu1 %1240  ;;  %v5576_v40 = vpop.permute.xlu0 %1188 }
 0x139   : > { %v1255_v45 = vsel %vm7145_vm12, %v1239_v6, %v1241_v39  ;;  %v1200_v46 = vsel %vm7147_vm14, %v1187_v25, %v5576_v40  ;;  %v1810_v56 = vld [vmem:[#allocation2 + $0x240] sm:$0xff]  ;;  %vm7149_vm14 = vcmask 228352  }
 0x13a   : > { %1271 = vst [vmem:[#allocation2 + $0x250] sm:$0xf] %v1255_v45  ;;  %1215 = vst [vmem:[#allocation2 + $0x218] sm:$0xf0] %v1200_v46  ;;  %334 = vrot.lane.b32.xlu1 %v5482_v4, %s5013_s27  ;;  %281 = vrot.lane.b32.xlu0 %v5570_v38, %s5014_s28  ;;  %v1882_v10 = vpack.c.bf16 %v1810_v56, %v1802_v47 }
 0x13c   : > { %v1299_v57 = vpop.permute.xlu1 %1298  ;;  %1944 = vmatpush1.bf16.msra.mxu0 %v1882_v10  ;;  %v5585_v58 = vpop.permute.xlu0 %1242 }
 0x13d   : > { %v1313_v59 = vsel %vm7146_vm11, %v1297_v35, %v1299_v57  ;;  %v1256_v60 = vsel %vm7145_vm12, %v1241_v39, %v5585_v58  ;;  %vm7152_vm12 = vcmask 302080   ;;  %v1804_v5 = vld [vmem:[#allocation2 + $0x210] sm:$0xff] }
 0x13e   : > { %1329 = vst [vmem:[#allocation2 + $0x250] sm:$0xf0] %v1313_v59  ;;  %1272 = vst [vmem:[#allocation2 + $0x258] sm:$0xf] %v1256_v60  ;;  %499 = vrot.lane.b32.xlu1 %v5570_v38, %s5017_s7  ;;  %387 = vrot.lane.b32.xlu0 %v5570_v38, %s5015_s29 }
 0x140   : > { %v1352_v62 = vpop.permute.xlu1 %1351  ;;  %v5595_v63 = vpop.permute.xlu0 %1300 }
 0x141   : > { %v1314_v0 = vsel %vm7146_vm11, %v1299_v57, %v5595_v63  ;;  %vm7151_vm11 = vcmask 236544   ;;  %v1805_v35 = vld [vmem:[#allocation2 + $0x218] sm:$0xff] }
 0x142   : > { %1330 = vst [vmem:[#allocation2 + $0x258] sm:$0xf0] %v1314_v0  ;;  %557 = vrot.lane.b32.xlu1 %v5482_v4, %s5018_s8  ;;  %501 = vrot.lane.b32.xlu0 %v475_v61, %s5017_s7 }
 0x144   : > { %v1410_v2 = vpop.permute.xlu1 %1409  ;;  %v1354_v49 = vpop.permute.xlu0 %1353 }
 0x145   : > { %v1369_v7 = vsel %vm7152_vm12, %v1352_v62, %v1354_v49  ;;  %v1812_v9 = vld [vmem:[#allocation2 + $0x250] sm:$0xff] }
 0x146   : > { %1385 = vst [vmem:[#allocation2 + $0x288] sm:$0xf] %v1369_v7  ;;  %614 = vrot.lane.b32.xlu1 %v5570_v38, %s5019_s9  ;;  %559 = vrot.lane.b32.xlu0 %v4974_v1, %s5018_s8  ;;  %v1884_v15 = vpack.c.bf16 %v1812_v9, %v1804_v5  ;;  %v705_v1 = vld [vmem:[%s5090_s26 + $0x20] sm:$0xf] }
 0x148   : > { %v1467_v8 = vpop.permute.xlu1 %1466  ;;  %v1412_v6 = vpop.permute.xlu0 %1411 }
 0x149   : > { %v1427_v41 = vsel %vm7151_vm11, %v1410_v2, %v1412_v6  ;;  %v1813_v11 = vld [vmem:[#allocation2 + $0x258] sm:$0xff] }
 0x14a   : > { %1443 = vst [vmem:[#allocation2 + $0x288] sm:$0xf0] %v1427_v41  ;;  %672 = vrot.lane.b32.xlu1 %v5482_v4, %s7179_s10  ;;  %616 = vrot.lane.b32.xlu0 %v590_v3, %s5019_s9  ;;  %v1885_v12 = vpack.c.bf16 %v1813_v11, %v1805_v35  ;;  %v4976_v35 = vld [vmem:[%s5090_s26 + $0x20] ss:$0 sps:$4 sm:$0xff]  }
 0x14c   : > { %v1525_v16 = vpop.permute.xlu1 %1524  ;;  %1984 = vmatprep.subr.bf16.mxu1 %v1885_v12  ;;  %v1469_v17 = vpop.permute.xlu0 %1468 }
 0x14d   : > { %v1484_v19 = vsel %vm7149_vm14, %v1467_v8, %v1469_v17  ;;  %1985 = vmatpush1.bf16.msra.mxu1 %v1884_v15  ;;  %v820_v15 = vld [vmem:[%s5090_s26 + $0x20] sm:$0xf] }
 0x14e   : > { %1500 = vst [vmem:[#allocation2 + $0x2c8] sm:$0xf] %v1484_v19  ;;  %725 = vrot.lane.b32.xlu1 %v5475_v13, %s7177_s11  ;;  %674 = vrot.lane.b32.xlu0 %v4975_v14, %s7179_s10 }
 0x150   : > { %v1350_v20 = vpop.permute.xlu1 %1349  ;;  %v1527_v21 = vpop.permute.xlu0 %1526 }
 0x151   : > { %v1368_v22 = vsel %vm7152_vm12, %v1350_v20, %v1352_v62  ;;  %v1542_v23 = vsel %vm7150_vm13, %v1525_v16, %v1527_v21  ;;  %v1819_v10 = vld [vmem:[#allocation2 + $0x288] sm:$0xff]  ;;  %v4977_v20 = vld [vmem:[%s5090_s26 + $0x20] ss:$0 sps:$4 sm:$0xff]  }
 0x152   : > { %1384 = vst [vmem:[#allocation2 + $0x280] sm:$0xf] %v1368_v22  ;;  %1558 = vst [vmem:[#allocation2 + $0x2c8] sm:$0xf0] %v1542_v23  ;;  %783 = vrot.lane.b32.xlu1 %v4997_v24, %s7175_s12  ;;  %727 = vrot.lane.b32.xlu0 %v5482_v4, %s7177_s11 }
 0x154   : > { %v1465_v25 = vpop.permute.xlu1 %1464  ;;  %v1408_v30 = vpop.permute.xlu0 %1407 }
 0x155   : > { %v1483_v34 = vsel %vm7149_vm14, %v1465_v25, %v1467_v8  ;;  %v1426_v39 = vsel %vm7151_vm11, %v1408_v30, %v1410_v2  ;;  %v990_v2 = vld [vmem:[%s5090_s26 + $0x14] sm:$0xff] }
 0x156   : > { %1499 = vst [vmem:[#allocation2 + $0x2c0] sm:$0xf] %v1483_v34  ;;  %1442 = vst [vmem:[#allocation2 + $0x280] sm:$0xf0] %v1426_v39  ;;  %840 = vrot.lane.b32.xlu1 %v5475_v13, %s7158_s13  ;;  %785 = vrot.lane.b32.xlu0 %v5492_v18, %s7175_s12  ;;  %v998_v3 = vcombine.low %v990_v2, %v990_v2  ;;  %v5677_v25 = vld [vmem:[%s5090_s26 + $0x14] sm:$0xff] }
 0x157   : > { %1009 = vst [vmem:[#allocation2 + $0x1a8] sm:$0xf0] %v990_v2  ;;  %v5681_v30 = vcombine.high %v5677_v25, %v5677_v25 }
 0x158   : > { %v1356_v45 = vpop.permute.xlu1 %1355  ;;  %v1523_v46 = vpop.permute.xlu0 %1522  ;;  %1008 = vst [vmem:[#allocation2 + $0x1a0] sm:$0xf0] %v998_v3 }
 0x159   : > { %v1370_v47 = vsel %vm7152_vm12, %v1354_v49, %v1356_v45  ;;  %v1541_v56 = vsel %vm7150_vm13, %v1523_v46, %v1525_v16  ;;  %v1827_v57 = vld [vmem:[#allocation2 + $0x2c8] sm:$0xff] }
 0x15a   : > { %1386 = vst [vmem:[#allocation2 + $0x290] sm:$0xf] %v1370_v47  ;;  %1557 = vst [vmem:[#allocation2 + $0x2c0] sm:$0xf0] %v1541_v56  ;;  %898 = vrot.lane.b32.xlu1 %v4997_v24, %s7155_s14  ;;  %842 = vrot.lane.b32.xlu0 %v5482_v4, %s7158_s13  ;;  %v1891_v59 = vpack.c.bf16 %v1827_v57, %v1819_v10 }
 0x15c   : > { %v1414_v60 = vpop.permute.xlu1 %1413  ;;  %1945 = vmatprep.subr.bf16.mxu0 %v1891_v59  ;;  %v5634_v61 = vpop.permute.xlu0 %1357 }
 0x15d   : > { %v1428_v62 = vsel %vm7151_vm11, %v1412_v6, %v1414_v60  ;;  %v1371_v0 = vsel %vm7152_vm12, %v1356_v45, %v5634_v61  ;;  %v1818_v9 = vld [vmem:[#allocation2 + $0x280] sm:$0xff]  ;;  %vm1910_vm12 = vcmask 1045504  }
 0x15e   : > { %1444 = vst [vmem:[#allocation2 + $0x290] sm:$0xf0] %v1428_v62  ;;  %1387 = vst [vmem:[#allocation2 + $0x298] sm:$0xf] %v1371_v0  ;;  %729 = vrot.lane.b32.xlu1 %v5570_v38, %s7177_s11  ;;  %900 = vrot.lane.b32.xlu0 %v5492_v18, %s7155_s14 }
 0x160   : > { %v1471_v49 = vpop.permute.xlu1 %1470  ;;  %v5645_v7 = vpop.permute.xlu0 %1415 }
 0x161   : > { %v1485_v8 = vsel %vm7149_vm14, %v1469_v17, %v1471_v49  ;;  %v1429_v6 = vsel %vm7151_vm11, %v1414_v60, %v5645_v7  ;;  %v1826_v41 = vld [vmem:[#allocation2 + $0x2c0] sm:$0xff]  ;;  %vm1712_vm11 = vcmask 138240  }
 0x162   : > { %1501 = vst [vmem:[#allocation2 + $0x2d0] sm:$0xf] %v1485_v8  ;;  %1445 = vst [vmem:[#allocation2 + $0x298] sm:$0xf0] %v1429_v6  ;;  %787 = vrot.lane.b32.xlu1 %v5482_v4, %s7175_s12  ;;  %731 = vrot.lane.b32.xlu0 %v705_v1, %s7177_s11  ;;  %v1890_v18 = vpack.c.bf16 %v1826_v41, %v1818_v9 }
 0x164   : > { %v1529_v11 = vpop.permute.xlu1 %1528  ;;  %1946 = vmatpush1.bf16.msra.mxu0 %v1890_v18  ;;  %v5654_v12 = vpop.permute.xlu0 %1472 }
 0x165   : > { %v1543_v5 = vsel %vm7150_vm13, %v1527_v21, %v1529_v11  ;;  %v1486_v14 = vsel %vm7149_vm14, %v1471_v49, %v5654_v12  ;;  %vm1597_vm14 = vcmask 154624   ;;  %v1820_v57 = vld [vmem:[#allocation2 + $0x290] sm:$0xff]  ;;  %v935_v49 = vld [vmem:[%s5090_s26 + $0x20] sm:$0xf] }
 0x166   : > { %1559 = vst [vmem:[#allocation2 + $0x2d0] sm:$0xf0] %v1543_v5  ;;  %1502 = vst [vmem:[#allocation2 + $0x2d8] sm:$0xf] %v1486_v14  ;;  %844 = vrot.lane.b32.xlu1 %v5570_v38, %s7158_s13  ;;  %789 = vrot.lane.b32.xlu0 %v4976_v35, %s7175_s12 }
 0x168   : > { %v1580_v16 = vpop.permute.xlu1 %1579  ;;  %v5663_v17 = vpop.permute.xlu0 %1530 }
 0x169   : > { %v1544_v19 = vsel %vm7150_vm13, %v1529_v11, %v5663_v17  ;;  %vm1655_vm13 = vcmask 146432   ;;  %v1821_v47 = vld [vmem:[#allocation2 + $0x298] sm:$0xff] }
 0x16a   : > { %1560 = vst [vmem:[#allocation2 + $0x2d8] sm:$0xf0] %v1544_v19  ;;  %902 = vrot.lane.b32.xlu1 %v5482_v4, %s7155_s14  ;;  %846 = vrot.lane.b32.xlu0 %v820_v15, %s7158_s13  ;;  %s7189_s13 = smov 39  }
 0x16c   : > { %v5671_v21 = vpop.permute.xlu1 %1583  ;;  %v1582_v22 = vpop.permute.xlu0 %1581 }
 0x16d   : > { %v1598_v23 = vsel %vm1597_vm14, %v1580_v16, %v1582_v22  ;;  %v1599_v24 = vsel %vm1597_vm14, %v1582_v22, %v5671_v21  ;;  %v1828_v45 = vld [vmem:[#allocation2 + $0x2d0] sm:$0xff] }
 0x16e   : > { %1614 = vst [vmem:[#allocation2 + $0x300] sm:$0xf] %v1598_v23  ;;  %1615 = vst [vmem:[#allocation2 + $0x308] sm:$0xf] %v1599_v24  ;;  %955 = vrot.lane.b32.xlu1 %v5475_v13, %s7153_s15  ;;  %904 = vrot.lane.b32.xlu0 %v4977_v20, %s7155_s14  ;;  %v1892_v13 = vpack.c.bf16 %v1828_v45, %v1820_v57  ;;  %v5739_v24 = vld [vmem:[%s7127_s3] sm:$0xf] }
 0x16f   : > { %s7190_s14 = smov 38  }
 0x170   : > { %v1640_v34 = vpop.permute.xlu1 %1639  ;;  %v1638_v39 = vpop.permute.xlu0 %1637 }
 0x171   : > { %v1656_v46 = vsel %vm1655_vm13, %v1638_v39, %v1640_v34  ;;  %v1829_v56 = vld [vmem:[#allocation2 + $0x2d8] sm:$0xff] }
 0x172   : > { %1672 = vst [vmem:[#allocation2 + $0x300] sm:$0xf0] %v1656_v46  ;;  %1034 = vrot.lane.b32.xlu1 %v5681_v30, %s7162_s16  ;;  %957 = vrot.lane.b32.xlu0 %v5482_v4, %s7153_s15  ;;  %v1893_v10 = vpack.c.bf16 %v1829_v56, %v1821_v47  ;;  %v5753_v46 = vcombine.high %v5446_v51, %v5446_v51 }
 0x174   : > { %v1695_v59 = vpop.permute.xlu1 %1694  ;;  %1986 = vmatprep.subr.bf16.mxu1 %v1893_v10  ;;  %v5691_v60 = vpop.permute.xlu0 %1641 }
 0x175   : > { %v1657_v62 = vsel %vm1655_vm13, %v1640_v34, %v5691_v60  ;;  %1987 = vmatpush1.bf16.msra.mxu1 %v1892_v13 }
 0x176   : > { %1673 = vst [vmem:[#allocation2 + $0x308] sm:$0xf0] %v1657_v62  ;;  %1086 = vrot.lane.b32.xlu1 %v5677_v25, %s7160_s17  ;;  %1036 = vrot.lane.b32.xlu0 %v5446_v51, %s7162_s16 }
 0x178   : > { %v5699_v4 = vpop.permute.xlu1 %1698  ;;  %v1697_v0 = vpop.permute.xlu0 %1696 }
 0x179   : > { %v1713_v1 = vsel %vm1712_vm11, %v1695_v59, %v1697_v0  ;;  %v1714_v2 = vsel %vm1712_vm11, %v1697_v0, %v5699_v4  ;;  %v1834_v18 = vld [vmem:[#allocation2 + $0x300] sm:$0xff] }
 0x17a   : > { %1729 = vst [vmem:[#allocation2 + $0x340] sm:$0xf] %v1713_v1  ;;  %1730 = vst [vmem:[#allocation2 + $0x348] sm:$0xf] %v1714_v2  ;;  %959 = vrot.lane.b32.xlu1 %v5570_v38, %s7153_s15  ;;  %1088 = vrot.lane.b32.xlu0 %v5452_v55, %s7160_s17 }
 0x17c   : > { %v5709_v3 = vpop.permute.xlu1 %279  ;;  %v278_v8 = vpop.permute.xlu0 %277 }
 0x17d   : > { %v288_v6 = vsel %vm283_vm0, %v5274_v37, %v278_v8  ;;  %v289_v9 = vsel %vm283_vm0, %v278_v8, %v5709_v3  ;;  %v1835_v11 = vld [vmem:[#allocation2 + $0x308] sm:$0xff] }
 0x17e   : > { %303 = vst [vmem:[#allocation2 + $0x20] sm:$0xf] %v288_v6  ;;  %304 = vst [vmem:[#allocation2 + $0x28] sm:$0xf] %v289_v9  ;;  %1138 = vrot.lane.b32.xlu1 %v5681_v30, %s7187_s18  ;;  %961 = vrot.lane.b32.xlu0 %v935_v49, %s7153_s15  ;;  %v1224_v6 = vld [vmem:[%s5090_s26 + $0x24] sm:$0xf] }
 0x17f   : > { %s7191_s15 = smov 29  }
 0x180   : > { %v5718_v38 = vpop.permute.xlu1 %332  ;;  %v331_v41 = vpop.permute.xlu0 %330 }
 0x181   : > { %v341_v35 = vsel %vm336_vm1, %v5286_v42, %v331_v41  ;;  %v342_v37 = vsel %vm336_vm1, %v331_v41, %v5718_v38  ;;  %v1843_v5 = vld [vmem:[#allocation2 + $0x348] sm:$0xf]  ;;  %v1842_v14 = vld [vmem:[#allocation2 + $0x340] sm:$0xf] }
 0x182   : > { %356 = vst [vmem:[#allocation2 + $0x20] sm:$0xf0] %v341_v35  ;;  %357 = vst [vmem:[#allocation2 + $0x28] sm:$0xf0] %v342_v37  ;;  %1190 = vrot.lane.b32.xlu1 %v5677_v25, %s7185_s19  ;;  %1140 = vrot.lane.b32.xlu0 %v5446_v51, %s7187_s18  ;;  %v1899_v15 = vpack.c.bf16 %v1843_v5, %v1835_v11  ;;  %v1898_v16 = vpack.c.bf16 %v1842_v14, %v1834_v18  ;;  %v4980_v35 = vld [vmem:[%s5090_s26 + $0x24] ss:$0 sps:$4 sm:$0xff]  }
 0x184   : > { %v5728_v19 = vpop.permute.xlu1 %385  ;;  %4889 = vmatprep.subr.msk.bf16.mxu0 %vm1910_vm12, %v1899_v15  ;;  %v384_v42 = vpop.permute.xlu0 %383  ;;  %v1912_v20 = vsel %vm1910_vm12, %v1898_v16, 0 }
 0x185   : > { %v394_v22 = vsel %vm389_vm2, %v5299_v50, %v384_v42  ;;  %v395_v23 = vsel %vm389_vm2, %v384_v42, %v5728_v19  ;;  %1948 = vmatpush1.bf16.msra.mxu0 %v1912_v20 }
 0x186   : > { %409 = vst [vmem:[#allocation2 + $0x60] sm:$0xf] %v394_v22  ;;  %410 = vst [vmem:[#allocation2 + $0x68] sm:$0xf] %v395_v23  ;;  %1244 = vrot.lane.b32.xlu1 %v5681_v30, %s7189_s13  ;;  %1192 = vrot.lane.b32.xlu0 %v5452_v55, %s7185_s19 }
 0x188   : > { %v441_v34 = vpop.permute.xlu1 %440  ;;  %v439_v50 = vpop.permute.xlu0 %438  ;;  %4890 = vmatmul.mubr.msk.bf16.vlgmr.msra.gmra.mrb[0].mxu0 %vm1906_vm10, %v5739_v24 }
 0x189   : > { %v451_v39 = vsel %vm7164_vm3, %v5309_v54, %v439_v50  ;;  %v452_v45 = vsel %vm7164_vm3, %v439_v50, %v441_v34  ;;  %2049 = vmatprep.mubr.bf16.mxu0 %v5039_v32  ;;  %v1743_v59 = vld [vmem:[#allocation2 + $0x28] sm:$0xff]  ;;  %v1742_v1 = vld [vmem:[#allocation2 + $0x20] sm:$0xff] }
 0x18a   : > { %467 = vst [vmem:[#allocation2 + $0x60] sm:$0xf0] %v451_v39  ;;  %468 = vst [vmem:[#allocation2 + $0x68] sm:$0xf0] %v452_v45  ;;  %1302 = vrot.lane.b32.xlu1 %v5677_v25, %s7190_s14  ;;  %1246 = vrot.lane.b32.xlu0 %v5446_v51, %s7189_s13 }
 0x18c   : > { %v5759_v47 = vpop.permute.xlu1 %1587  ;;  %v1586_v56 = vpop.permute.xlu0 %1585 }
 0x18d   : > { %v1600_v54 = vsel %vm1597_vm14, %v5671_v21, %v1586_v56  ;;  %v1601_v10 = vsel %vm1597_vm14, %v1586_v56, %v5759_v47 }
 0x18e   : > { %1616 = vst [vmem:[#allocation2 + $0x310] sm:$0xf] %v1600_v54  ;;  %1617 = vst [vmem:[#allocation2 + $0x318] sm:$0xf] %v1601_v10  ;;  %1038 = vrot.lane.b32.xlu1 %v5753_v46, %s7162_s16  ;;  %1304 = vrot.lane.b32.xlu0 %v5452_v55, %s7190_s14  ;;  %s7193_s16 = smov 27  }
 0x190   : > { %v5769_v57 = vpop.permute.xlu1 %1645  ;;  %v1644_v13 = vpop.permute.xlu0 %1643 }
 0x191   : > { %v1658_v62 = vsel %vm1655_vm13, %v5691_v60, %v1644_v13  ;;  %v1659_v21 = vsel %vm1655_vm13, %v1644_v13, %v5769_v57  ;;  %v1751_v0 = vld [vmem:[#allocation2 + $0x68] sm:$0xff]  ;;  %v1750_v2 = vld [vmem:[#allocation2 + $0x60] sm:$0xff] }
 0x192   : > { %1674 = vst [vmem:[#allocation2 + $0x310] sm:$0xf0] %v1658_v62  ;;  %1675 = vst [vmem:[#allocation2 + $0x318] sm:$0xf0] %v1659_v21  ;;  %1248 = vrot.lane.b32.xlu1 %v5753_v46, %s7189_s13  ;;  %1090 = vrot.lane.b32.xlu0 %v5446_v51, %s7160_s17  ;;  %v1855_v49 = vpack.c.bf16 %v1751_v0, %v1743_v59  ;;  %v1854_v8 = vpack.c.bf16 %v1750_v2, %v1742_v1  ;;  %s7192_s17 = smov 28  }
 0x194   : > { %v5780_v9 = vpop.permute.xlu1 %1702  ;;  %2017 = vmatprep.subr.bf16.mxu0 %v1855_v49  ;;  %v1701_v60 = vpop.permute.xlu0 %1700 }
 0x195   : > { %v1715_v41 = vsel %vm1712_vm11, %v5699_v4, %v1701_v60  ;;  %v1716_v18 = vsel %vm1712_vm11, %v1701_v60, %v5780_v9  ;;  %2018 = vmatpush1.bf16.msra.mxu0 %v1854_v8  ;;  %v1339_v8 = vld [vmem:[%s5090_s26 + $0x24] sm:$0xf] }
 0x196   : > { %1731 = vst [vmem:[#allocation2 + $0x350] sm:$0xf] %v1715_v41  ;;  %1732 = vst [vmem:[#allocation2 + $0x358] sm:$0xf] %v1716_v18  ;;  %1306 = vrot.lane.b32.xlu1 %v5446_v51, %s7190_s14  ;;  %1250 = vrot.lane.b32.xlu0 %v1224_v6, %s7189_s13 }
 0x198   : > { %v445_v37 = vpop.permute.xlu1 %444  ;;  %v443_v11 = vpop.permute.xlu0 %442 }
 0x199   : > { %v453_v5 = vsel %vm7164_vm3, %v441_v34, %v443_v11  ;;  %v454_v14 = vsel %vm7164_vm3, %v443_v11, %v445_v37  ;;  %v1837_v16 = vld [vmem:[#allocation2 + $0x318] sm:$0xff]  ;;  %v1836_v23 = vld [vmem:[#allocation2 + $0x310] sm:$0xff]  ;;  %vm306_vm3 = vcmask 846848  }
 0x19a   : > { %469 = vst [vmem:[#allocation2 + $0x70] sm:$0xf0] %v453_v5  ;;  %470 = vst.msk [vmem:[#allocation2 + $0x78] sm:$0xf0] %vm359_vm15, %v454_v14  ;;  %1359 = vrot.lane.b32.xlu1 %v5681_v30, %s7181_s24  ;;  %1308 = vrot.lane.b32.xlu0 %v4980_v35, %s7190_s14  ;;  %v4981_v14 = vld [vmem:[%s5090_s26 + $0x24] ss:$0 sps:$4 sm:$0xff]  }
 0x19c   : > { %v498_v4 = vpop.permute.xlu1 %497  ;;  %v496_v15 = vpop.permute.xlu0 %495 }
 0x19d   : > { %v508_v42 = vsel %vm7170_vm4, %v5350_v29, %v496_v15  ;;  %v509_v20 = vsel %vm7170_vm4, %v496_v15, %v498_v4  ;;  %v1845_v22 = vld [vmem:[#allocation2 + $0x358] sm:$0xf]  ;;  %v1844_v34 = vld [vmem:[#allocation2 + $0x350] sm:$0xf] }
 0x19e   : > { %524 = vst [vmem:[#allocation2 + $0xa0] sm:$0xf] %v508_v42  ;;  %525 = vst [vmem:[#allocation2 + $0xa8] sm:$0xf] %v509_v20  ;;  %1417 = vrot.lane.b32.xlu1 %v5677_v25, %s7191_s15  ;;  %1361 = vrot.lane.b32.xlu0 %v5446_v51, %s7181_s24  ;;  %v1901_v50 = vpack.c.bf16 %v1845_v22, %v1837_v16  ;;  %v1900_v39 = vpack.c.bf16 %v1844_v34, %v1836_v23  ;;  %v1454_v42 = vld [vmem:[%s5090_s26 + $0x24] sm:$0xf] }
 0x1a0   : > { %v556_v45 = vpop.permute.xlu1 %555  ;;  %4891 = vmatprep.subr.msk.bf16.mxu1 %vm1910_vm12, %v1901_v50  ;;  %v554_v56 = vpop.permute.xlu0 %553  ;;  %v1918_v29 = vsel %vm1910_vm12, %v1900_v39, 0 }
 0x1a1   : > { %v566_v54 = vsel %vm7167_vm5, %v5359_v33, %v554_v56  ;;  %v567_v10 = vsel %vm7167_vm5, %v554_v56, %v556_v45  ;;  %1989 = vmatpush1.bf16.msra.mxu1 %v1918_v29 }
 0x1a2   : > { %582 = vst [vmem:[#allocation2 + $0xa0] sm:$0xf0] %v566_v54  ;;  %583 = vst [vmem:[#allocation2 + $0xa8] sm:$0xf0] %v567_v10  ;;  %1474 = vrot.lane.b32.xlu1 %v5681_v30, %s7192_s17  ;;  %1419 = vrot.lane.b32.xlu0 %v5452_v55, %s7191_s15  ;;  %v4982_v10 = vld [vmem:[%s5090_s26 + $0x24] ss:$0 sps:$4 sm:$0xff]  }
 0x1a4   : > { %v613_v13 = vpop.permute.xlu1 %612  ;;  %v611_v59 = vpop.permute.xlu0 %610  ;;  %4892 = vmatmul.mubr.msk.bf16.vlgmr.msra.gmra.mrb[0].mxu1 %vm1906_vm10, %v5739_v24 }
 0x1a5   : > { %v623_v62 = vsel %vm7166_vm6, %v5368_v44, %v611_v59  ;;  %v624_v33 = vsel %vm7166_vm6, %v611_v59, %v613_v13  ;;  %2090 = vmatprep.mubr.bf16.mxu1 %v5039_v32 }
 0x1a6   : > { %639 = vst [vmem:[#allocation2 + $0xe0] sm:$0xf] %v623_v62  ;;  %640 = vst [vmem:[#allocation2 + $0xe8] sm:$0xf] %v624_v33  ;;  %1532 = vrot.lane.b32.xlu1 %v5677_v25, %s7193_s16  ;;  %1476 = vrot.lane.b32.xlu0 %v5446_v51, %s7192_s17 }
 0x1a8   : > { %v5822_v21 = vpop.permute.xlu1 %670  ;;  %v669_v0 = vpop.permute.xlu0 %668 }
 0x1a9   : > { %v681_v1 = vsel %vm7165_vm7, %v5377_v48, %v669_v0  ;;  %v682_v44 = vsel %vm7165_vm7, %v669_v0, %v5822_v21  ;;  %v1758_v35 = vld [vmem:[#allocation2 + $0xa0] sm:$0xff] }
 0x1aa   : > { %697 = vst [vmem:[#allocation2 + $0xe0] sm:$0xf0] %v681_v1  ;;  %698 = vst [vmem:[#allocation2 + $0xe8] sm:$0xf0] %v682_v44  ;;  %1142 = vrot.lane.b32.xlu1 %v5753_v46, %s7187_s18  ;;  %1534 = vrot.lane.b32.xlu0 %v5452_v55, %s7193_s16 }
 0x1ac   : > { %v335_v32 = vpop.permute.xlu1 %334  ;;  %v282_v2 = vpop.permute.xlu0 %281 }
 0x1ad   : > { %v343_v49 = vsel %vm336_vm1, %v5718_v38, %v335_v32  ;;  %360 = vst.msk [vmem:[#allocation2 + $0x38] sm:$0xf0] %vm359_vm15, %v335_v32  ;;  %v290_v48 = vsel %vm283_vm0, %v5709_v3, %v282_v2  ;;  %v1759_v38 = vld [vmem:[#allocation2 + $0xa8] sm:$0xff] }
 0x1ae   : > { %307 = vst.msk [vmem:[#allocation2 + $0x38] sm:$0xf] %vm306_vm3, %v282_v2  ;;  %358 = vst [vmem:[#allocation2 + $0x30] sm:$0xf0] %v343_v49  ;;  %1363 = vrot.lane.b32.xlu1 %v5753_v46, %s7181_s24  ;;  %1194 = vrot.lane.b32.xlu0 %v5446_v51, %s7185_s19 }
 0x1af   : > { %305 = vst [vmem:[#allocation2 + $0x30] sm:$0xf] %v290_v48 }
 0x1b0   : > { %v500_v6 = vpop.permute.xlu1 %499  ;;  %v388_v60 = vpop.permute.xlu0 %387 }
 0x1b1   : > { %v510_v41 = vsel %vm7170_vm4, %v498_v4, %v500_v6  ;;  %v396_v3 = vsel %vm389_vm2, %v5728_v19, %v388_v60  ;;  %412 = vst.msk [vmem:[#allocation2 + $0x78] sm:$0xf] %vm306_vm3, %v388_v60  ;;  %v1767_v18 = vld [vmem:[#allocation2 + $0xe8] sm:$0xff]  ;;  %v1766_v37 = vld [vmem:[#allocation2 + $0xe0] sm:$0xff] }
 0x1b2   : > { %526 = vst [vmem:[#allocation2 + $0xb0] sm:$0xf] %v510_v41  ;;  %411 = vst [vmem:[#allocation2 + $0x70] sm:$0xf] %v396_v3  ;;  %1421 = vrot.lane.b32.xlu1 %v5446_v51, %s7191_s15  ;;  %1365 = vrot.lane.b32.xlu0 %v1339_v8, %s7181_s24  ;;  %v1863_v11 = vpack.c.bf16 %v1767_v18, %v1759_v38  ;;  %v1862_v5 = vpack.c.bf16 %v1766_v37, %v1758_v35  ;;  %v1569_v3 = vld [vmem:[%s5090_s26 + $0x24] sm:$0xf] }
 0x1b4   : > { %v558_v4 = vpop.permute.xlu1 %557  ;;  %2019 = vmatprep.subr.bf16.mxu0 %v1863_v11  ;;  %v502_v15 = vpop.permute.xlu0 %501  ;;  %v4983_v11 = vld [vmem:[%s5090_s26 + $0x24] ss:$0 sps:$4 sm:$0xff]  }
 0x1b5   : > { %v568_v19 = vsel %vm7167_vm5, %v556_v45, %v558_v4  ;;  %v511_v16 = vsel %vm7170_vm4, %v500_v6, %v502_v15  ;;  %2020 = vmatpush1.bf16.msra.mxu0 %v1862_v5  ;;  %v1745_v23 = vld [vmem:[#allocation2 + $0x38] sm:$0xff]  ;;  %vm7219_vm4 = vcmask 973824  }
 0x1b6   : > { %584 = vst [vmem:[#allocation2 + $0xb0] sm:$0xf0] %v568_v19  ;;  %527 = vst.msk [vmem:[#allocation2 + $0xb8] sm:$0xf] %vm306_vm3, %v511_v16  ;;  %1478 = vrot.lane.b32.xlu1 %v5753_v46, %s7192_s17  ;;  %1423 = vrot.lane.b32.xlu0 %v4981_v14, %s7191_s15  ;;  %v1744_v56 = vld [vmem:[#allocation2 + $0x30] sm:$0xff] }
 0x1b8   : > { %v615_v20 = vpop.permute.xlu1 %614  ;;  %v560_v22 = vpop.permute.xlu0 %559  ;;  %v1753_v34 = vld [vmem:[#allocation2 + $0x78] sm:$0xff] }
 0x1b9   : > { %v625_v50 = vsel %vm7166_vm6, %v613_v13, %v615_v20  ;;  %v569_v39 = vsel %vm7167_vm5, %v558_v4, %v560_v22  ;;  %v1857_v45 = vpack.c.bf16 %v1753_v34, %v1745_v23  ;;  %v1752_v29 = vld [vmem:[#allocation2 + $0x70] sm:$0xff] }
 0x1ba   : > { %641 = vst [vmem:[#allocation2 + $0xf0] sm:$0xf] %v625_v50  ;;  %585 = vst.msk [vmem:[#allocation2 + $0xb8] sm:$0xf0] %vm359_vm15, %v569_v39  ;;  %1536 = vrot.lane.b32.xlu1 %v5446_v51, %s7193_s16  ;;  %1480 = vrot.lane.b32.xlu0 %v1454_v42, %s7192_s17  ;;  %v1856_v54 = vpack.c.bf16 %v1752_v29, %v1744_v56 }
 0x1bb   : > { %2058 = vmatprep.subr.bf16.mxu1 %v1857_v45 }
 0x1bc   : > { %v673_v59 = vpop.permute.xlu1 %672  ;;  %2059 = vmatpush1.bf16.msra.mxu1 %v1856_v54  ;;  %v617_v62 = vpop.permute.xlu0 %616 }
 0x1bd   : > { %v683_v13 = vsel %vm7165_vm7, %v5822_v21, %v673_v59  ;;  %v626_v33 = vsel %vm7166_vm6, %v615_v20, %v617_v62  ;;  %vm7196_vm6 = vcmask 80896  }
 0x1be   : > { %699 = vst [vmem:[#allocation2 + $0xf0] sm:$0xf0] %v683_v13  ;;  %642 = vst.msk [vmem:[#allocation2 + $0xf8] sm:$0xf] %vm306_vm3, %v626_v33  ;;  %1589 = vrot.lane.b32.xlu1 %v5681_v30, %s7183_s25  ;;  %1538 = vrot.lane.b32.xlu0 %v4982_v10, %s7193_s16 }
 0x1c0   : > { %v726_v0 = vpop.permute.xlu1 %725  ;;  %v675_v1 = vpop.permute.xlu0 %674 }
 0x1c1   : > { %v738_v44 = vsel %vm7169_vm8, %v5418_v26, %v726_v0  ;;  %v684_v32 = vsel %vm7165_vm7, %v673_v59, %v675_v1  ;;  %vm7194_vm7 = vcmask 80896  }
 0x1c2   : > { %754 = vst [vmem:[#allocation2 + $0x120] sm:$0xf] %v738_v44  ;;  %700 = vst.msk [vmem:[#allocation2 + $0xf8] sm:$0xf0] %vm359_vm15, %v684_v32  ;;  %1647 = vrot.lane.b32.xlu1 %v5677_v25, %s7173_s20  ;;  %1591 = vrot.lane.b32.xlu0 %v5446_v51, %s7183_s25 }
 0x1c4   : > { %v784_v21 = vpop.permute.xlu1 %783  ;;  %v728_v2 = vpop.permute.xlu0 %727 }
 0x1c5   : > { %v796_v49 = vsel %vm7168_vm9, %v5427_v31, %v784_v21  ;;  %v739_v48 = vsel %vm7169_vm8, %v726_v0, %v728_v2  ;;  %v1768_v8 = vld [vmem:[#allocation2 + $0xf0] sm:$0xff]  ;;  %v1761_v31 = vld [vmem:[#allocation2 + $0xb8] sm:$0xff] }
 0x1c6   : > { %812 = vst [vmem:[#allocation2 + $0x120] sm:$0xf0] %v796_v49  ;;  %755 = vst [vmem:[#allocation2 + $0x128] sm:$0xf] %v739_v48  ;;  %1704 = vrot.lane.b32.xlu1 %v5681_v30, %s7171_s23  ;;  %1649 = vrot.lane.b32.xlu0 %v5452_v55, %s7173_s20  ;;  %v1760_v30 = vld [vmem:[#allocation2 + $0xb0] sm:$0xff] }
 0x1c7   : > { %v1864_v41 = vpack.c.bf16 %v1768_v8, %v1760_v30 }
 0x1c8   : > { %v841_v26 = vpop.permute.xlu1 %840  ;;  %v786_v25 = vpop.permute.xlu0 %785 }
 0x1c9   : > { %v853_v6 = vsel %vm7194_vm7, %v5436_v43, %v841_v26  ;;  %v797_v60 = vsel %vm7168_vm9, %v784_v21, %v786_v25  ;;  %v1769_v38 = vld [vmem:[#allocation2 + $0xf8] sm:$0xff]  ;;  %vm7195_vm7 = vcmask 72704  }
 0x1ca   : > { %869 = vst [vmem:[#allocation2 + $0x160] sm:$0xf] %v853_v6  ;;  %813 = vst [vmem:[#allocation2 + $0x128] sm:$0xf0] %v797_v60  ;;  %1593 = vrot.lane.b32.xlu1 %v5753_v46, %s7183_s25  ;;  %1706 = vrot.lane.b32.xlu0 %v5446_v51, %s7171_s23  ;;  %v1865_v55 = vpack.c.bf16 %v1769_v38, %v1761_v31 }
 0x1cb   : > { %vm7197_vm5 = vmmov %vm7195_vm7 }
 0x1cc   : > { %v899_v18 = vpop.permute.xlu1 %898  ;;  %2060 = vmatprep.subr.bf16.mxu1 %v1865_v55  ;;  %v843_v43 = vpop.permute.xlu0 %842 }
 0x1cd   : > { %v911_v35 = vsel %vm7195_vm7, %v5448_v52, %v899_v18  ;;  %v854_v37 = vsel %vm7196_vm6, %v841_v26, %v843_v43  ;;  %2061 = vmatpush1.bf16.msra.mxu1 %v1864_v41  ;;  %v1684_v52 = vld [vmem:[%s5090_s26 + $0x24] sm:$0xf] }
 0x1ce   : > { %927 = vst [vmem:[#allocation2 + $0x160] sm:$0xf0] %v911_v35  ;;  %870 = vst [vmem:[#allocation2 + $0x168] sm:$0xf] %v854_v37  ;;  %1651 = vrot.lane.b32.xlu1 %v5446_v51, %s7173_s20  ;;  %1595 = vrot.lane.b32.xlu0 %v1569_v3, %s7183_s25  ;;  %v1774_v56 = vld [vmem:[#allocation2 + $0x120] sm:$0xff] }
 0x1d0   : > { %v730_v5 = vpop.permute.xlu1 %729  ;;  %v901_v14 = vpop.permute.xlu0 %900 }
 0x1d1   : > { %v740_v4 = vsel %vm7169_vm8, %v728_v2, %v730_v5  ;;  %v912_v15 = vsel %vm7197_vm5, %v899_v18, %v901_v14  ;;  %vm7198_vm5 = vmmov %vm7196_vm6  ;;  %v1775_v50 = vld [vmem:[#allocation2 + $0x128] sm:$0xff] }
 0x1d2   : > { %756 = vst [vmem:[#allocation2 + $0x130] sm:$0xf] %v740_v4  ;;  %928 = vst [vmem:[#allocation2 + $0x168] sm:$0xf0] %v912_v15  ;;  %1708 = vrot.lane.b32.xlu1 %v5753_v46, %s7171_s23  ;;  %1653 = vrot.lane.b32.xlu0 %v4983_v11, %s7173_s20  ;;  %s7240_s20 = smov 10  }
 0x1d3   : > { %vm7199_vm6 = vmmov %vm7195_vm7 }
 0x1d4   : > { %v788_v19 = vpop.permute.xlu1 %787  ;;  %v732_v16 = vpop.permute.xlu0 %731  ;;  %vm7200_vm7 = vmmov %vm7198_vm5 }
 0x1d5   : > { %v798_v51 = vsel %vm7168_vm9, %v786_v25, %v788_v19  ;;  %v741_v42 = vsel %vm7169_vm8, %v730_v5, %v732_v16  ;;  %v1782_v23 = vld [vmem:[#allocation2 + $0x160] sm:$0xff]  ;;  %vm7205_vm8 = vcmask 973824  }
 0x1d6   : > { %814 = vst [vmem:[#allocation2 + $0x130] sm:$0xf0] %v798_v51  ;;  %757 = vst.msk [vmem:[#allocation2 + $0x138] sm:$0xf] %vm306_vm3, %v741_v42  ;;  %1710 = vrot.lane.b32.xlu0 %v1684_v52, %s7171_s23  ;;  %v1870_v29 = vpack.c.bf16 %v1782_v23, %v1774_v56  ;;  %s7241_s23 = smov 9  }
 0x1d8   : > { %v845_v20 = vpop.permute.xlu1 %844  ;;  %v790_v22 = vpop.permute.xlu0 %789 }
 0x1d9   : > { %v855_v34 = vsel %vm7198_vm5, %v843_v43, %v845_v20  ;;  %v799_v46 = vsel %vm7168_vm9, %v788_v19, %v790_v22  ;;  %v1783_v39 = vld [vmem:[#allocation2 + $0x168] sm:$0xff]  ;;  %vm7201_vm5 = vcmask 7168   ;;  %vm7202_vm9 = vmmov %vm7199_vm6 }
 0x1da   : > { %871 = vst [vmem:[#allocation2 + $0x170] sm:$0xf] %v855_v34  ;;  %815 = vst.msk [vmem:[#allocation2 + $0x138] sm:$0xf0] %vm359_vm15, %v799_v46  ;;  %v1871_v45 = vpack.c.bf16 %v1783_v39, %v1775_v50 }
 0x1dc   : > { %v903_v54 = vpop.permute.xlu1 %902  ;;  %2021 = vmatprep.subr.bf16.mxu0 %v1871_v45  ;;  %v847_v10 = vpop.permute.xlu0 %846 }
 0x1dd   : > { %v913_v59 = vsel %vm7199_vm6, %v901_v14, %v903_v54  ;;  %v856_v62 = vsel %vm7200_vm7, %v845_v20, %v847_v10  ;;  %2022 = vmatpush1.bf16.msra.mxu0 %v1870_v29  ;;  %vm7203_vm6 = vcmask 1039360   ;;  %vm7204_vm7 = vmmov %vm7201_vm5  ;;  %v1776_v31 = vld [vmem:[#allocation2 + $0x130] sm:$0xff] }
 0x1de   : > { %929 = vst [vmem:[#allocation2 + $0x170] sm:$0xf0] %v913_v59  ;;  %872 = vst.msk [vmem:[#allocation2 + $0x178] sm:$0xf] %vm306_vm3, %v856_v62 }
 0x1e0   : > { %v956_v13 = vpop.permute.xlu1 %955  ;;  %v905_v33 = vpop.permute.xlu0 %904 }
 0x1e1   : > { %v968_v0 = vsel %vm7201_vm5, %v5500_v27, %v956_v13  ;;  %v914_v1 = vsel %vm7202_vm9, %v903_v54, %v905_v33  ;;  %vm7206_vm5 = vmmov %vm7203_vm6  ;;  %v1777_v8 = vld [vmem:[#allocation2 + $0x138] sm:$0xff] }
 0x1e2   : > { %984 = vst [vmem:[#allocation2 + $0x1a0] sm:$0xf] %v968_v0  ;;  %930 = vst.msk [vmem:[#allocation2 + $0x178] sm:$0xf0] %vm359_vm15, %v914_v1 }
 0x1e3   : > { %vm7207_vm9 = vmmov %vm7204_vm7 }
 0x1e4   : > { %v1035_v44 = vpop.permute.xlu1 %1034  ;;  %v958_v32 = vpop.permute.xlu0 %957 }
 0x1e5   : > { %v1045_v21 = vsel %vm7203_vm6, %v5511_v36, %v1035_v44  ;;  %v969_v2 = vsel %vm7204_vm7, %v956_v13, %v958_v32  ;;  %v1784_v26 = vld [vmem:[#allocation2 + $0x170] sm:$0xff]  ;;  %vm7208_vm6 = vmmov %vm7205_vm8 }
 0x1e6   : > { %1060 = vst [vmem:[#allocation2 + $0x1e0] sm:$0xf] %v1045_v21  ;;  %985 = vst [vmem:[#allocation2 + $0x1a8] sm:$0xf] %v969_v2  ;;  %v1872_v38 = vpack.c.bf16 %v1784_v26, %v1776_v31 }
 0x1e8   : > { %v1087_v49 = vpop.permute.xlu1 %1086  ;;  %v1037_v48 = vpop.permute.xlu0 %1036 }
 0x1e9   : > { %v1097_v27 = vsel %vm7205_vm8, %v5520_v53, %v1087_v49  ;;  %v1046_v25 = vsel %vm7206_vm5, %v1035_v44, %v1037_v48  ;;  %v1785_v6 = vld [vmem:[#allocation2 + $0x178] sm:$0xff]  ;;  %vm7209_vm8 = vcmask 965632   ;;  %vm7210_vm5 = vcmask 957440   ;;  %v1790_v52 = vld [vmem:[#allocation2 + $0x1a0] sm:$0xff] }
 0x1ea   : > { %1112 = vst [vmem:[#allocation2 + $0x1e0] sm:$0xf0] %v1097_v27  ;;  %1061 = vst [vmem:[#allocation2 + $0x1e8] sm:$0xf] %v1046_v25  ;;  %v1873_v60 = vpack.c.bf16 %v1785_v6, %v1777_v8 }
 0x1ec   : > { %v960_v36 = vpop.permute.xlu1 %959  ;;  %2062 = vmatprep.subr.bf16.mxu1 %v1873_v60  ;;  %v1089_v55 = vpop.permute.xlu0 %1088 }
 0x1ed   : > { %v970_v30 = vsel %vm7207_vm9, %v958_v32, %v960_v36  ;;  %v1098_v41 = vsel %vm7208_vm6, %v1087_v49, %v1089_v55  ;;  %2063 = vmatpush1.bf16.msra.mxu1 %v1872_v38  ;;  %vm7211_vm9 = vmmov %vm7209_vm8  ;;  %v1791_v4 = vld [vmem:[#allocation2 + $0x1a8] sm:$0xff]  ;;  %vm7212_vm6 = vcmask 318464  }
 0x1ee   : > { %986 = vst [vmem:[#allocation2 + $0x1b0] sm:$0xf] %v970_v30  ;;  %1113 = vst [vmem:[#allocation2 + $0x1e8] sm:$0xf0] %v1098_v41 }
 0x1f0   : > { %v1139_v53 = vpop.permute.xlu1 %1138  ;;  %v962_v3 = vpop.permute.xlu0 %961 }
 0x1f1   : > { %v1149_v18 = vsel %vm7209_vm8, %v5563_v28, %v1139_v53  ;;  %v971_v43 = vsel %vm7204_vm7, %v960_v36, %v962_v3  ;;  %v1798_v11 = vld [vmem:[#allocation2 + $0x1e0] sm:$0xff]  ;;  %vm7213_vm8 = vmmov %vm7210_vm5  ;;  %vm7214_vm7 = vcmask 310272  }
 0x1f2   : > { %1164 = vst [vmem:[#allocation2 + $0x220] sm:$0xf] %v1149_v18  ;;  %987 = vst.msk [vmem:[#allocation2 + $0x1b8] sm:$0xf] %vm306_vm3, %v971_v43  ;;  %v1878_v19 = vpack.c.bf16 %v1798_v11, %v1790_v52 }
 0x1f4   : > { %v1191_v35 = vpop.permute.xlu1 %1190  ;;  %v5934_v37 = vpop.permute.xlu0 %1140 }
 0x1f5   : > { %v1201_v5 = vsel %vm7210_vm5, %v5576_v40, %v1191_v35  ;;  %v1150_v14 = vsel %vm7211_vm9, %v1139_v53, %v5934_v37  ;;  %v1799_v15 = vld [vmem:[#allocation2 + $0x1e8] sm:$0xff]  ;;  %vm7215_vm5 = vmmov %vm7212_vm6  ;;  %vm7216_vm9 = vcmask 1039360   ;;  %v1792_v8 = vld [vmem:[#allocation2 + $0x1b0] sm:$0xff] }
 0x1f6   : > { %1216 = vst [vmem:[#allocation2 + $0x220] sm:$0xf0] %v1201_v5  ;;  %1165 = vst [vmem:[#allocation2 + $0x228] sm:$0xf] %v1150_v14  ;;  %v1879_v28 = vpack.c.bf16 %v1799_v15, %v1791_v4 }
 0x1f8   : > { %v1245_v16 = vpop.permute.xlu1 %1244  ;;  %2023 = vmatprep.subr.bf16.mxu0 %v1879_v28  ;;  %v5940_v51 = vpop.permute.xlu0 %1192 }
 0x1f9   : > { %v1257_v42 = vsel %vm7212_vm6, %v5585_v58, %v1245_v16  ;;  %v1202_v40 = vsel %vm7213_vm8, %v1191_v35, %v5940_v51  ;;  %2024 = vmatpush1.bf16.msra.mxu0 %v1878_v19  ;;  %vm7217_vm6 = vmmov %vm7214_vm7  ;;  %v1793_v49 = vld [vmem:[#allocation2 + $0x1b8] sm:$0xff] }
 0x1fa   : > { %1273 = vst [vmem:[#allocation2 + $0x260] sm:$0xf] %v1257_v42  ;;  %1217 = vst [vmem:[#allocation2 + $0x228] sm:$0xf0] %v1202_v40 }
 0x1fb   : > { %vm7218_vm8 = vmmov %vm7215_vm5 }
 0x1fc   : > { %v1303_v20 = vpop.permute.xlu1 %1302  ;;  %v1247_v22 = vpop.permute.xlu0 %1246 }
 0x1fd   : > { %v1315_v23 = vsel %vm7214_vm7, %v5595_v63, %v1303_v20  ;;  %v1258_v34 = vsel %vm7215_vm5, %v1245_v16, %v1247_v22  ;;  %vm7220_vm7 = vmmov %vm7217_vm6  ;;  %v1806_v44 = vld [vmem:[#allocation2 + $0x220] sm:$0xff] }
 0x1fe   : > { %1331 = vst [vmem:[#allocation2 + $0x260] sm:$0xf0] %v1315_v23  ;;  %1274 = vst [vmem:[#allocation2 + $0x268] sm:$0xf] %v1258_v34 }
 0x200   : > { %v1039_v46 = vpop.permute.xlu1 %1038  ;;  %v1305_v50 = vpop.permute.xlu0 %1304 }
 0x201   : > { %v1047_v39 = vsel %vm7216_vm9, %v1037_v48, %v1039_v46  ;;  %1063 = vst.msk [vmem:[#allocation2 + $0x1f8] sm:$0xf] %vm306_vm3, %v1039_v46  ;;  %v1316_v58 = vsel %vm7217_vm6, %v1303_v20, %v1305_v50  ;;  %v1807_v33 = vld [vmem:[#allocation2 + $0x228] sm:$0xff]  ;;  %vm7222_vm9 = vmmov %vm7217_vm6  ;;  %vm7223_vm6 = vcmask 236544  }
 0x202   : > { %1062 = vst [vmem:[#allocation2 + $0x1f0] sm:$0xf] %v1047_v39  ;;  %1332 = vst [vmem:[#allocation2 + $0x268] sm:$0xf0] %v1316_v58 }
 0x204   : > { %v1249_v45 = vpop.permute.xlu1 %1248  ;;  %v1091_v56 = vpop.permute.xlu0 %1090 }
 0x205   : > { %v1259_v29 = vsel %vm7218_vm8, %v1247_v22, %v1249_v45  ;;  %v1099_v63 = vsel %vm7219_vm4, %v1089_v55, %v1091_v56  ;;  %1115 = vst.msk [vmem:[#allocation2 + $0x1f8] sm:$0xf0] %vm359_vm15, %v1091_v56  ;;  %v1814_v59 = vld [vmem:[#allocation2 + $0x260] sm:$0xff]  ;;  %vm7221_vm4 = vcmask 302080  }
 0x206   : > { %1275 = vst [vmem:[#allocation2 + $0x270] sm:$0xf] %v1259_v29  ;;  %1114 = vst [vmem:[#allocation2 + $0x1f0] sm:$0xf0] %v1099_v63  ;;  %v1886_v32 = vpack.c.bf16 %v1814_v59, %v1806_v44 }
 0x207   : > { %vm7224_vm8 = vmmov %vm7221_vm4 }
 0x208   : > { %v1307_v54 = vpop.permute.xlu1 %1306  ;;  %v1251_v10 = vpop.permute.xlu0 %1250 }
 0x209   : > { %v1317_v62 = vsel %vm7220_vm7, %v1305_v50, %v1307_v54  ;;  %v1260_v13 = vsel %vm7215_vm5, %v1249_v45, %v1251_v10  ;;  %v1815_v0 = vld [vmem:[#allocation2 + $0x268] sm:$0xff]  ;;  %vm7225_vm7 = vcmask 228352   ;;  %vm7226_vm5 = vmmov %vm7223_vm6 }
 0x20a   : > { %1333 = vst [vmem:[#allocation2 + $0x270] sm:$0xf0] %v1317_v62  ;;  %1276 = vst.msk [vmem:[#allocation2 + $0x278] sm:$0xf] %vm306_vm3, %v1260_v13  ;;  %v1887_v1 = vpack.c.bf16 %v1815_v0, %v1807_v33 }
 0x20c   : > { %v1360_v21 = vpop.permute.xlu1 %1359  ;;  %2025 = vmatprep.subr.bf16.mxu0 %v1887_v1  ;;  %v1309_v2 = vpop.permute.xlu0 %1308  ;;  %v1801_v48 = vld [vmem:[#allocation2 + $0x1f8] sm:$0xff] }
 0x20d   : > { %v1372_v26 = vsel %vm7221_vm4, %v5634_v61, %v1360_v21  ;;  %v1318_v27 = vsel %vm7222_vm9, %v1307_v54, %v1309_v2  ;;  %2026 = vmatpush1.bf16.msra.mxu0 %v1886_v32  ;;  %v1881_v25 = vpack.c.bf16 %v1801_v48, %v1793_v49  ;;  %v1800_v6 = vld [vmem:[#allocation2 + $0x1f0] sm:$0xff]  ;;  %vm7227_vm4 = vcmask 220160   ;;  %vm7228_vm9 = vmmov %vm7225_vm7 }
 0x20e   : > { %1388 = vst [vmem:[#allocation2 + $0x2a0] sm:$0xf] %v1372_v26  ;;  %1334 = vst.msk [vmem:[#allocation2 + $0x278] sm:$0xf0] %vm359_vm15, %v1318_v27  ;;  %v1880_v60 = vpack.c.bf16 %v1800_v6, %v1792_v8 }
 0x20f   : > { %2064 = vmatprep.subr.bf16.mxu1 %v1881_v25 }
 0x210   : > { %v1418_v31 = vpop.permute.xlu1 %1417  ;;  %2065 = vmatpush1.bf16.msra.mxu1 %v1880_v60  ;;  %v1362_v38 = vpop.permute.xlu0 %1361 }
 0x211   : > { %v1430_v36 = vsel %vm7223_vm6, %v5645_v7, %v1418_v31  ;;  %v1373_v55 = vsel %vm7224_vm8, %v1360_v21, %v1362_v38  ;;  %vm7229_vm6 = vcmask 965632   ;;  %vm7230_vm8 = vmmov %vm7227_vm4  ;;  %v1816_v29 = vld [vmem:[#allocation2 + $0x270] sm:$0xff] }
 0x212   : > { %1446 = vst [vmem:[#allocation2 + $0x2a0] sm:$0xf0] %v1430_v36  ;;  %1389 = vst [vmem:[#allocation2 + $0x2a8] sm:$0xf] %v1373_v55 }
 0x214   : > { %v1475_v61 = vpop.permute.xlu1 %1474  ;;  %v1420_v30 = vpop.permute.xlu0 %1419 }
 0x215   : > { %v1487_v41 = vsel %vm7225_vm7, %v5654_v12, %v1475_v61  ;;  %v1431_v53 = vsel %vm7226_vm5, %v1418_v31, %v1420_v30  ;;  %vm7231_vm7 = vcmask 302080   ;;  %vm7232_vm5 = vcmask 957440   ;;  %v1817_v50 = vld [vmem:[#allocation2 + $0x278] sm:$0xff] }
 0x216   : > { %1503 = vst [vmem:[#allocation2 + $0x2e0] sm:$0xf] %v1487_v41  ;;  %1447 = vst [vmem:[#allocation2 + $0x2a8] sm:$0xf0] %v1431_v53 }
 0x218   : > { %v1533_v3 = vpop.permute.xlu1 %1532  ;;  %v1477_v18 = vpop.permute.xlu0 %1476 }
 0x219   : > { %v1545_v43 = vsel %vm7227_vm4, %v5663_v17, %v1533_v3  ;;  %v1488_v7 = vsel %vm7228_vm9, %v1475_v61, %v1477_v18  ;;  %vm7233_vm4 = vcmask 236544   ;;  %vm7234_vm9 = vmmov %vm7231_vm7  ;;  %v1822_v22 = vld [vmem:[#allocation2 + $0x2a0] sm:$0xff] }
 0x21a   : > { %1561 = vst [vmem:[#allocation2 + $0x2e0] sm:$0xf0] %v1545_v43  ;;  %1504 = vst [vmem:[#allocation2 + $0x2e8] sm:$0xf] %v1488_v7 }
 0x21c   : > { %v1143_v35 = vpop.permute.xlu1 %1142  ;;  %v1535_v11 = vpop.permute.xlu0 %1534 }
 0x21d   : > { %v1151_v5 = vsel %vm7229_vm6, %v5934_v37, %v1143_v35  ;;  %1167 = vst.msk [vmem:[#allocation2 + $0x238] sm:$0xf] %vm306_vm3, %v1143_v35  ;;  %v1546_v12 = vsel %vm7230_vm8, %v1533_v3, %v1535_v11  ;;  %v1823_v42 = vld [vmem:[#allocation2 + $0x2a8] sm:$0xff]  ;;  %vm7235_vm6 = vcmask 228352   ;;  %vm7236_vm8 = vmmov %vm7233_vm4 }
 0x21e   : > { %1166 = vst [vmem:[#allocation2 + $0x230] sm:$0xf] %v1151_v5  ;;  %1562 = vst [vmem:[#allocation2 + $0x2e8] sm:$0xf0] %v1546_v12 }
 0x220   : > { %v1364_v14 = vpop.permute.xlu1 %1363  ;;  %v1195_v4 = vpop.permute.xlu0 %1194 }
 0x221   : > { %v1374_v15 = vsel %vm7231_vm7, %v1362_v38, %v1364_v14  ;;  %v1203_v17 = vsel %vm7232_vm5, %v5940_v51, %v1195_v4  ;;  %1219 = vst.msk [vmem:[#allocation2 + $0x238] sm:$0xf0] %vm359_vm15, %v1195_v4  ;;  %v1830_v37 = vld [vmem:[#allocation2 + $0x2e0] sm:$0xff]  ;;  %vm7237_vm7 = vcmask 220160   ;;  %vm7238_vm5 = vmmov %vm7235_vm6 }
 0x222   : > { %1390 = vst [vmem:[#allocation2 + $0x2b0] sm:$0xf] %v1374_v15  ;;  %1218 = vst [vmem:[#allocation2 + $0x230] sm:$0xf0] %v1203_v17  ;;  %v1894_v23 = vpack.c.bf16 %v1830_v37, %v1822_v22 }
 0x224   : > { %v1422_v28 = vpop.permute.xlu1 %1421  ;;  %v1366_v52 = vpop.permute.xlu0 %1365 }
 0x225   : > { %v1432_v19 = vsel %vm7233_vm4, %v1420_v30, %v1422_v28  ;;  %v1375_v16 = vsel %vm7234_vm9, %v1364_v14, %v1366_v52  ;;  %v1831_v40 = vld [vmem:[#allocation2 + $0x2e8] sm:$0xff]  ;;  %vm7239_vm4 = vmmov %vm7237_vm7 }
 0x226   : > { %1448 = vst [vmem:[#allocation2 + $0x2b0] sm:$0xf0] %v1432_v19  ;;  %1391 = vst.msk [vmem:[#allocation2 + $0x2b8] sm:$0xf] %vm306_vm3, %v1375_v16  ;;  %v1895_v20 = vpack.c.bf16 %v1831_v40, %v1823_v42 }
 0x228   : > { %v1479_v51 = vpop.permute.xlu1 %1478  ;;  %2027 = vmatprep.subr.bf16.mxu0 %v1895_v20  ;;  %v1424_v34 = vpop.permute.xlu0 %1423  ;;  %v1809_v46 = vld [vmem:[#allocation2 + $0x238] sm:$0xff] }
 0x229   : > { %v1489_v39 = vsel %vm7235_vm6, %v1477_v18, %v1479_v51  ;;  %v1433_v58 = vsel %vm7236_vm8, %v1422_v28, %v1424_v34  ;;  %2028 = vmatpush1.bf16.msra.mxu0 %v1894_v23  ;;  %v1889_v45 = vpack.c.bf16 %v1817_v50, %v1809_v46  ;;  %v1808_v56 = vld [vmem:[#allocation2 + $0x230] sm:$0xff]  ;;  %v2100_v28 = vlaneseq }
 0x22a   : > { %1505 = vst [vmem:[#allocation2 + $0x2f0] sm:$0xf] %v1489_v39  ;;  %1449 = vst.msk [vmem:[#allocation2 + $0x2b8] sm:$0xf0] %vm359_vm15, %v1433_v58  ;;  %v1888_v63 = vpack.c.bf16 %v1816_v29, %v1808_v56 }
 0x22b   : > { %2066 = vmatprep.subr.bf16.mxu1 %v1889_v45  ;;  %v6012_v16 = vshrl.u32 %v2100_v28, 7 }
 0x22c   : > { %v1537_v54 = vpop.permute.xlu1 %1536  ;;  %2067 = vmatpush1.bf16.msra.mxu1 %v1888_v63  ;;  %v1481_v10 = vpop.permute.xlu0 %1480 }
 0x22d   : > { %v1547_v59 = vsel %vm7237_vm7, %v1535_v11, %v1537_v54  ;;  %v1490_v62 = vsel %vm7238_vm5, %v1479_v51, %v1481_v10  ;;  %v1824_v60 = vld [vmem:[#allocation2 + $0x2b0] sm:$0xff]  ;;  %v2102_v23 = vsub.s32 0, %v6012_v16  ;;  %v253_v51 = vld [vmem:[%s7124_s0] sm:$0xff]  ;;  %v2106_v34 = vsub.s32 1, %v6012_v16 }
 0x22e   : > { %1563 = vst [vmem:[#allocation2 + $0x2f0] sm:$0xf0] %v1547_v59  ;;  %1506 = vst.msk [vmem:[#allocation2 + $0x2f8] sm:$0xf] %vm306_vm3, %v1490_v62  ;;  %v2110_v62 = vsub.s32 2, %v6012_v16 }
 0x22f   : > { %v6025_v46 = vrot.slane %v253_v51, %v2102_v23  ;;  %v6029_v50 = vrot.slane %v253_v51, %v2106_v34 }
 0x230   : > { %v1590_v13 = vpop.permute.xlu1 %1589  ;;  %v1539_v33 = vpop.permute.xlu0 %1538 }
 0x231   : > { %v1602_v0 = vsel %vm1597_vm14, %v5759_v47, %v1590_v13  ;;  %v1548_v1 = vsel %vm7239_vm4, %v1537_v54, %v1539_v33  ;;  %v1825_v25 = vld [vmem:[#allocation2 + $0x2b8] sm:$0xff]  ;;  %v6043_v33 = vrot.slane %v253_v51, %v2110_v62 }
 0x232   : > { %1618 = vst [vmem:[#allocation2 + $0x320] sm:$0xf] %v1602_v0  ;;  %1564 = vst.msk [vmem:[#allocation2 + $0x2f8] sm:$0xf0] %vm359_vm15, %v1548_v1 }
 0x234   : > { %v1648_v44 = vpop.permute.xlu1 %1647  ;;  %v1592_v32 = vpop.permute.xlu0 %1591 }
 0x235   : > { %v1660_v21 = vsel %vm1655_vm13, %v5769_v57, %v1648_v44  ;;  %v1603_v2 = vsel %vm1597_vm14, %v1590_v13, %v1592_v32  ;;  %v1832_v26 = vld [vmem:[#allocation2 + $0x2f0] sm:$0xff]  ;;  %v2114_v13 = vsub.s32 3, %v6012_v16 }
 0x236   : > { %1676 = vst [vmem:[#allocation2 + $0x320] sm:$0xf0] %v1660_v21  ;;  %1619 = vst [vmem:[#allocation2 + $0x328] sm:$0xf] %v1603_v2  ;;  %v1896_v31 = vpack.c.bf16 %v1832_v26, %v1824_v60  ;;  %v2122_v60 = vsub.s32 5, %v6012_v16 }
 0x237   : > { %v6047_v0 = vrot.slane %v253_v51, %v2114_v13 }
 0x238   : > { %v1705_v49 = vpop.permute.xlu1 %1704  ;;  %v1650_v48 = vpop.permute.xlu0 %1649 }
 0x239   : > { %v1717_v47 = vsel %vm1712_vm11, %v5780_v9, %v1705_v49  ;;  %v1661_v27 = vsel %vm1655_vm13, %v1648_v44, %v1650_v48  ;;  %v1833_v8 = vld [vmem:[#allocation2 + $0x2f8] sm:$0xff] }
 0x23a   : > { %1733 = vst [vmem:[#allocation2 + $0x360] sm:$0xf] %v1717_v47  ;;  %1677 = vst [vmem:[#allocation2 + $0x328] sm:$0xf0] %v1661_v27  ;;  %v1897_v6 = vpack.c.bf16 %v1833_v8, %v1825_v25 }
 0x23c   : > { %v1594_v57 = vpop.permute.xlu1 %1593  ;;  %2068 = vmatprep.subr.bf16.mxu1 %v1897_v6  ;;  %v1707_v38 = vpop.permute.xlu0 %1706  ;;  %v2118_v6 = vsub.s32 4, %v6012_v16 }
 0x23d   : > { %v1604_v36 = vsel %vm1597_vm14, %v1592_v32, %v1594_v57  ;;  %v1718_v55 = vsel %vm1712_vm11, %v1705_v49, %v1707_v38  ;;  %2069 = vmatpush1.bf16.msra.mxu1 %v1896_v31  ;;  %v1838_v3 = vld [vmem:[#allocation2 + $0x320] sm:$0xff] }
 0x23e   : > { %1620 = vst [vmem:[#allocation2 + $0x330] sm:$0xf] %v1604_v36  ;;  %1734 = vst [vmem:[#allocation2 + $0x368] sm:$0xf] %v1718_v55  ;;  %v6061_v31 = vrot.slane %v253_v51, %v2118_v6 }
 0x240   : > { %v1652_v9 = vpop.permute.xlu1 %1651  ;;  %v1596_v61 = vpop.permute.xlu0 %1595 }
 0x241   : > { %v1662_v30 = vsel %vm1655_vm13, %v1650_v48, %v1652_v9  ;;  %v1605_v41 = vsel %vm1597_vm14, %v1594_v57, %v1596_v61  ;;  %v1846_v53 = vld [vmem:[#allocation2 + $0x360] sm:$0xf]  ;;  %v1839_v5 = vld [vmem:[#allocation2 + $0x328] sm:$0xff]  ;;  %v6065_v57 = vrot.slane %v253_v51, %v2122_v60 }
 0x242   : > { %1678 = vst [vmem:[#allocation2 + $0x330] sm:$0xf0] %v1662_v30  ;;  %1621 = vst.msk [vmem:[#allocation2 + $0x338] sm:$0xf] %vm306_vm3, %v1605_v41  ;;  %v1902_v7 = vpack.c.bf16 %v1846_v53, %v1838_v3 }
 0x244   : > { %v1709_v18 = vpop.permute.xlu1 %1708  ;;  %v1654_v43 = vpop.permute.xlu0 %1653  ;;  %v1924_v15 = vsel %vm1910_vm12, %v1902_v7, 0  ;;  %v2126_v7 = vsub.s32 6, %v6012_v16 }
 0x245   : > { %v1719_v35 = vsel %vm1712_vm11, %v1707_v38, %v1709_v18  ;;  %v1663_v11 = vsel %vm1655_vm13, %v1652_v9, %v1654_v43  ;;  %v1847_v12 = vld [vmem:[#allocation2 + $0x368] sm:$0xf] }
 0x246   : > { %1735 = vst [vmem:[#allocation2 + $0x370] sm:$0xf] %v1719_v35  ;;  %1679 = vst.msk [vmem:[#allocation2 + $0x338] sm:$0xf0] %vm359_vm15, %v1663_v11  ;;  %v1903_v14 = vpack.c.bf16 %v1847_v12, %v1839_v5  ;;  %v2130_v35 = vsub.s32 7, %v6012_v16  ;;  %v6079_v5 = vrot.slane %v253_v51, %v2126_v7 }
 0x248   : > { %4893 = vmatprep.subr.msk.bf16.mxu0 %vm1910_vm12, %v1903_v14  ;;  %v1711_v4 = vpop.permute.xlu0 %1710  ;;  %v6083_v12 = vrot.slane %v253_v51, %v2130_v35 }
 0x249   : > { %v1720_v17 = vsel %vm1712_vm11, %v1709_v18, %v1711_v4  ;;  %2030 = vmatpush1.bf16.msra.mxu0 %v1924_v15  ;;  %v1840_v37 = vld [vmem:[#allocation2 + $0x330] sm:$0xff] }
 0x24a   : > { %1736 = vst.msk [vmem:[#allocation2 + $0x378] sm:$0xf] %vm306_vm3, %v1720_v17  ;;  %vm2154_vm3 = vcmask 850944  }
 0x24c   : > { %4894 = vmatmul.mubr.msk.bf16.vlgmr.msra.gmra.mrb[4].mxu0 %vm1906_vm10, %v5739_v24 }
 0x24d   : > { %v1848_v52 = vld [vmem:[#allocation2 + $0x370] sm:$0xf]  ;;  %v1841_v42 = vld [vmem:[#allocation2 + $0x338] sm:$0xff] }
 0x24e   : > { %v1904_v19 = vpack.c.bf16 %v1848_v52, %v1840_v37 }
 0x250   : > { %v1930_v22 = vsel %vm1910_vm12, %v1904_v19, 0 }
 0x251   : > { %v1849_v40 = vld [vmem:[#allocation2 + $0x378] sm:$0xf] }
 0x252   : > { %v1905_v20 = vpack.c.bf16 %v1849_v40, %v1841_v42 }
 0x254   : > { %4895 = vmatprep.subr.msk.bf16.mxu1 %vm1910_vm12, %v1905_v20 }
 0x255   : > { %2071 = vmatpush1.bf16.msra.mxu1 %v1930_v22 }
 0x258   : > { %4896 = vmatmul.mubr.msk.bf16.vlgmr.msra.gmra.mrb[4].mxu1 %vm1906_vm10, %v5739_v24  ;;  %vm2232_vm10 = vcmask 1048384  }
 0x25b   : > { %v6031_v39 = vpop.f32.mrb[0].mxu0 }
 0x25c   : > { %v2140_v58 = vmul.f32 %v6025_v46, %v6031_v39  ;;  %v6035_v45 = vpop.f32.mrb[1].mxu0 }
 0x25d   : > { %v2141_v56 = vmul.f32 %v6029_v50, %v6035_v45  ;;  %v1973_v29 = vpop.f32.mrb[2].mxu0 }
 0x25e   : > { %v2159_v24 = vmul.f32 %v2140_v58, %v2140_v58  ;;  %v1974_v63 = vpop.f32.mrb[3].mxu0 }
 0x25f   : > { %v2148_v54 = vadd.f32 %v2141_v56, %v2140_v58  ;;  %v2160_v10 = vmul.f32 %v2141_v56, %v2141_v56  ;;  %v5040_v56 = vmov 0.0  }
 0x260   : > { %2231 = vst [vmem:[#allocation3] sm:$0xff] %v5040_v56  ;;  %2234 = vst.msk [vmem:[#allocation3 + $0x48] sm:$0xff] %vm2154_vm3, %v5040_v56 }
 0x261   : > { %v2167_v59 = vadd.f32 %v2160_v10, %v2159_v24  ;;  %2233 = vst.msk [vmem:[#allocation3 + $0x40] sm:$0xff] %vm2232_vm10, %v5040_v56  ;;  %vm7245_vm10 = vcmask 826368  }
 0x277   : > { %v6049_v1 = vpop.f32.mrb[0].mxu1 }
 0x278   : > { %v2142_v44 = vmul.f32 %v6043_v33, %v6049_v1  ;;  %v6053_v32 = vpop.f32.mrb[1].mxu1 }
 0x279   : > { %v2143_v21 = vmul.f32 %v6047_v0, %v6053_v32  ;;  %v2014_v2 = vpop.f32.mrb[2].mxu1 }
 0x27a   : > { %v2149_v49 = vadd.f32 %v2148_v54, %v2142_v44  ;;  %v2161_v48 = vmul.f32 %v2142_v44, %v2142_v44  ;;  %v2015_v26 = vpop.f32.mrb[3].mxu1 }
 0x27b   : > { %v2162_v47 = vmul.f32 %v2143_v21, %v2143_v21 }
 0x27c   : > { %v2168_v27 = vadd.f32 %v2167_v59, %v2161_v48  ;;  %v2150_v25 = vadd.f32 %v2149_v49, %v2143_v21 }
 0x27e   : > { %v2169_v8 = vadd.f32 %v2168_v27, %v2162_v47 }
 0x31f   : > { %v6067_v38 = vpop.f32.mrb[4].mxu0 }
 0x320   : > { %v2144_v36 = vmul.f32 %v6061_v31, %v6067_v38  ;;  %v6071_v55 = vpop.f32.mrb[5].mxu0 }
 0x321   : > { %v2145_v9 = vmul.f32 %v6065_v57, %v6071_v55  ;;  %v2055_v61 = vpop.f32.mrb[6].mxu0 }
 0x322   : > { %v2151_v30 = vadd.f32 %v2150_v25, %v2144_v36  ;;  %v2163_v41 = vmul.f32 %v2144_v36, %v2144_v36  ;;  %v2056_v53 = vpop.f32.mrb[7].mxu0 }
 0x323   : > { %v2164_v3 = vmul.f32 %v2145_v9, %v2145_v9 }
 0x324   : > { %v2170_v18 = vadd.f32 %v2169_v8, %v2163_v41  ;;  %v2152_v43 = vadd.f32 %v2151_v30, %v2145_v9 }
 0x326   : > { %v2171_v11 = vadd.f32 %v2170_v18, %v2164_v3 }
 0x32b   : > { %v2092_v14 = vpop.f32.mrb[4].mxu1 }
 0x32c   : > { %v2146_v4 = vmul.f32 %v6079_v5, %v2092_v14  ;;  %v2094_v15 = vpop.f32.mrb[5].mxu1 }
 0x32d   : > { %v2147_v17 = vmul.f32 %v6083_v12, %v2094_v15  ;;  %v2096_v28 = vpop.f32.mrb[6].mxu1 }
 0x32e   : > { %v2153_v52 = vadd.f32 %v2152_v43, %v2146_v4  ;;  %v2165_v37 = vmul.f32 %v2146_v4, %v2146_v4  ;;  %v2097_v19 = vpop.f32.mrb[7].mxu1 }
 0x32f   : > { %v2155_v42 = vsel %vm2154_vm3, %v2147_v17, 0.0  ;;  %v2166_v40 = vmul.f32 %v2147_v17, %v2147_v17 }
 0x330   : > { %v2172_v20 = vadd.f32 %v2171_v11, %v2165_v37  ;;  %v2156_v22 = vadd.f32 %v2155_v42, %v2153_v52 }
 0x331   : > { %v2173_v58 = vsel %vm2154_vm3, %v2166_v40, 0.0 }
 0x332   : > { %2157 = vadd.xlane.f32.xlu1 %v2156_v22  ;;  %v2174_v51 = vadd.f32 %v2173_v58, %v2172_v20 }
 0x334   : > { %2175 = vadd.xlane.f32.xlu0 %v2174_v51 }
 0x343   : > { %2259 = vrot.lane.b32.xlu1 %v5040_v56, %s5014_s28 }
 0x347   : > { %2369 = vrot.lane.b32.xlu1 %v5040_v56, %s5015_s29 }
 0x34a   : > { %2314 = vrot.lane.b32.xlu0 %v5040_v56, %s5013_s27 }
 0x34b   : > { %2486 = vrot.lane.b32.xlu1 %v5040_v56, %s5017_s7 }
 0x34e   : > { %2426 = vrot.lane.b32.xlu0 %v5040_v56, %s5016_s30 }
 0x34f   : > { %2606 = vrot.lane.b32.xlu1 %v5040_v56, %s5019_s9 }
 0x352   : > { %2546 = vrot.lane.b32.xlu0 %v5040_v56, %s5018_s8 }
 0x353   : > { %2726 = vrot.lane.b32.xlu1 %v5040_v56, %s7177_s11 }
 0x356   : > { %2666 = vrot.lane.b32.xlu0 %v5040_v56, %s7179_s10 }
 0x3bf   : > { %v2158_v29 = vpop.xlane.xlu1 %2157 }
 0x3c0   : > { %v2177_v24 = vmul.f32 0.001953125, %v2158_v29 }
 0x3c1   : > { %v2176_v63 = vpop.xlane.xlu0 %2175 }
 0x3c2   : > { %v2178_v54 = vmul.f32 0.001953125, %v2176_v63  ;;  %v2179_v10 = vmul.f32 %v2177_v24, %v2177_v24  ;;  %v2181_v21 = vsub.f32 %v6031_v39, %v2177_v24  ;;  %v2182_v2 = vsub.f32 %v6035_v45, %v2177_v24 }
 0x3c3   : > { %v2183_v49 = vsub.f32 %v6049_v1, %v2177_v24  ;;  %v2184_v48 = vsub.f32 %v6053_v32, %v2177_v24  ;;  %v2185_v47 = vsub.f32 %v6067_v38, %v2177_v24  ;;  %v2186_v27 = vsub.f32 %v6071_v55, %v2177_v24  ;;  %v2260_v63 = vpop.permute.xlu1 %2259 }
 0x3c4   : > { %v2180_v59 = vsub.f32 %v2178_v54, %v2179_v10  ;;  %v2187_v25 = vsub.f32 %v2092_v14, %v2177_v24  ;;  %v2188_v8 = vsub.f32 %v2094_v15, %v2177_v24 }
 0x3c5   : > { %v2315_v54 = vpop.permute.xlu0 %2314 }
 0x3c6   : > { %v2189_v44 = vadd.f32 1e-05, %v2180_v59 }
 0x3c7   : > { %v2370_v10 = vpop.permute.xlu1 %2369 }
 0x3c8   : > { %4991 = vrsqrt.f32 %v2189_v44 }
 0x3c9   : > { %v2427_v59 = vpop.permute.xlu0 %2426 }
 0x3cb   : > { %v6259_v44 = vpop.permute.xlu1 %2486 }
 0x3d2   : > { %v4992_v26 = vpop.eup %4991 }
 0x3d3   : > { %v2192_v36 = vmul.f32 %v4992_v26, %v2182_v2  ;;  %v2191_v9 = vmul.f32 %v4992_v26, %v2181_v21  ;;  %v2193_v61 = vmul.f32 %v4992_v26, %v2183_v49  ;;  %v2194_v30 = vmul.f32 %v4992_v26, %v2184_v48  ;;  %v6265_v21 = vpop.permute.xlu0 %2546  ;;  %v6267_v2 = vpop.permute.xlu1 %2606 }
 0x3d4   : > { %v2195_v41 = vmul.f32 %v4992_v26, %v2185_v47  ;;  %v2196_v53 = vmul.f32 %v4992_v26, %v2186_v27  ;;  %v2197_v39 = vmul.f32 %v4992_v26, %v2187_v25  ;;  %v2198_v3 = vmul.f32 %v4992_v26, %v2188_v8 }
 0x3d5   : > { %vm2200_vm12 = vcmp.ge.f32.partialorder %v2192_v36, 0.0  ;;  %v2208_v45 = vmul.f32 0.01, %v2192_v36  ;;  %vm2199_vm15 = vcmp.ge.f32.partialorder %v2191_v9, 0.0  ;;  %v2207_v1 = vmul.f32 0.01, %v2191_v9 }
 0x3d6   : > { %vm2201_vm9 = vcmp.ge.f32.partialorder %v2193_v61, 0.0  ;;  %v2209_v32 = vmul.f32 0.01, %v2193_v61  ;;  %vm2202_vm6 = vcmp.ge.f32.partialorder %v2194_v30, 0.0  ;;  %v2210_v38 = vmul.f32 0.01, %v2194_v30 }
 0x3d7   : > { %v2216_v18 = vsel %vm2200_vm12, %v2192_v36, %v2208_v45  ;;  %v2215_v55 = vsel %vm2199_vm15, %v2191_v9, %v2207_v1  ;;  %vm2203_vm8 = vcmp.ge.f32.partialorder %v2195_v41, 0.0  ;;  %v2211_v43 = vmul.f32 0.01, %v2195_v41  ;;  %v6277_v49 = vpop.permute.xlu0 %2666  ;;  %v6279_v48 = vpop.permute.xlu1 %2726  ;;  %vm7246_vm12 = vmmov %vm7245_vm10 }
 0x3d8   : > { %v6118_v11 = vmul.f32 %v2216_v18, %v6029_v50  ;;  %v6121_v14 = vmul.f32 %v2215_v55, %v6025_v46  ;;  %v2217_v4 = vsel %vm2201_vm9, %v2193_v61, %v2209_v32  ;;  %v2218_v15 = vsel %vm2202_vm6, %v2194_v30, %v2210_v38  ;;  %vm7247_vm15 = vmmov %vm7245_vm10 }
 0x3d9   : > { %v6124_v17 = vmul.f32 %v2217_v4, %v6043_v33  ;;  %v6127_v28 = vmul.f32 %v2218_v15, %v6047_v0  ;;  %v2219_v52 = vsel %vm2203_vm8, %v2195_v41, %v2211_v43  ;;  %vm2204_vm7 = vcmp.ge.f32.partialorder %v2196_v53, 0.0  ;;  %vm7248_vm9 = vmmov %vm7245_vm10 }
 0x3da   : > { %2236 = vst [vmem:[#allocation3 + $0x10] sm:$0xff] %v6118_v11  ;;  %2263 = vrot.lane.b32.xlu1 %v6118_v11, %s5014_s28  ;;  %2235 = vst [vmem:[#allocation3 + $0x8] sm:$0xff] %v6121_v14  ;;  %2261 = vrot.lane.b32.xlu0 %v6121_v14, %s5014_s28  ;;  %v6136_v46 = vmul.f32 %v2219_v52, %v6061_v31  ;;  %v2212_v50 = vmul.f32 0.01, %v2196_v53  ;;  %vm2205_vm5 = vcmp.ge.f32.partialorder %v2197_v39, 0.0  ;;  %vm2206_vm4 = vcmp.ge.f32.partialorder %v2198_v3, 0.0 }
 0x3db   : > { %v2213_v33 = vmul.f32 0.01, %v2197_v39  ;;  %2237 = vst [vmem:[#allocation3 + $0x18] sm:$0xff] %v6124_v17  ;;  %2238 = vst [vmem:[#allocation3 + $0x20] sm:$0xff] %v6127_v28  ;;  %v2214_v0 = vmul.f32 0.01, %v2198_v3 }
 0x3dc   : > { %2239 = vst [vmem:[#allocation3 + $0x28] sm:$0xff] %v6136_v46  ;;  %v2220_v37 = vsel %vm2204_vm7, %v2196_v53, %v2212_v50  ;;  %vm7249_vm6 = vcmask 818176   ;;  %vm7251_vm7 = vcmask 809984  }
 0x3dd   : > { %v2221_v19 = vsel %vm2205_vm5, %v2197_v39, %v2213_v33  ;;  %v6142_v42 = vmul.f32 %v2220_v37, %v6065_v57  ;;  %v2222_v31 = vsel %vm2206_vm4, %v2198_v3, %v2214_v0  ;;  %vm7250_vm8 = vmmov %vm7249_vm6 }
 0x3de   : > { %v6145_v40 = vmul.f32 %v2221_v19, %v6079_v5  ;;  %2316 = vrot.lane.b32.xlu1 %v6121_v14, %s5013_s27  ;;  %2318 = vrot.lane.b32.xlu0 %v6118_v11, %s5013_s27  ;;  %v2230_v20 = vmul.f32 %v2222_v31, %v6083_v12  ;;  %vm7252_vm5 = vmmov %vm7251_vm7 }
 0x3df   : > { %2240 = vst [vmem:[#allocation3 + $0x30] sm:$0xff] %v6142_v42  ;;  %vm7253_vm4 = vmmov %vm7249_vm6 }
 0x3e0   : > { %2241 = vst [vmem:[#allocation3 + $0x38] sm:$0xff] %v6145_v40  ;;  %2242 = vst.msk [vmem:[#allocation3 + $0x40] sm:$0xff] %vm2154_vm3, %v2230_v20 }
 0x3e1   : > { %v6155_v57 = vld [vmem:[#allocation3 + $0x10] sm:$0xff]  ;;  %v6157_v22 = vld [vmem:[#allocation3 + $0x8] sm:$0xff] }
 0x3e2   : > { %2265 = vrot.lane.b32.xlu1 %v6124_v17, %s5014_s28  ;;  %2267 = vrot.lane.b32.xlu0 %v6127_v28, %s5014_s28  ;;  %v6163_v5 = vld [vmem:[#allocation3 + $0x20] sm:$0xff]  ;;  %v6165_v58 = vld [vmem:[#allocation3 + $0x18] sm:$0xff] }
 0x3e3   : > { %v3012_v12 = vld [vmem:[#allocation3 + $0x28] sm:$0xff] }
 0x3e4   : > { %3020 = vst [vmem:[#allocation4 + $0x360] sm:$0xff] %v3012_v12 }
 0x3e6   : > { %2320 = vrot.lane.b32.xlu1 %v6124_v17, %s5013_s27  ;;  %2322 = vrot.lane.b32.xlu0 %v6127_v28, %s5013_s27  ;;  %v3489_v51 = vld [vmem:[#allocation3 + $0x30] sm:$0xff] }
 0x3e7   : > { %v3550_v29 = vld [vmem:[#allocation3 + $0x38] sm:$0xff]  ;;  %v6171_v24 = vld [vmem:[#allocation3 + $0x40] sm:$0xff]  ;;  %3021 = vst [vmem:[#allocation4 + $0x368] sm:$0xff] %v3489_v51 }
 0x3e8   : > { %3022 = vst [vmem:[#allocation4 + $0x370] sm:$0xff] %v3550_v29  ;;  %3023 = vst.msk [vmem:[#allocation4 + $0x378] sm:$0xff] %vm2154_vm3, %v6171_v24 }
 0x3ea   : > { %2371 = vrot.lane.b32.xlu1 %v6121_v14, %s5015_s29  ;;  %2373 = vrot.lane.b32.xlu0 %v6118_v11, %s5015_s29 }
 0x3ee   : > { %2428 = vrot.lane.b32.xlu1 %v6121_v14, %s5016_s30  ;;  %2430 = vrot.lane.b32.xlu0 %v6118_v11, %s5016_s30 }
 0x3f2   : > { %2375 = vrot.lane.b32.xlu1 %v6124_v17, %s5015_s29  ;;  %2377 = vrot.lane.b32.xlu0 %v6127_v28, %s5015_s29 }
 0x3f6   : > { %2432 = vrot.lane.b32.xlu1 %v6124_v17, %s5016_s30  ;;  %2434 = vrot.lane.b32.xlu0 %v6127_v28, %s5016_s30 }
 0x3fa   : > { %2488 = vrot.lane.b32.xlu1 %v6121_v14, %s5017_s7  ;;  %2490 = vrot.lane.b32.xlu0 %v6118_v11, %s5017_s7 }
 0x3fe   : > { %2548 = vrot.lane.b32.xlu1 %v6121_v14, %s5018_s8  ;;  %2550 = vrot.lane.b32.xlu0 %v6118_v11, %s5018_s8 }
 0x402   : > { %2492 = vrot.lane.b32.xlu1 %v6124_v17, %s5017_s7  ;;  %2494 = vrot.lane.b32.xlu0 %v6127_v28, %s5017_s7 }
 0x406   : > { %2552 = vrot.lane.b32.xlu1 %v6124_v17, %s5018_s8  ;;  %2554 = vrot.lane.b32.xlu0 %v6127_v28, %s5018_s8 }
 0x40a   : > { %2608 = vrot.lane.b32.xlu1 %v6121_v14, %s5019_s9  ;;  %2610 = vrot.lane.b32.xlu0 %v6118_v11, %s5019_s9 }
 0x40e   : > { %2668 = vrot.lane.b32.xlu1 %v6121_v14, %s7179_s10  ;;  %2670 = vrot.lane.b32.xlu0 %v6118_v11, %s7179_s10 }
 0x412   : > { %2612 = vrot.lane.b32.xlu1 %v6124_v17, %s5019_s9  ;;  %2614 = vrot.lane.b32.xlu0 %v6127_v28, %s5019_s9 }
 0x416   : > { %2672 = vrot.lane.b32.xlu1 %v6124_v17, %s7179_s10  ;;  %2674 = vrot.lane.b32.xlu0 %v6127_v28, %s7179_s10  ;;  %s7244_s10 = smov 119  }
 0x41a   : > { %2728 = vrot.lane.b32.xlu1 %v6121_v14, %s7177_s11  ;;  %2730 = vrot.lane.b32.xlu0 %v6118_v11, %s7177_s11 }
 0x41e   : > { %2788 = vrot.lane.b32.xlu1 %v6121_v14, %s7175_s12  ;;  %2790 = vrot.lane.b32.xlu0 %v6118_v11, %s7175_s12 }
 0x422   : > { %2732 = vrot.lane.b32.xlu1 %v6124_v17, %s7177_s11  ;;  %2786 = vrot.lane.b32.xlu0 %v5040_v56, %s7175_s12 }
 0x426   : > { %2792 = vrot.lane.b32.xlu1 %v6124_v17, %s7175_s12  ;;  %2734 = vrot.lane.b32.xlu0 %v6127_v28, %s7177_s11  ;;  %s7243_s11 = smov 127  }
 0x42a   : > { %2848 = vrot.lane.b32.xlu1 %v6121_v14, %s7240_s20  ;;  %2794 = vrot.lane.b32.xlu0 %v6127_v28, %s7175_s12  ;;  %s7242_s12 = smov 1  }
 0x42e   : > { %2908 = vrot.lane.b32.xlu1 %v6121_v14, %s7241_s23  ;;  %2850 = vrot.lane.b32.xlu0 %v6118_v11, %s7240_s20 }
 0x432   : > { %2846 = vrot.lane.b32.xlu1 %v5040_v56, %s7240_s20  ;;  %2910 = vrot.lane.b32.xlu0 %v6118_v11, %s7241_s23 }
 0x436   : > { %2852 = vrot.lane.b32.xlu1 %v6124_v17, %s7240_s20  ;;  %2906 = vrot.lane.b32.xlu0 %v5040_v56, %s7241_s23 }
 0x43a   : > { %2912 = vrot.lane.b32.xlu1 %v6124_v17, %s7241_s23  ;;  %2854 = vrot.lane.b32.xlu0 %v6127_v28, %s7240_s20 }
 0x43e   : > { %2968 = vrot.lane.b32.xlu1 %v6121_v14, %s7242_s12  ;;  %2914 = vrot.lane.b32.xlu0 %v6127_v28, %s7241_s23 }
 0x442   : > { %2966 = vrot.lane.b32.xlu1 %v5040_v56, %s7242_s12  ;;  %2970 = vrot.lane.b32.xlu0 %v6118_v11, %s7242_s12 }
 0x446   : > { %2974 = vrot.lane.b32.xlu1 %v6127_v28, %s7242_s12  ;;  %2972 = vrot.lane.b32.xlu0 %v6124_v17, %s7242_s12 }
 0x44a   : > { %3044 = vrot.lane.b32.xlu1 %v6124_v17, %s7243_s11  ;;  %3042 = vrot.lane.b32.xlu0 %v6118_v11, %s7243_s11 }
 0x44c   : > { %v2262_v56 = vpop.permute.xlu0 %2261  ;;  %v2264_v26 = vpop.permute.xlu1 %2263 }
 0x44d   : > { %v2275_v47 = vsel %vm283_vm0, %v2260_v63, %v2262_v56  ;;  %v2276_v27 = vsel %vm283_vm0, %v2262_v56, %v2264_v26 }
 0x44e   : > { %3099 = vrot.lane.b32.xlu1 %v6124_v17, %s7244_s10  ;;  %3097 = vrot.lane.b32.xlu0 %v6118_v11, %s7244_s10 }
 0x450   : > { %v2319_v25 = vpop.permute.xlu0 %2318  ;;  %v2317_v8 = vpop.permute.xlu1 %2316 }
 0x451   : > { %v2330_v36 = vsel %vm336_vm1, %v2315_v54, %v2317_v8  ;;  %v2331_v9 = vsel %vm336_vm1, %v2317_v8, %v2319_v25 }
 0x452   : > { %3095 = vrot.lane.b32.xlu1 %v6121_v14, %s7244_s10  ;;  %3040 = vrot.lane.b32.xlu0 %v6121_v14, %s7243_s11  ;;  %v4002_v61 = vpack.c.bf16 %v2331_v9, %v2276_v27  ;;  %v4001_v30 = vpack.c.bf16 %v2330_v36, %v2275_v47 }
 0x454   : > { %v6297_v41 = vpop.permute.xlu0 %2267  ;;  %v2266_v53 = vpop.permute.xlu1 %2265  ;;  %4148 = vmatprep.subr.bf16.mxu0 %v4002_v61 }
 0x455   : > { %v2277_v39 = vsel %vm283_vm0, %v2264_v26, %v2266_v53  ;;  %v2278_v3 = vsel %vm283_vm0, %v2266_v53, %v6297_v41  ;;  %4149 = vmatpush1.bf16.msra.mxu0 %v4001_v30 }
 0x456   : > { %3048 = vrot.lane.b32.xlu1 %v6136_v46, %s7243_s11  ;;  %3046 = vrot.lane.b32.xlu0 %v6127_v28, %s7243_s11 }
 0x458   : > { %v6306_v45 = vpop.permute.xlu0 %2322  ;;  %v2321_v1 = vpop.permute.xlu1 %2320 }
 0x459   : > { %v2332_v32 = vsel %vm336_vm1, %v2319_v25, %v2321_v1  ;;  %v2333_v38 = vsel %vm336_vm1, %v2321_v1, %v6306_v45 }
 0x45a   : > { %3103 = vrot.lane.b32.xlu1 %v6136_v46, %s7244_s10  ;;  %3101 = vrot.lane.b32.xlu0 %v6127_v28, %s7244_s10  ;;  %v4004_v18 = vpack.c.bf16 %v2333_v38, %v2278_v3  ;;  %v4003_v55 = vpack.c.bf16 %v2332_v32, %v2277_v39 }
 0x45c   : > { %v2374_v43 = vpop.permute.xlu0 %2373  ;;  %v2372_v4 = vpop.permute.xlu1 %2371  ;;  %4189 = vmatprep.subr.bf16.mxu1 %v4004_v18 }
 0x45d   : > { %v2385_v15 = vsel %vm389_vm2, %v2370_v10, %v2372_v4  ;;  %v2386_v52 = vsel %vm389_vm2, %v2372_v4, %v2374_v43  ;;  %4190 = vmatpush1.bf16.msra.mxu1 %v4003_v55 }
 0x45e   : > { %3154 = vrot.lane.b32.xlu1 %v6124_v17, %s7187_s18  ;;  %3152 = vrot.lane.b32.xlu0 %v6118_v11, %s7187_s18 }
 0x460   : > { %v2431_v50 = vpop.permute.xlu0 %2430  ;;  %v2429_v33 = vpop.permute.xlu1 %2428 }
 0x461   : > { %v2444_v0 = vsel %vm7245_vm10, %v2427_v59, %v2429_v33  ;;  %v2445_v37 = vsel %vm7246_vm12, %v2429_v33, %v2431_v50  ;;  %vm7254_vm10 = vmmov %vm7253_vm4 }
 0x462   : > { %3209 = vrot.lane.b32.xlu1 %v6124_v17, %s7185_s19  ;;  %3207 = vrot.lane.b32.xlu0 %v6118_v11, %s7185_s19  ;;  %v4010_v19 = vpack.c.bf16 %v2445_v37, %v2386_v52  ;;  %v4009_v31 = vpack.c.bf16 %v2444_v0, %v2385_v15  ;;  %vm7255_vm12 = vmmov %vm7252_vm5 }
 0x464   : > { %v6327_v20 = vpop.permute.xlu0 %2377  ;;  %v2376_v12 = vpop.permute.xlu1 %2375  ;;  %4150 = vmatprep.subr.bf16.mxu0 %v4010_v19 }
 0x465   : > { %v2387_v51 = vsel %vm389_vm2, %v2374_v43, %v2376_v12  ;;  %v2388_v29 = vsel %vm389_vm2, %v2376_v12, %v6327_v20  ;;  %4151 = vmatpush1.bf16.msra.mxu0 %v4009_v31 }
 0x466   : > { %3205 = vrot.lane.b32.xlu1 %v6121_v14, %s7185_s19  ;;  %3150 = vrot.lane.b32.xlu0 %v6121_v14, %s7187_s18 }
 0x468   : > { %v6336_v63 = vpop.permute.xlu0 %2434  ;;  %v2433_v54 = vpop.permute.xlu1 %2432 }
 0x469   : > { %v2446_v10 = vsel %vm7247_vm15, %v2431_v50, %v2433_v54  ;;  %v2447_v59 = vsel %vm7248_vm9, %v2433_v54, %v6336_v63  ;;  %vm7256_vm15 = vmmov %vm7252_vm5  ;;  %vm7257_vm9 = vcmask 744448  }
 0x46a   : > { %3158 = vrot.lane.b32.xlu1 %v6136_v46, %s7187_s18  ;;  %3156 = vrot.lane.b32.xlu0 %v6127_v28, %s7187_s18  ;;  %v4012_v56 = vpack.c.bf16 %v2447_v59, %v2388_v29  ;;  %v4011_v26 = vpack.c.bf16 %v2446_v10, %v2387_v51 }
 0x46c   : > { %v2491_v47 = vpop.permute.xlu0 %2490  ;;  %v2489_v27 = vpop.permute.xlu1 %2488  ;;  %4191 = vmatprep.subr.bf16.mxu1 %v4012_v56 }
 0x46d   : > { %v2504_v25 = vsel %vm7249_vm6, %v6259_v44, %v2489_v27  ;;  %v2505_v8 = vsel %vm7250_vm8, %v2489_v27, %v2491_v47  ;;  %4192 = vmatpush1.bf16.msra.mxu1 %v4011_v26  ;;  %vm7258_vm6 = vmmov %vm7257_vm9  ;;  %vm7259_vm8 = vcmask 736256  }
 0x46e   : > { %3213 = vrot.lane.b32.xlu1 %v6136_v46, %s7185_s19  ;;  %3211 = vrot.lane.b32.xlu0 %v6127_v28, %s7185_s19 }
 0x470   : > { %v2551_v36 = vpop.permute.xlu0 %2550  ;;  %v2549_v9 = vpop.permute.xlu1 %2548 }
 0x471   : > { %v2564_v61 = vsel %vm7251_vm7, %v6265_v21, %v2549_v9  ;;  %v2565_v30 = vsel %vm7252_vm5, %v2549_v9, %v2551_v36  ;;  %vm7260_vm7 = vmmov %vm7259_vm8 }
 0x472   : > { %3266 = vrot.lane.b32.xlu1 %v6124_v17, %s7189_s13  ;;  %3264 = vrot.lane.b32.xlu0 %v6118_v11, %s7189_s13  ;;  %v4018_v44 = vpack.c.bf16 %v2565_v30, %v2505_v8  ;;  %v4017_v53 = vpack.c.bf16 %v2564_v61, %v2504_v25  ;;  %vm7261_vm5 = vmmov %vm7258_vm6 }
 0x474   : > { %v6359_v39 = vpop.permute.xlu0 %2494  ;;  %v2493_v3 = vpop.permute.xlu1 %2492  ;;  %4152 = vmatprep.subr.bf16.mxu0 %v4018_v44 }
 0x475   : > { %v2506_v1 = vsel %vm7253_vm4, %v2491_v47, %v2493_v3  ;;  %v2507_v32 = vsel %vm7254_vm10, %v2493_v3, %v6359_v39  ;;  %4153 = vmatpush1.bf16.msra.mxu0 %v4017_v53  ;;  %vm7262_vm4 = vmmov %vm7261_vm5 }
 0x476   : > { %3326 = vrot.lane.b32.xlu1 %v6124_v17, %s7190_s14  ;;  %3324 = vrot.lane.b32.xlu0 %v6118_v11, %s7190_s14  ;;  %vm7263_vm10 = vmmov %vm7260_vm7 }
 0x478   : > { %v6368_v21 = vpop.permute.xlu0 %2554  ;;  %v2553_v38 = vpop.permute.xlu1 %2552 }
 0x479   : > { %v2566_v18 = vsel %vm7255_vm12, %v2551_v36, %v2553_v38  ;;  %v2567_v55 = vsel %vm7256_vm15, %v2553_v38, %v6368_v21  ;;  %vm7264_vm12 = vmmov %vm7260_vm7  ;;  %vm7265_vm15 = vcmask 728064  }
 0x47a   : > { %3322 = vrot.lane.b32.xlu1 %v6121_v14, %s7190_s14  ;;  %3262 = vrot.lane.b32.xlu0 %v6121_v14, %s7189_s13  ;;  %v4020_v43 = vpack.c.bf16 %v2567_v55, %v2507_v32  ;;  %v4019_v4 = vpack.c.bf16 %v2566_v18, %v2506_v1 }
 0x47c   : > { %v2611_v15 = vpop.permute.xlu0 %2610  ;;  %v2609_v52 = vpop.permute.xlu1 %2608  ;;  %4193 = vmatprep.subr.bf16.mxu1 %v4020_v43 }
 0x47d   : > { %v2624_v50 = vsel %vm7257_vm9, %v6267_v2, %v2609_v52  ;;  %v2625_v33 = vsel %vm7258_vm6, %v2609_v52, %v2611_v15  ;;  %4194 = vmatpush1.bf16.msra.mxu1 %v4019_v4  ;;  %vm7266_vm9 = vmmov %vm7265_vm15  ;;  %vm7267_vm6 = vcmask 89088  }
 0x47e   : > { %3270 = vrot.lane.b32.xlu1 %v6136_v46, %s7189_s13  ;;  %3268 = vrot.lane.b32.xlu0 %v6127_v28, %s7189_s13 }
 0x480   : > { %v2671_v0 = vpop.permute.xlu0 %2670  ;;  %v2669_v37 = vpop.permute.xlu1 %2668 }
 0x481   : > { %v2684_v19 = vsel %vm7259_vm8, %v6277_v49, %v2669_v37  ;;  %v2685_v31 = vsel %vm7260_vm7, %v2669_v37, %v2671_v0  ;;  %vm7268_vm8 = vmmov %vm7267_vm6 }
 0x482   : > { %3330 = vrot.lane.b32.xlu1 %v6136_v46, %s7190_s14  ;;  %3328 = vrot.lane.b32.xlu0 %v6127_v28, %s7190_s14  ;;  %v4026_v2 = vpack.c.bf16 %v2685_v31, %v2625_v33  ;;  %v4025_v12 = vpack.c.bf16 %v2684_v19, %v2624_v50  ;;  %vm7269_vm7 = vmmov %vm7266_vm9 }
 0x484   : > { %v6391_v51 = vpop.permute.xlu0 %2614  ;;  %v2613_v29 = vpop.permute.xlu1 %2612  ;;  %4154 = vmatprep.subr.bf16.mxu0 %v4026_v2 }
 0x485   : > { %v2626_v54 = vsel %vm7261_vm5, %v2611_v15, %v2613_v29  ;;  %v2627_v10 = vsel %vm7262_vm4, %v2613_v29, %v6391_v51  ;;  %4155 = vmatpush1.bf16.msra.mxu0 %v4025_v12  ;;  %vm7270_vm5 = vmmov %vm7269_vm7 }
 0x486   : > { %3386 = vrot.lane.b32.xlu1 %v6124_v17, %s7181_s24  ;;  %3384 = vrot.lane.b32.xlu0 %v6118_v11, %s7181_s24  ;;  %vm7271_vm4 = vmmov %vm7267_vm6 }
 0x488   : > { %v6400_v49 = vpop.permute.xlu0 %2674  ;;  %v2673_v59 = vpop.permute.xlu1 %2672 }
 0x489   : > { %v2686_v56 = vsel %vm7263_vm10, %v2671_v0, %v2673_v59  ;;  %v2687_v26 = vsel %vm7264_vm12, %v2673_v59, %v6400_v49  ;;  %vm7272_vm10 = vmmov %vm7271_vm4  ;;  %vm7273_vm12 = vcmask 80896  }
 0x48a   : > { %3444 = vrot.lane.b32.xlu0 %v6118_v11, %s7191_s15  ;;  %3446 = vrot.lane.b32.xlu1 %v6124_v17, %s7191_s15  ;;  %v4028_v47 = vpack.c.bf16 %v2687_v26, %v2627_v10  ;;  %v4027_v27 = vpack.c.bf16 %v2686_v56, %v2626_v54 }
 0x48c   : > { %v2731_v25 = vpop.permute.xlu0 %2730  ;;  %v2729_v8 = vpop.permute.xlu1 %2728  ;;  %4195 = vmatprep.subr.bf16.mxu1 %v4028_v47 }
 0x48d   : > { %v2744_v36 = vsel %vm7265_vm15, %v6279_v48, %v2729_v8  ;;  %v2745_v9 = vsel %vm7266_vm9, %v2729_v8, %v2731_v25  ;;  %4196 = vmatpush1.bf16.msra.mxu1 %v4027_v27  ;;  %vm7274_vm15 = vcmask 72704   ;;  %vm7275_vm9 = vmmov %vm7273_vm12 }
 0x48e   : > { %3382 = vrot.lane.b32.xlu0 %v6121_v14, %s7181_s24  ;;  %3442 = vrot.lane.b32.xlu1 %v6121_v14, %s7191_s15 }
 0x490   : > { %v2791_v61 = vpop.permute.xlu0 %2790  ;;  %v2789_v30 = vpop.permute.xlu1 %2788 }
 0x491   : > { %v2805_v44 = vsel %vm7267_vm6, %v2789_v30, %v2791_v61  ;;  %vm7276_vm6 = vmmov %vm7274_vm15 }
 0x492   : > { %3388 = vrot.lane.b32.xlu0 %v6127_v28, %s7181_s24  ;;  %3390 = vrot.lane.b32.xlu1 %v6136_v46, %s7181_s24  ;;  %v4034_v48 = vpack.c.bf16 %v2805_v44, %v2745_v9  ;;  %s7281_s24 = smov 18  }
 0x494   : > { %v2787_v53 = vpop.permute.xlu0 %2786  ;;  %v2733_v3 = vpop.permute.xlu1 %2732  ;;  %4156 = vmatprep.subr.bf16.mxu0 %v4034_v48 }
 0x495   : > { %v2804_v1 = vsel %vm7268_vm8, %v2787_v53, %v2789_v30  ;;  %v2746_v32 = vsel %vm7269_vm7, %v2731_v25, %v2733_v3  ;;  %vm7277_vm8 = vmmov %vm7275_vm9 }
 0x496   : > { %3448 = vrot.lane.b32.xlu0 %v6127_v28, %s7191_s15  ;;  %3450 = vrot.lane.b32.xlu1 %v6136_v46, %s7191_s15  ;;  %v4033_v38 = vpack.c.bf16 %v2804_v1, %v2744_v36  ;;  %vm7278_vm7 = vmmov %vm7277_vm8 }
 0x498   : > { %v6427_v18 = vpop.permute.xlu0 %2734  ;;  %v2793_v55 = vpop.permute.xlu1 %2792  ;;  %4157 = vmatpush1.bf16.msra.mxu0 %v4033_v38 }
 0x499   : > { %v2747_v43 = vsel %vm7270_vm5, %v2733_v3, %v6427_v18  ;;  %v2806_v4 = vsel %vm7271_vm4, %v2791_v61, %v2793_v55  ;;  %vm7279_vm5 = vmmov %vm7276_vm6 }
 0x49a   : > { %3504 = vrot.lane.b32.xlu0 %v6118_v11, %s7192_s17  ;;  %3506 = vrot.lane.b32.xlu1 %v6124_v17, %s7192_s17  ;;  %v4035_v0 = vpack.c.bf16 %v2806_v4, %v2746_v32  ;;  %vm7280_vm4 = vmmov %vm7279_vm5 }
 0x49c   : > { %v6436_v15 = vpop.permute.xlu0 %2794  ;;  %v2849_v52 = vpop.permute.xlu1 %2848 }
 0x49d   : > { %v2807_v50 = vsel %vm7272_vm10, %v2793_v55, %v6436_v15  ;;  %vm7282_vm10 = vcmask 7168  }
 0x49e   : > { %3564 = vrot.lane.b32.xlu0 %v6118_v11, %s7193_s16  ;;  %3566 = vrot.lane.b32.xlu1 %v6124_v17, %s7193_s16  ;;  %v4036_v33 = vpack.c.bf16 %v2807_v50, %v2747_v43 }
 0x4a0   : > { %v2851_v37 = vpop.permute.xlu0 %2850  ;;  %v2909_v19 = vpop.permute.xlu1 %2908  ;;  %4197 = vmatprep.subr.bf16.mxu1 %v4036_v33 }
 0x4a1   : > { %v2865_v31 = vsel %vm7273_vm12, %v2849_v52, %v2851_v37  ;;  %4198 = vmatpush1.bf16.msra.mxu1 %v4035_v0  ;;  %vm7283_vm12 = vmmov %vm7282_vm10 }
 0x4a2   : > { %3502 = vrot.lane.b32.xlu0 %v6121_v14, %s7192_s17  ;;  %3562 = vrot.lane.b32.xlu1 %v6121_v14, %s7193_s16 }
 0x4a4   : > { %v2911_v2 = vpop.permute.xlu0 %2910  ;;  %v2847_v12 = vpop.permute.xlu1 %2846 }
 0x4a5   : > { %v2925_v29 = vsel %vm7274_vm15, %v2909_v19, %v2911_v2  ;;  %v2864_v54 = vsel %vm7275_vm9, %v2847_v12, %v2849_v52  ;;  %vm7284_vm15 = vmmov %vm7282_vm10 }
 0x4a6   : > { %3508 = vrot.lane.b32.xlu0 %v6127_v28, %s7192_s17  ;;  %3510 = vrot.lane.b32.xlu1 %v6136_v46, %s7192_s17  ;;  %v4042_v10 = vpack.c.bf16 %v2925_v29, %v2865_v31  ;;  %vm7285_vm9 = vmmov %vm7282_vm10 }
 0x4a8   : > { %v2907_v59 = vpop.permute.xlu0 %2906  ;;  %v2853_v56 = vpop.permute.xlu1 %2852  ;;  %4158 = vmatprep.subr.bf16.mxu0 %v4042_v10 }
 0x4a9   : > { %v2924_v26 = vsel %vm7276_vm6, %v2907_v59, %v2909_v19  ;;  %v2866_v47 = vsel %vm7277_vm8, %v2851_v37, %v2853_v56  ;;  %vm7286_vm6 = vcmask 1039360   ;;  %vm7287_vm8 = vcmask 973824  }
 0x4aa   : > { %3568 = vrot.lane.b32.xlu0 %v6127_v28, %s7193_s16  ;;  %3570 = vrot.lane.b32.xlu1 %v6136_v46, %s7193_s16  ;;  %v4041_v27 = vpack.c.bf16 %v2924_v26, %v2864_v54 }
 0x4ac   : > { %v6461_v25 = vpop.permute.xlu0 %2854  ;;  %v2913_v8 = vpop.permute.xlu1 %2912  ;;  %4159 = vmatpush1.bf16.msra.mxu0 %v4041_v27 }
 0x4ad   : > { %v2867_v36 = vsel %vm7278_vm7, %v2853_v56, %v6461_v25  ;;  %v2926_v9 = vsel %vm7279_vm5, %v2911_v2, %v2913_v8  ;;  %vm7289_vm7 = vmmov %vm7286_vm6 }
 0x4ae   : > { %3624 = vrot.lane.b32.xlu0 %v6118_v11, %s7183_s25  ;;  %3626 = vrot.lane.b32.xlu1 %v6124_v17, %s7183_s25  ;;  %v4043_v53 = vpack.c.bf16 %v2926_v9, %v2866_v47  ;;  %vm7290_vm5 = vmmov %vm7287_vm8 }
 0x4b0   : > { %v6470_v61 = vpop.permute.xlu0 %2914  ;;  %v2969_v30 = vpop.permute.xlu1 %2968 }
 0x4b1   : > { %v2927_v44 = vsel %vm7280_vm4, %v2913_v8, %v6470_v61  ;;  %vm7291_vm4 = vmmov %vm7286_vm6 }
 0x4b2   : > { %3684 = vrot.lane.b32.xlu0 %v6118_v11, %s7281_s24  ;;  %3686 = vrot.lane.b32.xlu1 %v6124_v17, %s7281_s24  ;;  %v4044_v48 = vpack.c.bf16 %v2927_v44, %v2867_v36 }
 0x4b4   : > { %v2971_v3 = vpop.permute.xlu0 %2970  ;;  %v2967_v1 = vpop.permute.xlu1 %2966  ;;  %4199 = vmatprep.subr.bf16.mxu1 %v4044_v48 }
 0x4b5   : > { %v2985_v32 = vsel %vm7282_vm10, %v2969_v30, %v2971_v3  ;;  %v2984_v38 = vsel %vm7283_vm12, %v2967_v1, %v2969_v30  ;;  %4200 = vmatpush1.bf16.msra.mxu1 %v4043_v53  ;;  %vm7292_vm10 = vmmov %vm7291_vm4 }
 0x4b6   : > { %3622 = vrot.lane.b32.xlu0 %v6121_v14, %s7183_s25  ;;  %3682 = vrot.lane.b32.xlu1 %v6121_v14, %s7281_s24  ;;  %v4050_v11 = vpack.c.bf16 %v6155_v57, %v2985_v32  ;;  %v4049_v17 = vpack.c.bf16 %v6157_v22, %v2984_v38  ;;  %vm7293_vm12 = vmmov %vm7290_vm5 }
 0x4b8   : > { %v2973_v55 = vpop.permute.xlu0 %2972  ;;  %v6486_v43 = vpop.permute.xlu1 %2974  ;;  %4160 = vmatprep.subr.bf16.mxu0 %v4050_v11 }
 0x4b9   : > { %v2986_v4 = vsel %vm7284_vm15, %v2971_v3, %v2973_v55  ;;  %v2987_v52 = vsel %vm7285_vm9, %v2973_v55, %v6486_v43  ;;  %4161 = vmatpush1.bf16.msra.mxu0 %v4049_v17  ;;  %vm7294_vm15 = vmmov %vm7290_vm5  ;;  %vm4119_vm9 = vcmask 719872  }
 0x4ba   : > { %3628 = vrot.lane.b32.xlu0 %v6127_v28, %s7183_s25  ;;  %3630 = vrot.lane.b32.xlu1 %v6136_v46, %s7183_s25  ;;  %v4052_v14 = vpack.c.bf16 %v6163_v5, %v2987_v52  ;;  %v4051_v50 = vpack.c.bf16 %v6165_v58, %v2986_v4  ;;  %s7288_s25 = smov 17  }
 0x4bc   : > { %v3043_v33 = vpop.permute.xlu0 %3042  ;;  %v3045_v0 = vpop.permute.xlu1 %3044  ;;  %4201 = vmatprep.subr.bf16.mxu1 %v4052_v14 }
 0x4bd   : > { %v3057_v37 = vsel %vm7286_vm6, %v3043_v33, %v3045_v0  ;;  %4202 = vmatpush1.bf16.msra.mxu1 %v4051_v50  ;;  %vm7295_vm6 = vcmask 965632  }
 0x4be   : > { %3688 = vrot.lane.b32.xlu0 %v6127_v28, %s7281_s24  ;;  %3690 = vrot.lane.b32.xlu1 %v6136_v46, %s7281_s24 }
 0x4c0   : > { %v3098_v19 = vpop.permute.xlu0 %3097  ;;  %v3100_v31 = vpop.permute.xlu1 %3099 }
 0x4c1   : > { %v3112_v2 = vsel %vm7287_vm8, %v3098_v19, %v3100_v31  ;;  %vm7296_vm8 = vcmask 957440  }
 0x4c2   : > { %3742 = vrot.lane.b32.xlu0 %v6157_v22, %s7288_s25  ;;  %3744 = vrot.lane.b32.xlu1 %v6155_v57, %s7288_s25  ;;  %v4058_v12 = vpack.c.bf16 %v3112_v2, %v3057_v37 }
 0x4c4   : > { %v3041_v29 = vpop.permute.xlu0 %3040  ;;  %v3096_v54 = vpop.permute.xlu1 %3095  ;;  %4162 = vmatprep.subr.bf16.mxu0 %v4058_v12  ;;  %v6574_v12 = vld [vmem:[#allocation3 + $0x40] sm:$0xff] }
 0x4c5   : > { %v3056_v10 = vsel %vm7289_vm7, %v3041_v29, %v3043_v33  ;;  %v3111_v28 = vsel %vm7290_vm5, %v3096_v54, %v3098_v19  ;;  %vm7297_vm7 = vmmov %vm7295_vm6 }
 0x4c6   : > { %3746 = vrot.lane.b32.xlu0 %v6165_v58, %s7288_s25  ;;  %3748 = vrot.lane.b32.xlu1 %v6163_v5, %s7288_s25  ;;  %v4057_v59 = vpack.c.bf16 %v3111_v28, %v3056_v10  ;;  %v6525_v5 = vld [vmem:[%s7128_s4] sm:$0xff]  ;;  %vm7298_vm5 = vmmov %vm7296_vm8 }
 0x4c7   : > { %v6531_v27 = vcombine.high %v6525_v5, %v6525_v5 }
 0x4c8   : > { %v3047_v56 = vpop.permute.xlu0 %3046  ;;  %v6513_v22 = vpop.permute.xlu1 %3048  ;;  %4163 = vmatpush1.bf16.msra.mxu0 %v4057_v59 }
 0x4c9   : > { %v3058_v57 = vsel %vm7291_vm4, %v3045_v0, %v3047_v56  ;;  %v3059_v26 = vsel %vm7292_vm10, %v3047_v56, %v6513_v22  ;;  %4900 = vmatprep.mubr.msk.bf16.mxu0 %vm4119_vm9, %v6531_v27  ;;  %4902 = vmatprep.mubr.msk.bf16.mxu1 %vm4119_vm9, %v6531_v27  ;;  %vm7299_vm4 = vmmov %vm7295_vm6 }
 0x4ca   : > { %3750 = vrot.lane.b32.xlu0 %v6136_v46, %s7288_s25  ;;  %2269 = vrot.lane.b32.xlu1 %v6136_v46, %s5014_s28  ;;  %vm7300_vm10 = vmmov %vm7299_vm4 }
 0x4cc   : > { %v3102_v58 = vpop.permute.xlu0 %3101  ;;  %v6527_v47 = vpop.permute.xlu1 %3103 }
 0x4cd   : > { %v3113_v8 = vsel %vm7293_vm12, %v3100_v31, %v3102_v58  ;;  %v3114_v36 = vsel %vm7294_vm15, %v3102_v58, %v6527_v47  ;;  %vm7301_vm12 = vmmov %vm7298_vm5  ;;  %v6586_v58 = vld [vmem:[#allocation3 + $0x28] sm:$0xff] }
 0x4ce   : > { %2271 = vrot.lane.b32.xlu0 %v6142_v42, %s5014_s28  ;;  %2324 = vrot.lane.b32.xlu1 %v6136_v46, %s5013_s27  ;;  %v4060_v9 = vpack.c.bf16 %v3114_v36, %v3059_v26  ;;  %v4059_v30 = vpack.c.bf16 %v3113_v8, %v3058_v57  ;;  %vm7302_vm15 = vmmov %vm7298_vm5 }
 0x4d0   : > { %v3153_v44 = vpop.permute.xlu0 %3152  ;;  %v3155_v48 = vpop.permute.xlu1 %3154  ;;  %4203 = vmatprep.subr.bf16.mxu1 %v4060_v9 }
 0x4d1   : > { %v3167_v53 = vsel %vm7295_vm6, %v3153_v44, %v3155_v48  ;;  %4204 = vmatpush1.bf16.msra.mxu1 %v4059_v30  ;;  %vm7303_vm6 = vcmask 318464  }
 0x4d2   : > { %2326 = vrot.lane.b32.xlu0 %v6142_v42, %s5013_s27  ;;  %2273 = vrot.lane.b32.xlu1 %v6145_v40, %s5014_s28  ;;  %s7318_s28 = smov 89  }
 0x4d4   : > { %v3208_v3 = vpop.permute.xlu0 %3207  ;;  %v3210_v1 = vpop.permute.xlu1 %3209 }
 0x4d5   : > { %v3222_v32 = vsel %vm7296_vm8, %v3208_v3, %v3210_v1  ;;  %vm7304_vm8 = vcmask 310272  }
 0x4d6   : > { %2328 = vrot.lane.b32.xlu0 %v6145_v40, %s5013_s27  ;;  %2379 = vrot.lane.b32.xlu1 %v6136_v46, %s5015_s29  ;;  %v4066_v38 = vpack.c.bf16 %v3222_v32, %v3167_v53  ;;  %s7312_s27 = smov 90  }
 0x4d8   : > { %v3151_v11 = vpop.permute.xlu0 %3150  ;;  %v3206_v17 = vpop.permute.xlu1 %3205  ;;  %4164 = vmatprep.subr.bf16.mxu0 %v4066_v38 }
 0x4d9   : > { %v3166_v55 = vsel %vm7297_vm7, %v3151_v11, %v3153_v44  ;;  %v3221_v4 = vsel %vm7298_vm5, %v3206_v17, %v3208_v3  ;;  %vm7305_vm7 = vmmov %vm7303_vm6 }
 0x4da   : > { %2381 = vrot.lane.b32.xlu0 %v6142_v42, %s5015_s29  ;;  %2436 = vrot.lane.b32.xlu1 %v6136_v46, %s5016_s30  ;;  %v4065_v52 = vpack.c.bf16 %v3221_v4, %v3166_v55  ;;  %vm7306_vm5 = vmmov %vm7304_vm8 }
 0x4dc   : > { %v3157_v14 = vpop.permute.xlu0 %3156  ;;  %v6560_v50 = vpop.permute.xlu1 %3158  ;;  %4165 = vmatpush1.bf16.msra.mxu0 %v4065_v52 }
 0x4dd   : > { %v3168_v33 = vsel %vm7299_vm4, %v3155_v48, %v3157_v14  ;;  %v3169_v0 = vsel %vm7300_vm10, %v3157_v14, %v6560_v50  ;;  %vm7307_vm4 = vmmov %vm7303_vm6 }
 0x4de   : > { %2438 = vrot.lane.b32.xlu0 %v6142_v42, %s5016_s30  ;;  %2440 = vrot.lane.b32.xlu1 %v6145_v40, %s5016_s30  ;;  %vm7308_vm10 = vmmov %vm7307_vm4 }
 0x4e0   : > { %v3212_v37 = vpop.permute.xlu0 %3211  ;;  %v6569_v19 = vpop.permute.xlu1 %3213 }
 0x4e1   : > { %v3223_v31 = vsel %vm7301_vm12, %v3210_v1, %v3212_v37  ;;  %v3224_v2 = vsel %vm7302_vm15, %v3212_v37, %v6569_v19  ;;  %vm7309_vm12 = vmmov %vm7306_vm5 }
 0x4e2   : > { %2442 = vrot.lane.b32.xlu0 %v6574_v12, %s5016_s30  ;;  %2383 = vrot.lane.b32.xlu1 %v6145_v40, %s5015_s29  ;;  %v4068_v29 = vpack.c.bf16 %v3224_v2, %v3169_v0  ;;  %v4067_v54 = vpack.c.bf16 %v3223_v31, %v3168_v33  ;;  %vm7310_vm15 = vmmov %vm7306_vm5  ;;  %s7321_s29 = smov 11   ;;  %s7330_s30 = smov 118  }
 0x4e4   : > { %v3265_v10 = vpop.permute.xlu0 %3264  ;;  %v3267_v28 = vpop.permute.xlu1 %3266  ;;  %4205 = vmatprep.subr.bf16.mxu1 %v4068_v29 }
 0x4e5   : > { %v3281_v59 = vsel %vm7303_vm6, %v3265_v10, %v3267_v28  ;;  %4206 = vmatpush1.bf16.msra.mxu1 %v4067_v54  ;;  %vm7311_vm6 = vcmask 302080  }
 0x4e6   : > { %2496 = vrot.lane.b32.xlu0 %v6136_v46, %s5017_s7  ;;  %2498 = vrot.lane.b32.xlu1 %v6142_v42, %s5017_s7 }
 0x4e8   : > { %v3325_v56 = vpop.permute.xlu0 %3324  ;;  %v3327_v57 = vpop.permute.xlu1 %3326 }
 0x4e9   : > { %v3341_v26 = vsel %vm7304_vm8, %v3325_v56, %v3327_v57  ;;  %vm7313_vm8 = vcmask 236544  }
 0x4ea   : > { %2556 = vrot.lane.b32.xlu0 %v6586_v58, %s5018_s8  ;;  %2558 = vrot.lane.b32.xlu1 %v6142_v42, %s5018_s8  ;;  %v4074_v8 = vpack.c.bf16 %v3341_v26, %v3281_v59  ;;  %v6628_v59 = vld [vmem:[#allocation3 + $0x38] sm:$0xff] }
 0x4ec   : > { %v3263_v36 = vpop.permute.xlu0 %3262  ;;  %v3323_v9 = vpop.permute.xlu1 %3322  ;;  %4166 = vmatprep.subr.bf16.mxu0 %v4074_v8  ;;  %v6641_v8 = vld [vmem:[#allocation3 + $0x30] sm:$0xff] }
 0x4ed   : > { %v3280_v46 = vsel %vm7305_vm7, %v3263_v36, %v3265_v10  ;;  %v3340_v30 = vsel %vm7306_vm5, %v3323_v9, %v3325_v56  ;;  %vm7314_vm7 = vmmov %vm7311_vm6 }
 0x4ee   : > { %2500 = vrot.lane.b32.xlu0 %v6145_v40, %s5017_s7  ;;  %2502 = vrot.lane.b32.xlu1 %v6574_v12, %s5017_s7  ;;  %v4073_v44 = vpack.c.bf16 %v3340_v30, %v3280_v46  ;;  %vm7315_vm5 = vmmov %vm7313_vm8  ;;  %s7331_s7 = smov 117  }
 0x4f0   : > { %v3269_v48 = vpop.permute.xlu0 %3268  ;;  %v6598_v53 = vpop.permute.xlu1 %3270  ;;  %4167 = vmatpush1.bf16.msra.mxu0 %v4073_v44 }
 0x4f1   : > { %v3282_v3 = vsel %vm7307_vm4, %v3267_v28, %v3269_v48  ;;  %v3283_v1 = vsel %vm7308_vm10, %v3269_v48, %v6598_v53  ;;  %vm7316_vm4 = vmmov %vm7311_vm6 }
 0x4f2   : > { %2560 = vrot.lane.b32.xlu0 %v6145_v40, %s5018_s8  ;;  %2562 = vrot.lane.b32.xlu1 %v6574_v12, %s5018_s8  ;;  %vm7317_vm10 = vmmov %vm7316_vm4  ;;  %s7336_s8 = smov 37  }
 0x4f4   : > { %v3329_v32 = vpop.permute.xlu0 %3328  ;;  %v6607_v38 = vpop.permute.xlu1 %3330 }
 0x4f5   : > { %v3342_v11 = vsel %vm7309_vm12, %v3327_v57, %v3329_v32  ;;  %v3343_v17 = vsel %vm7310_vm15, %v3329_v32, %v6607_v38  ;;  %vm7319_vm12 = vmmov %vm7315_vm5 }
 0x4f6   : > { %2616 = vrot.lane.b32.xlu0 %v6586_v58, %s5019_s9  ;;  %2618 = vrot.lane.b32.xlu1 %v6142_v42, %s5019_s9  ;;  %v4076_v55 = vpack.c.bf16 %v3343_v17, %v3283_v1  ;;  %v4075_v4 = vpack.c.bf16 %v3342_v11, %v3282_v3  ;;  %vm7320_vm15 = vmmov %vm7315_vm5 }
 0x4f8   : > { %v3385_v52 = vpop.permute.xlu0 %3384  ;;  %v3387_v14 = vpop.permute.xlu1 %3386  ;;  %4207 = vmatprep.subr.bf16.mxu1 %v4076_v55 }
 0x4f9   : > { %v3401_v33 = vsel %vm7311_vm6, %v3385_v52, %v3387_v14  ;;  %4208 = vmatpush1.bf16.msra.mxu1 %v4075_v4  ;;  %vm7322_vm6 = vcmask 228352  }
 0x4fa   : > { %2676 = vrot.lane.b32.xlu0 %v6586_v58, %s7312_s27  ;;  %2678 = vrot.lane.b32.xlu1 %v6142_v42, %s7312_s27 }
 0x4fc   : > { %v3445_v0 = vpop.permute.xlu0 %3444  ;;  %v3447_v37 = vpop.permute.xlu1 %3446 }
 0x4fd   : > { %v3461_v31 = vsel %vm7313_vm8, %v3445_v0, %v3447_v37  ;;  %vm7323_vm8 = vcmask 220160  }
 0x4fe   : > { %2620 = vrot.lane.b32.xlu0 %v6145_v40, %s5019_s9  ;;  %2622 = vrot.lane.b32.xlu1 %v6574_v12, %s5019_s9  ;;  %v4082_v2 = vpack.c.bf16 %v3461_v31, %v3401_v33  ;;  %s7353_s9 = smov 19  }
 0x500   : > { %v3383_v29 = vpop.permute.xlu0 %3382  ;;  %v3443_v54 = vpop.permute.xlu1 %3442  ;;  %4168 = vmatprep.subr.bf16.mxu0 %v4082_v2 }
 0x501   : > { %v3400_v10 = vsel %vm7314_vm7, %v3383_v29, %v3385_v52  ;;  %v3460_v28 = vsel %vm7315_vm5, %v3443_v54, %v3445_v0  ;;  %vm7324_vm7 = vmmov %vm7322_vm6 }
 0x502   : > { %2680 = vrot.lane.b32.xlu0 %v6628_v59, %s7312_s27  ;;  %2682 = vrot.lane.b32.xlu1 %v6574_v12, %s7312_s27  ;;  %v4081_v42 = vpack.c.bf16 %v3460_v28, %v3400_v10  ;;  %vm7325_vm5 = vmmov %vm7323_vm8 }
 0x504   : > { %v3389_v40 = vpop.permute.xlu0 %3388  ;;  %v6634_v56 = vpop.permute.xlu1 %3390  ;;  %4169 = vmatpush1.bf16.msra.mxu0 %v4081_v42 }
 0x505   : > { %v3402_v57 = vsel %vm7316_vm4, %v3387_v14, %v3389_v40  ;;  %v3403_v26 = vsel %vm7317_vm10, %v3389_v40, %v6634_v56  ;;  %vm7326_vm4 = vmmov %vm7322_vm6 }
 0x506   : > { %2736 = vrot.lane.b32.xlu0 %v6586_v58, %s7318_s28  ;;  %2738 = vrot.lane.b32.xlu1 %v6641_v8, %s7318_s28  ;;  %vm7327_vm10 = vmmov %vm7326_vm4 }
 0x508   : > { %v3449_v36 = vpop.permute.xlu0 %3448  ;;  %v6645_v9 = vpop.permute.xlu1 %3450 }
 0x509   : > { %v3462_v46 = vsel %vm7319_vm12, %v3447_v37, %v3449_v36  ;;  %v3463_v30 = vsel %vm7320_vm15, %v3449_v36, %v6645_v9  ;;  %vm7328_vm12 = vmmov %vm7325_vm5 }
 0x50a   : > { %2796 = vrot.lane.b32.xlu0 %v6586_v58, %s7321_s29  ;;  %2798 = vrot.lane.b32.xlu1 %v6641_v8, %s7321_s29  ;;  %v4084_v44 = vpack.c.bf16 %v3463_v30, %v3403_v26  ;;  %v4083_v48 = vpack.c.bf16 %v3462_v46, %v3402_v57  ;;  %vm7329_vm15 = vmmov %vm7325_vm5 }
 0x50c   : > { %v3505_v3 = vpop.permute.xlu0 %3504  ;;  %v3507_v1 = vpop.permute.xlu1 %3506  ;;  %4209 = vmatprep.subr.bf16.mxu1 %v4084_v44 }
 0x50d   : > { %v3521_v32 = vsel %vm7322_vm6, %v3505_v3, %v3507_v1  ;;  %4210 = vmatpush1.bf16.msra.mxu1 %v4083_v48  ;;  %vm4123_vm6 = vcmask 1043456  }
 0x50e   : > { %2740 = vrot.lane.b32.xlu0 %v6628_v59, %s7318_s28  ;;  %2742 = vrot.lane.b32.xlu1 %v6574_v12, %s7318_s28 }
 0x510   : > { %v3565_v11 = vpop.permute.xlu0 %3564  ;;  %v3567_v17 = vpop.permute.xlu1 %3566 }
 0x511   : > { %v3581_v55 = vsel %vm7323_vm8, %v3565_v11, %v3567_v17 }
 0x512   : > { %2800 = vrot.lane.b32.xlu0 %v6628_v59, %s7321_s29  ;;  %2802 = vrot.lane.b32.xlu1 %v6574_v12, %s7321_s29  ;;  %v4090_v4 = vpack.c.bf16 %v3581_v55, %v3521_v32 }
 0x514   : > { %v3503_v52 = vpop.permute.xlu0 %3502  ;;  %v3563_v14 = vpop.permute.xlu1 %3562  ;;  %4170 = vmatprep.subr.bf16.mxu0 %v4090_v4 }
 0x515   : > { %v3520_v33 = vsel %vm7324_vm7, %v3503_v52, %v3505_v3  ;;  %v3580_v0 = vsel %vm7325_vm5, %v3563_v14, %v3565_v11  ;;  %vm7337_vm7 = vcmask 818176  }
 0x516   : > { %2856 = vrot.lane.b32.xlu0 %v6586_v58, %s7240_s20  ;;  %2858 = vrot.lane.b32.xlu1 %v6641_v8, %s7240_s20  ;;  %v4089_v37 = vpack.c.bf16 %v3580_v0, %v3520_v33  ;;  %vm7338_vm5 = vmmov %vm7337_vm7 }
 0x518   : > { %v3509_v31 = vpop.permute.xlu0 %3508  ;;  %v6670_v2 = vpop.permute.xlu1 %3510  ;;  %4171 = vmatpush1.bf16.msra.mxu0 %v4089_v37 }
 0x519   : > { %v3522_v29 = vsel %vm7326_vm4, %v3507_v1, %v3509_v31  ;;  %v3523_v54 = vsel %vm7327_vm10, %v3509_v31, %v6670_v2  ;;  %vm7341_vm10 = vmmov %vm7338_vm5 }
 0x51a   : > { %2916 = vrot.lane.b32.xlu0 %v6586_v58, %s7241_s23  ;;  %2918 = vrot.lane.b32.xlu1 %v6641_v8, %s7241_s23 }
 0x51c   : > { %v3569_v10 = vpop.permute.xlu0 %3568  ;;  %v6679_v28 = vpop.permute.xlu1 %3570 }
 0x51d   : > { %v3582_v42 = vsel %vm7328_vm12, %v3567_v17, %v3569_v10  ;;  %v3583_v40 = vsel %vm7329_vm15, %v3569_v10, %v6679_v28  ;;  %vm7342_vm12 = vmmov %vm7338_vm5 }
 0x51e   : > { %2860 = vrot.lane.b32.xlu0 %v6628_v59, %s7240_s20  ;;  %2862 = vrot.lane.b32.xlu1 %v6574_v12, %s7240_s20  ;;  %v4092_v57 = vpack.c.bf16 %v3583_v40, %v3523_v54  ;;  %v4091_v26 = vpack.c.bf16 %v3582_v42, %v3522_v29 }
 0x520   : > { %v3625_v36 = vpop.permute.xlu0 %3624  ;;  %v3627_v46 = vpop.permute.xlu1 %3626  ;;  %4211 = vmatprep.subr.bf16.mxu1 %v4092_v57 }
 0x521   : > { %v3641_v30 = vsel %vm1597_vm14, %v3625_v36, %v3627_v46  ;;  %4212 = vmatpush1.bf16.msra.mxu1 %v4091_v26 }
 0x522   : > { %2920 = vrot.lane.b32.xlu0 %v6628_v59, %s7241_s23  ;;  %2922 = vrot.lane.b32.xlu1 %v6574_v12, %s7241_s23 }
 0x524   : > { %v3685_v44 = vpop.permute.xlu0 %3684  ;;  %v3687_v48 = vpop.permute.xlu1 %3686 }
 0x525   : > { %v3701_v3 = vsel %vm1655_vm13, %v3685_v44, %v3687_v48 }
 0x526   : > { %2976 = vrot.lane.b32.xlu0 %v6586_v58, %s7242_s12  ;;  %2978 = vrot.lane.b32.xlu1 %v6641_v8, %s7242_s12  ;;  %v4098_v1 = vpack.c.bf16 %v3701_v3, %v3641_v30 }
 0x528   : > { %v3623_v32 = vpop.permute.xlu0 %3622  ;;  %v3683_v11 = vpop.permute.xlu1 %3682  ;;  %4172 = vmatprep.subr.bf16.mxu0 %v4098_v1 }
 0x529   : > { %v3640_v17 = vsel %vm1597_vm14, %v3623_v32, %v3625_v36  ;;  %v3700_v55 = vsel %vm1655_vm13, %v3683_v11, %v3685_v44 }
 0x52a   : > { %2980 = vrot.lane.b32.xlu0 %v6628_v59, %s7242_s12  ;;  %2982 = vrot.lane.b32.xlu1 %v6574_v12, %s7242_s12  ;;  %v4097_v4 = vpack.c.bf16 %v3700_v55, %v3640_v17  ;;  %v6739_v17 = vcombine.low %v6525_v5, %v6525_v5 }
 0x52c   : > { %v3629_v52 = vpop.permute.xlu0 %3628  ;;  %v6704_v58 = vpop.permute.xlu1 %3630  ;;  %4173 = vmatpush1.bf16.msra.mxu0 %v4097_v4 }
 0x52d   : > { %v3642_v14 = vsel %vm1597_vm14, %v3627_v46, %v3629_v52  ;;  %v3643_v33 = vsel %vm1597_vm14, %v3629_v52, %v6704_v58 }
 0x52e   : > { %3050 = vrot.lane.b32.xlu0 %v6641_v8, %s7243_s11  ;;  %3052 = vrot.lane.b32.xlu1 %v6628_v59, %s7243_s11 }
 0x530   : > { %v3689_v0 = vpop.permute.xlu0 %3688  ;;  %v6713_v37 = vpop.permute.xlu1 %3690 }
 0x531   : > { %v3702_v31 = vsel %vm1655_vm13, %v3687_v48, %v3689_v0  ;;  %v3703_v29 = vsel %vm1655_vm13, %v3689_v0, %v6713_v37 }
 0x532   : > { %3105 = vrot.lane.b32.xlu0 %v6641_v8, %s7244_s10  ;;  %3107 = vrot.lane.b32.xlu1 %v6628_v59, %s7244_s10  ;;  %v4100_v54 = vpack.c.bf16 %v3703_v29, %v3643_v33  ;;  %v4099_v10 = vpack.c.bf16 %v3702_v31, %v3642_v14 }
 0x534   : > { %v3743_v42 = vpop.permute.xlu0 %3742  ;;  %v3745_v40 = vpop.permute.xlu1 %3744  ;;  %4213 = vmatprep.subr.bf16.mxu1 %v4100_v54 }
 0x535   : > { %v3760_v57 = vsel %vm1712_vm11, %v3743_v42, %v3745_v40  ;;  %4214 = vmatpush1.bf16.msra.mxu1 %v4099_v10 }
 0x536   : > { %3054 = vrot.lane.b32.xlu0 %v6574_v12, %s7243_s11  ;;  %3109 = vrot.lane.b32.xlu1 %v6574_v12, %s7244_s10  ;;  %v4105_v46 = vpack.c.bf16 %v3760_v57, %v3760_v57 }
 0x538   : > { %v3747_v26 = vpop.permute.xlu0 %3746  ;;  %v3749_v36 = vpop.permute.xlu1 %3748  ;;  %v4125_v32 = vsel %vm4123_vm6, %v4105_v46, 0 }
 0x539   : > { %v3761_v30 = vsel %vm1712_vm11, %v3745_v40, %v3747_v26  ;;  %v3762_v44 = vsel %vm1712_vm11, %v3747_v26, %v3749_v36 }
 0x53a   : > { %3160 = vrot.lane.b32.xlu0 %v6641_v8, %s7330_s30  ;;  %3162 = vrot.lane.b32.xlu1 %v6628_v59, %s7330_s30  ;;  %v4106_v48 = vpack.c.bf16 %v3761_v30, %v3761_v30  ;;  %v4107_v11 = vpack.c.bf16 %v3762_v44, %v3762_v44 }
 0x53c   : > { %v6733_v3 = vpop.permute.xlu0 %3750  ;;  %v2270_v1 = vpop.permute.xlu1 %2269  ;;  %4899 = vmatprep.subr.msk.bf16.mxu0 %vm4123_vm6, %v4106_v48  ;;  %v4131_v5 = vsel %vm4123_vm6, %v4107_v11, 0 }
 0x53d   : > { %v3763_v55 = vsel %vm1712_vm11, %v3749_v36, %v6733_v3  ;;  %v2279_v4 = vsel %vm283_vm0, %v6297_v41, %v2270_v1  ;;  %4175 = vmatpush1.bf16.msra.mxu0 %v4125_v32 }
 0x53e   : > { %3215 = vrot.lane.b32.xlu0 %v6641_v8, %s7331_s7  ;;  %3217 = vrot.lane.b32.xlu1 %v6628_v59, %s7331_s7  ;;  %v4108_v52 = vpack.c.bf16 %v3763_v55, %v3763_v55 }
 0x540   : > { %v2272_v14 = vpop.permute.xlu0 %2271  ;;  %v2325_v33 = vpop.permute.xlu1 %2324  ;;  %4901 = vmatprep.subr.msk.bf16.mxu1 %vm4123_vm6, %v4108_v52  ;;  %4181 = vmatmul.mubr.bf16.vlgmr.msra.gmra.mrb[8].mxu0 %v6739_v17 }
 0x541   : > { %v2280_v0 = vsel %vm283_vm0, %v2270_v1, %v2272_v14  ;;  %v2334_v41 = vsel %vm336_vm1, %v6306_v45, %v2325_v33  ;;  %4216 = vmatpush1.bf16.msra.mxu1 %v4131_v5  ;;  %4904 = vmatprep.mubr.msk.bf16.mxu0 %vm4119_vm9, %v6531_v27 }
 0x542   : > { %3164 = vrot.lane.b32.xlu0 %v6574_v12, %s7330_s30  ;;  %3219 = vrot.lane.b32.xlu1 %v6574_v12, %s7331_s7  ;;  %v4005_v42 = vpack.c.bf16 %v2334_v41, %v2279_v4 }
 0x544   : > { %v2327_v31 = vpop.permute.xlu0 %2326  ;;  %v2274_v29 = vpop.permute.xlu1 %2273  ;;  %4222 = vmatmul.mubr.bf16.vlgmr.msra.gmra.mrb[8].mxu1 %v6739_v17 }
 0x545   : > { %v2335_v54 = vsel %vm336_vm1, %v2325_v33, %v2327_v31  ;;  %v2281_v10 = vsel %vm283_vm0, %v2272_v14, %v2274_v29  ;;  %2297 = vst.msk [vmem:[#allocation4 + $0x38] sm:$0xff] %vm2154_vm3, %v2274_v29  ;;  %4906 = vmatprep.mubr.msk.bf16.mxu1 %vm4119_vm9, %v6531_v27  ;;  %v6779_v27 = vld [vmem:[#allocation3 + $0x48] sm:$0xff]  ;;  %vm7332_vm0 = vcmask 826368  }
 0x546   : > { %3272 = vrot.lane.b32.xlu0 %v6641_v8, %s7189_s13  ;;  %3274 = vrot.lane.b32.xlu1 %v6628_v59, %s7189_s13  ;;  %v4006_v45 = vpack.c.bf16 %v2335_v54, %v2280_v0  ;;  %vm7334_vm9 = vmmov %vm7332_vm0 }
 0x547   : > { %vm7335_vm8 = vmmov %vm7332_vm0 }
 0x548   : > { %v2329_v40 = vpop.permute.xlu0 %2328  ;;  %v2380_v57 = vpop.permute.xlu1 %2379  ;;  %4230 = vmatprep.subr.bf16.mxu0 %v4006_v45 }
 0x549   : > { %v2336_v26 = vsel %vm336_vm1, %v2327_v31, %v2329_v40  ;;  %2352 = vst.msk [vmem:[#allocation4 + $0x78] sm:$0xff] %vm2154_vm3, %v2329_v40  ;;  %v2389_v36 = vsel %vm389_vm2, %v6327_v20, %v2380_v57  ;;  %4231 = vmatpush1.bf16.msra.mxu0 %v4005_v42  ;;  %vm7333_vm1 = vmmov %vm7332_vm0 }
 0x54a   : > { %3332 = vrot.lane.b32.xlu0 %v6641_v8, %s7190_s14  ;;  %3334 = vrot.lane.b32.xlu1 %v6628_v59, %s7190_s14 }
 0x54c   : > { %v2382_v46 = vpop.permute.xlu0 %2381  ;;  %v2437_v30 = vpop.permute.xlu1 %2436  ;;  %v3792_v32 = vld [vmem:[#allocation4 + $0x38] sm:$0xff] }
 0x54d   : > { %v2390_v44 = vsel %vm389_vm2, %v2380_v57, %v2382_v46  ;;  %v2448_v48 = vsel %vm7332_vm0, %v6336_v63, %v2437_v30  ;;  %v4007_v63 = vpack.c.bf16 %v2336_v26, %v2281_v10 }
 0x54e   : > { %3276 = vrot.lane.b32.xlu0 %v6574_v12, %s7189_s13  ;;  %3278 = vrot.lane.b32.xlu1 %v6779_v27, %s7189_s13  ;;  %v4013_v33 = vpack.c.bf16 %v2448_v48, %v2389_v36  ;;  %s4921_s13 = sshll.u32 %s7411_s22, 6 }
 0x54f   : > { %s251_s18 = scalar_lea.vmem %s7130_s6, %s4921_s13 }
 0x550   : > { %v2439_v20 = vpop.permute.xlu0 %2438  ;;  %v2441_v1 = vpop.permute.xlu1 %2440  ;;  %v3800_v11 = vld [vmem:[#allocation4 + $0x78] sm:$0xff] }
 0x551   : > { %v2449_v55 = vsel %vm7333_vm1, %v2437_v30, %v2439_v20  ;;  %v2450_v4 = vsel %vm7334_vm9, %v2439_v20, %v2441_v1  ;;  %v4008_v52 = vpack.c.bf16 %v3800_v11, %v3792_v32  ;;  %vm7345_vm1 = vcmask 744448  }
 0x552   : > { %3336 = vrot.lane.b32.xlu0 %v6574_v12, %s7190_s14  ;;  %3338 = vrot.lane.b32.xlu1 %v6779_v27, %s7190_s14  ;;  %v4014_v14 = vpack.c.bf16 %v2449_v55, %v2390_v44  ;;  %vm7346_vm9 = vmmov %vm7345_vm1 }
 0x553   : > { %4271 = vmatprep.subr.bf16.mxu1 %v4008_v52  ;;  %v6826_v52 = vld [vmem:[#allocation4 + $0x368] sm:$0xff] }
 0x554   : > { %v2443_v5 = vpop.permute.xlu0 %2442  ;;  %4272 = vmatpush1.bf16.msra.mxu1 %v4007_v63  ;;  %v2384_v0 = vpop.permute.xlu1 %2383  ;;  %4232 = vmatprep.subr.bf16.mxu0 %v4014_v14 }
 0x555   : > { %v2451_v41 = vsel %vm7335_vm8, %v2441_v1, %v2443_v5  ;;  %v2391_v31 = vsel %vm389_vm2, %v2382_v46, %v2384_v0  ;;  %2407 = vst.msk [vmem:[#allocation4 + $0xb8] sm:$0xff] %vm2154_vm3, %v2384_v0  ;;  %4233 = vmatpush1.bf16.msra.mxu0 %v4013_v33  ;;  %vm7339_vm2 = vcmask 809984   ;;  %v6837_v0 = vld [vmem:[#allocation4 + $0x370] sm:$0xff]  ;;  %vm7347_vm8 = vcmask 736256  }
 0x556   : > { %2467 = vst.msk [vmem:[#allocation4 + $0xf8] sm:$0xff] %vm2154_vm3, %v2451_v41  ;;  %3392 = vrot.lane.b32.xlu0 %v6641_v8, %s7336_s8  ;;  %3394 = vrot.lane.b32.xlu1 %v6628_v59, %s7336_s8  ;;  %vm7340_vm4 = vmmov %vm7339_vm2  ;;  %v4015_v44 = vpack.c.bf16 %v2450_v4, %v2391_v31 }
 0x557   : > { %vm7343_vm15 = vmmov %vm7339_vm2 }
 0x558   : > { %v2497_v29 = vpop.permute.xlu0 %2496  ;;  %v2499_v54 = vpop.permute.xlu1 %2498  ;;  %vm7344_vm0 = vmmov %vm7339_vm2 }
 0x559   : > { %v2508_v10 = vsel %vm7337_vm7, %v6359_v39, %v2497_v29  ;;  %v2509_v45 = vsel %vm7338_vm5, %v2497_v29, %v2499_v54  ;;  %vm7348_vm7 = vmmov %vm7347_vm8 }
 0x55a   : > { %3452 = vrot.lane.b32.xlu0 %v6641_v8, %s7191_s15  ;;  %3454 = vrot.lane.b32.xlu1 %v6628_v59, %s7191_s15  ;;  %vm7349_vm5 = vmmov %vm7345_vm1 }
 0x55c   : > { %v2557_v42 = vpop.permute.xlu0 %2556  ;;  %v2559_v40 = vpop.permute.xlu1 %2558  ;;  %v3808_v57 = vld [vmem:[#allocation4 + $0xb8] sm:$0xff] }
 0x55d   : > { %v2568_v26 = vsel %vm7339_vm2, %v6368_v21, %v2557_v42  ;;  %v2569_v36 = vsel %vm7340_vm4, %v2557_v42, %v2559_v40  ;;  %v3816_v46 = vld [vmem:[#allocation4 + $0xf8] sm:$0xff]  ;;  %vm7350_vm2 = vmmov %vm7345_vm1 }
 0x55e   : > { %3396 = vrot.lane.b32.xlu0 %v6574_v12, %s7336_s8  ;;  %3398 = vrot.lane.b32.xlu1 %v6779_v27, %s7336_s8  ;;  %v4016_v39 = vpack.c.bf16 %v3816_v46, %v3808_v57  ;;  %v4022_v8 = vpack.c.bf16 %v2569_v36, %v2509_v45  ;;  %v4021_v30 = vpack.c.bf16 %v2568_v26, %v2508_v10  ;;  %vm7351_vm4 = vmmov %vm7348_vm7 }
 0x560   : > { %v2501_v48 = vpop.permute.xlu0 %2500  ;;  %4273 = vmatprep.subr.bf16.mxu1 %v4016_v39  ;;  %v2503_v20 = vpop.permute.xlu1 %2502  ;;  %4234 = vmatprep.subr.bf16.mxu0 %v4022_v8 }
 0x561   : > { %v2510_v1 = vsel %vm7341_vm10, %v2499_v54, %v2501_v48  ;;  %v2511_v21 = vsel %vm7342_vm12, %v2501_v48, %v2503_v20  ;;  %4274 = vmatpush1.bf16.msra.mxu1 %v4015_v44  ;;  %4235 = vmatpush1.bf16.msra.mxu0 %v4021_v30  ;;  %vm7352_vm10 = vmmov %vm7351_vm4  ;;  %vm7354_vm12 = vcmask 728064  }
 0x562   : > { %2527 = vst.msk [vmem:[#allocation4 + $0x138] sm:$0xff] %vm2154_vm3, %v2511_v21  ;;  %3456 = vrot.lane.b32.xlu0 %v6574_v12, %s7191_s15  ;;  %3458 = vrot.lane.b32.xlu1 %v6779_v27, %s7191_s15 }
 0x564   : > { %v2561_v32 = vpop.permute.xlu0 %2560  ;;  %v2563_v11 = vpop.permute.xlu1 %2562 }
 0x565   : > { %v2570_v55 = vsel %vm7343_vm15, %v2559_v40, %v2561_v32  ;;  %v2571_v4 = vsel %vm7344_vm0, %v2561_v32, %v2563_v11  ;;  %vm7355_vm15 = vmmov %vm7354_vm12  ;;  %vm7356_vm0 = vcmask 89088  }
 0x566   : > { %2587 = vst.msk [vmem:[#allocation4 + $0x178] sm:$0xff] %vm2154_vm3, %v2571_v4  ;;  %3512 = vrot.lane.b32.xlu0 %v6826_v52, %s7192_s17  ;;  %3514 = vrot.lane.b32.xlu1 %v6628_v59, %s7192_s17  ;;  %v4023_v40 = vpack.c.bf16 %v2570_v55, %v2510_v1 }
 0x568   : > { %v2617_v63 = vpop.permute.xlu0 %2616  ;;  %v2619_v14 = vpop.permute.xlu1 %2618 }
 0x569   : > { %v2628_v33 = vsel %vm7345_vm1, %v6391_v51, %v2617_v63  ;;  %v2629_v5 = vsel %vm7346_vm9, %v2617_v63, %v2619_v14  ;;  %v3824_v54 = vld [vmem:[#allocation4 + $0x138] sm:$0xff]  ;;  %vm7357_vm1 = vmmov %vm7356_vm0 }
 0x56a   : > { %3572 = vrot.lane.b32.xlu0 %v6826_v52, %s7193_s16  ;;  %3574 = vrot.lane.b32.xlu1 %v6837_v0, %s7193_s16  ;;  %vm7358_vm9 = vmmov %vm7354_vm12 }
 0x56c   : > { %v2677_v41 = vpop.permute.xlu0 %2676  ;;  %v2679_v31 = vpop.permute.xlu1 %2678 }
 0x56d   : > { %v2688_v59 = vsel %vm7347_vm8, %v6400_v49, %v2677_v41  ;;  %v2689_v29 = vsel %vm7348_vm7, %v2677_v41, %v2679_v31  ;;  %v3832_v10 = vld [vmem:[#allocation4 + $0x178] sm:$0xff]  ;;  %vm7359_vm8 = vmmov %vm7358_vm9 }
 0x56e   : > { %3516 = vrot.lane.b32.xlu0 %v6574_v12, %s7192_s17  ;;  %3518 = vrot.lane.b32.xlu1 %v6779_v27, %s7192_s17  ;;  %v4024_v51 = vpack.c.bf16 %v3832_v10, %v3824_v54  ;;  %v4030_v45 = vpack.c.bf16 %v2689_v29, %v2629_v5  ;;  %v4029_v42 = vpack.c.bf16 %v2688_v59, %v2628_v33  ;;  %vm7360_vm7 = vmmov %vm7356_vm0 }
 0x570   : > { %v2621_v57 = vpop.permute.xlu0 %2620  ;;  %4275 = vmatprep.subr.bf16.mxu1 %v4024_v51  ;;  %v2623_v26 = vpop.permute.xlu1 %2622  ;;  %4236 = vmatprep.subr.bf16.mxu0 %v4030_v45 }
 0x571   : > { %v2630_v49 = vsel %vm7349_vm5, %v2619_v14, %v2621_v57  ;;  %v2631_v36 = vsel %vm7350_vm2, %v2621_v57, %v2623_v26  ;;  %4276 = vmatpush1.bf16.msra.mxu1 %v4023_v40  ;;  %4237 = vmatpush1.bf16.msra.mxu0 %v4029_v42  ;;  %vm7361_vm5 = vmmov %vm7356_vm0  ;;  %vm7362_vm2 = vcmask 80896  }
 0x572   : > { %2647 = vst.msk [vmem:[#allocation4 + $0x1b8] sm:$0xff] %vm2154_vm3, %v2631_v36  ;;  %3576 = vrot.lane.b32.xlu0 %v6574_v12, %s7193_s16  ;;  %3578 = vrot.lane.b32.xlu1 %v6779_v27, %s7193_s16 }
 0x574   : > { %v2681_v46 = vpop.permute.xlu0 %2680  ;;  %v2683_v39 = vpop.permute.xlu1 %2682 }
 0x575   : > { %v2690_v8 = vsel %vm7351_vm4, %v2679_v31, %v2681_v46  ;;  %v2691_v30 = vsel %vm7352_vm10, %v2681_v46, %v2683_v39  ;;  %vm7363_vm4 = vmmov %vm7362_vm2  ;;  %vm7364_vm10 = vcmask 72704  }
 0x576   : > { %2707 = vst.msk [vmem:[#allocation4 + $0x1f8] sm:$0xff] %vm2154_vm3, %v2691_v30  ;;  %3632 = vrot.lane.b32.xlu0 %v6826_v52, %s7353_s9  ;;  %3634 = vrot.lane.b32.xlu1 %v6837_v0, %s7353_s9  ;;  %v4031_v33 = vpack.c.bf16 %v2690_v8, %v2630_v49 }
 0x578   : > { %v2737_v44 = vpop.permute.xlu0 %2736  ;;  %v2739_v48 = vpop.permute.xlu1 %2738 }
 0x579   : > { %v2748_v12 = vsel %vm7354_vm12, %v6427_v18, %v2737_v44  ;;  %v2749_v20 = vsel %vm7355_vm15, %v2737_v44, %v2739_v48  ;;  %v3840_v55 = vld [vmem:[#allocation4 + $0x1b8] sm:$0xff]  ;;  %vm7365_vm12 = vmmov %vm7364_vm10 }
 0x57a   : > { %3692 = vrot.lane.b32.xlu0 %v6826_v52, %s7281_s24  ;;  %3694 = vrot.lane.b32.xlu1 %v6837_v0, %s7281_s24  ;;  %vm7366_vm15 = vmmov %vm7362_vm2 }
 0x57c   : > { %v2797_v1 = vpop.permute.xlu0 %2796  ;;  %v2799_v21 = vpop.permute.xlu1 %2798 }
 0x57d   : > { %v2808_v32 = vsel %vm7356_vm0, %v6436_v15, %v2797_v1  ;;  %v2809_v11 = vsel %vm7357_vm1, %v2797_v1, %v2799_v21  ;;  %v3848_v4 = vld [vmem:[#allocation4 + $0x1f8] sm:$0xff]  ;;  %vm7367_vm0 = vmmov %vm7362_vm2 }
 0x57e   : > { %3636 = vrot.lane.b32.xlu0 %v6171_v24, %s7353_s9  ;;  %3638 = vrot.lane.b32.xlu1 %v6779_v27, %s7353_s9  ;;  %v4032_v18 = vpack.c.bf16 %v3848_v4, %v3840_v55  ;;  %v4038_v63 = vpack.c.bf16 %v2809_v11, %v2749_v20  ;;  %v4037_v14 = vpack.c.bf16 %v2808_v32, %v2748_v12  ;;  %vm7368_vm1 = vmmov %vm7364_vm10 }
 0x580   : > { %v2741_v5 = vpop.permute.xlu0 %2740  ;;  %4277 = vmatprep.subr.bf16.mxu1 %v4032_v18  ;;  %v2743_v41 = vpop.permute.xlu1 %2742  ;;  %4238 = vmatprep.subr.bf16.mxu0 %v4038_v63  ;;  %v5003_v63 = vld [vmem:[#allocation4 + $0x360] sm:$0xff] }
 0x581   : > { %v2750_v15 = vsel %vm7358_vm9, %v2739_v48, %v2741_v5  ;;  %v2751_v31 = vsel %vm7359_vm8, %v2741_v5, %v2743_v41  ;;  %4278 = vmatpush1.bf16.msra.mxu1 %v4031_v33  ;;  %4239 = vmatpush1.bf16.msra.mxu0 %v4037_v14  ;;  %vm7369_vm9 = vmmov %vm7368_vm1  ;;  %vm7370_vm8 = vcmask 7168  }
 0x582   : > { %2767 = vst.msk [vmem:[#allocation4 + $0x238] sm:$0xff] %vm2154_vm3, %v2751_v31  ;;  %3696 = vrot.lane.b32.xlu0 %v6171_v24, %s7281_s24  ;;  %3698 = vrot.lane.b32.xlu1 %v6779_v27, %s7281_s24 }
 0x584   : > { %v2801_v59 = vpop.permute.xlu0 %2800  ;;  %v2803_v29 = vpop.permute.xlu1 %2802 }
 0x585   : > { %v2810_v54 = vsel %vm7360_vm7, %v2799_v21, %v2801_v59  ;;  %v2811_v10 = vsel %vm7361_vm5, %v2801_v59, %v2803_v29  ;;  %vm7371_vm7 = vmmov %vm7370_vm8 }
 0x586   : > { %2827 = vst.msk [vmem:[#allocation4 + $0x278] sm:$0xff] %vm2154_vm3, %v2811_v10  ;;  %3752 = vrot.lane.b32.xlu0 %v6826_v52, %s7288_s25  ;;  %3754 = vrot.lane.b32.xlu1 %v6837_v0, %s7288_s25  ;;  %v4039_v44 = vpack.c.bf16 %v2810_v54, %v2750_v15  ;;  %vm7372_vm5 = vmmov %vm7371_vm7 }
 0x588   : > { %v2857_v51 = vpop.permute.xlu0 %2856  ;;  %v2859_v45 = vpop.permute.xlu1 %2858 }
 0x589   : > { %v2868_v42 = vsel %vm7362_vm2, %v6461_v25, %v2857_v51  ;;  %v2869_v40 = vsel %vm7363_vm4, %v2857_v51, %v2859_v45  ;;  %v3856_v46 = vld [vmem:[#allocation4 + $0x238] sm:$0xff]  ;;  %vm7373_vm2 = vmmov %vm7372_vm5  ;;  %vm7374_vm4 = vcmask 1039360  }
 0x58a   : > { %3756 = vrot.lane.b32.xlu0 %v6171_v24, %s7288_s25  ;;  %3758 = vrot.lane.b32.xlu1 %v6779_v27, %s7288_s25 }
 0x58c   : > { %v2917_v57 = vpop.permute.xlu0 %2916  ;;  %v2919_v26 = vpop.permute.xlu1 %2918 }
 0x58d   : > { %v2928_v49 = vsel %vm7364_vm10, %v6470_v61, %v2917_v57  ;;  %v2929_v36 = vsel %vm7365_vm12, %v2917_v57, %v2919_v26  ;;  %v3864_v39 = vld [vmem:[#allocation4 + $0x278] sm:$0xff]  ;;  %vm7375_vm10 = vmmov %vm7374_vm4  ;;  %vm7376_vm12 = vcmask 973824  }
 0x58e   : > { %v4040_v8 = vpack.c.bf16 %v3864_v39, %v3856_v46  ;;  %v4046_v30 = vpack.c.bf16 %v2929_v36, %v2869_v40  ;;  %v4045_v25 = vpack.c.bf16 %v2928_v49, %v2868_v42  ;;  %v3896_v49 = vld [vmem:[#allocation4 + $0x378] sm:$0xff] }
 0x590   : > { %v2861_v48 = vpop.permute.xlu0 %2860  ;;  %4279 = vmatprep.subr.bf16.mxu1 %v4040_v8  ;;  %v2863_v12 = vpop.permute.xlu1 %2862  ;;  %4240 = vmatprep.subr.bf16.mxu0 %v4046_v30 }
 0x591   : > { %v2870_v24 = vsel %vm7366_vm15, %v2859_v45, %v2861_v48  ;;  %v2871_v27 = vsel %vm7367_vm0, %v2861_v48, %v2863_v12  ;;  %4280 = vmatpush1.bf16.msra.mxu1 %v4039_v44  ;;  %4241 = vmatpush1.bf16.msra.mxu0 %v4045_v25  ;;  %vm7377_vm15 = vmmov %vm7376_vm12 }
 0x592   : > { %2887 = vst.msk [vmem:[#allocation4 + $0x2b8] sm:$0xff] %vm2154_vm3, %v2871_v27  ;;  %vm7378_vm0 = vmmov %vm7374_vm4 }
 0x594   : > { %v2921_v61 = vpop.permute.xlu0 %2920  ;;  %v2923_v20 = vpop.permute.xlu1 %2922 }
 0x595   : > { %v2930_v1 = vsel %vm7368_vm1, %v2919_v26, %v2921_v61  ;;  %v2931_v21 = vsel %vm7369_vm9, %v2921_v61, %v2923_v20  ;;  %vm7379_vm1 = vmmov %vm7376_vm12  ;;  %vm7380_vm9 = vcmask 965632  }
 0x596   : > { %2947 = vst.msk [vmem:[#allocation4 + $0x2f8] sm:$0xff] %vm2154_vm3, %v2931_v21 }
 0x598   : > { %v2977_v32 = vpop.permute.xlu0 %2976  ;;  %v2979_v11 = vpop.permute.xlu1 %2978 }
 0x599   : > { %v2988_v55 = vsel %vm7370_vm8, %v6486_v43, %v2977_v32  ;;  %v2989_v4 = vsel %vm7371_vm7, %v2977_v32, %v2979_v11  ;;  %v3872_v31 = vld [vmem:[#allocation4 + $0x2b8] sm:$0xff]  ;;  %v4047_v43 = vpack.c.bf16 %v2930_v1, %v2870_v24  ;;  %vm7381_vm8 = vmmov %vm7380_vm9  ;;  %vm7382_vm7 = vcmask 957440  }
 0x59a   : > { %v4054_v18 = vpack.c.bf16 %v6826_v52, %v2989_v4  ;;  %v4053_v14 = vpack.c.bf16 %v5003_v63, %v2988_v55 }
 0x59c   : > { %v2981_v33 = vpop.permute.xlu0 %2980  ;;  %v2983_v5 = vpop.permute.xlu1 %2982  ;;  %4242 = vmatprep.subr.bf16.mxu0 %v4054_v18 }
 0x59d   : > { %v2990_v41 = vsel %vm7372_vm5, %v2979_v11, %v2981_v33  ;;  %v2991_v15 = vsel %vm7373_vm2, %v2981_v33, %v2983_v5  ;;  %v3880_v59 = vld [vmem:[#allocation4 + $0x2f8] sm:$0xff]  ;;  %4243 = vmatpush1.bf16.msra.mxu0 %v4053_v14  ;;  %vm7383_vm5 = vmmov %vm7382_vm7 }
 0x59e   : > { %3007 = vst.msk [vmem:[#allocation4 + $0x338] sm:$0xff] %vm2154_vm3, %v2991_v15  ;;  %v4048_v29 = vpack.c.bf16 %v3880_v59, %v3872_v31  ;;  %v4055_v8 = vpack.c.bf16 %v6837_v0, %v2990_v41  ;;  %vm7384_vm2 = vmmov %vm7381_vm8 }
 0x5a0   : > { %v3051_v54 = vpop.permute.xlu0 %3050  ;;  %4281 = vmatprep.subr.bf16.mxu1 %v4048_v29  ;;  %v3053_v10 = vpop.permute.xlu1 %3052 }
 0x5a1   : > { %v3060_v52 = vsel %vm7374_vm4, %v6513_v22, %v3051_v54  ;;  %v3061_v51 = vsel %vm7375_vm10, %v3051_v54, %v3053_v10  ;;  %4282 = vmatpush1.bf16.msra.mxu1 %v4047_v43  ;;  %vm7385_vm4 = vmmov %vm7383_vm5  ;;  %vm7386_vm10 = vcmask 318464  }
 0x5a4   : > { %v3106_v45 = vpop.permute.xlu0 %3105  ;;  %v3108_v42 = vpop.permute.xlu1 %3107 }
 0x5a5   : > { %v3115_v40 = vsel %vm7376_vm12, %v6527_v47, %v3106_v45  ;;  %v3116_v57 = vsel %vm7377_vm15, %v3106_v45, %v3108_v42  ;;  %v3888_v26 = vld [vmem:[#allocation4 + $0x338] sm:$0xff]  ;;  %vm7387_vm12 = vmmov %vm7386_vm10  ;;  %vm7388_vm15 = vcmask 310272  }
 0x5a6   : > { %v4056_v36 = vpack.c.bf16 %v3896_v49, %v3888_v26  ;;  %v4062_v46 = vpack.c.bf16 %v3116_v57, %v3061_v51  ;;  %v4061_v39 = vpack.c.bf16 %v3115_v40, %v3060_v52 }
 0x5a8   : > { %v3055_v30 = vpop.permute.xlu0 %3054  ;;  %4283 = vmatprep.subr.bf16.mxu1 %v4056_v36  ;;  %v3110_v22 = vpop.permute.xlu1 %3109  ;;  %4244 = vmatprep.subr.bf16.mxu0 %v4062_v46 }
 0x5a9   : > { %v3062_v25 = vsel %vm7378_vm0, %v3053_v10, %v3055_v30  ;;  %3078 = vst.msk [vmem:[#allocation4 + $0x3b8] sm:$0xff] %vm2154_vm3, %v3055_v30  ;;  %v3117_v44 = vsel %vm7379_vm1, %v3108_v42, %v3110_v22  ;;  %3133 = vst.msk [vmem:[#allocation4 + $0x3f8] sm:$0xff] %vm2154_vm3, %v3110_v22  ;;  %4284 = vmatpush1.bf16.msra.mxu1 %v4055_v8  ;;  %4245 = vmatpush1.bf16.msra.mxu0 %v4061_v39 }
 0x5aa   : > { %v4063_v11 = vpack.c.bf16 %v3117_v44, %v3062_v25  ;;  %vm7389_vm0 = vmmov %vm7388_vm15 }
 0x5ab   : > { %vm7390_vm1 = vmmov %vm7386_vm10 }
 0x5ac   : > { %v3161_v47 = vpop.permute.xlu0 %3160  ;;  %v3163_v48 = vpop.permute.xlu1 %3162 }
 0x5ad   : > { %v3170_v12 = vsel %vm7380_vm9, %v6560_v50, %v3161_v47  ;;  %v3171_v0 = vsel %vm7381_vm8, %v3161_v47, %v3163_v48  ;;  %vm7391_vm9 = vmmov %vm7390_vm1 }
 0x5ae   : > { %vm7392_vm8 = vmmov %vm7389_vm0 }
 0x5b0   : > { %v3216_v24 = vpop.permute.xlu0 %3215  ;;  %v3218_v27 = vpop.permute.xlu1 %3217  ;;  %v3904_v61 = vld [vmem:[#allocation4 + $0x3b8] sm:$0xff] }
 0x5b1   : > { %v3912_v20 = vld [vmem:[#allocation4 + $0x3f8] sm:$0xff]  ;;  %v3225_v1 = vsel %vm7382_vm7, %v6569_v19, %v3216_v24  ;;  %v3226_v21 = vsel %vm7383_vm5, %v3216_v24, %v3218_v27  ;;  %vm7393_vm7 = vmmov %vm7389_vm0  ;;  %vm7394_vm5 = vcmask 302080  }
 0x5b2   : > { %v4064_v32 = vpack.c.bf16 %v3912_v20, %v3904_v61  ;;  %v4070_v55 = vpack.c.bf16 %v3226_v21, %v3171_v0  ;;  %v4069_v4 = vpack.c.bf16 %v3225_v1, %v3170_v12 }
 0x5b4   : > { %4285 = vmatprep.subr.bf16.mxu1 %v4064_v32  ;;  %v3165_v18 = vpop.permute.xlu0 %3164  ;;  %v3220_v63 = vpop.permute.xlu1 %3219  ;;  %4246 = vmatprep.subr.bf16.mxu0 %v4070_v55 }
 0x5b5   : > { %4286 = vmatpush1.bf16.msra.mxu1 %v4063_v11  ;;  %v3172_v50 = vsel %vm7384_vm2, %v3163_v48, %v3165_v18  ;;  %3188 = vst.msk [vmem:[#allocation4 + $0x438] sm:$0xff] %vm2154_vm3, %v3165_v18  ;;  %v3227_v14 = vsel %vm7385_vm4, %v3218_v27, %v3220_v63  ;;  %3243 = vst.msk [vmem:[#allocation4 + $0x478] sm:$0xff] %vm2154_vm3, %v3220_v63  ;;  %4247 = vmatpush1.bf16.msra.mxu0 %v4069_v4  ;;  %vm7396_vm4 = vcmask 236544  }
 0x5b6   : > { %v4071_v52 = vpack.c.bf16 %v3227_v14, %v3172_v50  ;;  %vm7395_vm2 = vmmov %vm7394_vm5 }
 0x5b8   : > { %v3273_v19 = vpop.permute.xlu0 %3272  ;;  %v3275_v33 = vpop.permute.xlu1 %3274 }
 0x5b9   : > { %v3284_v5 = vsel %vm7386_vm10, %v6598_v53, %v3273_v19  ;;  %v3285_v41 = vsel %vm7387_vm12, %v3273_v19, %v3275_v33  ;;  %vm7397_vm10 = vmmov %vm7396_vm4 }
 0x5ba   : > { %vm7398_vm12 = vmmov %vm7395_vm2 }
 0x5bc   : > { %v3333_v15 = vpop.permute.xlu0 %3332  ;;  %v3335_v31 = vpop.permute.xlu1 %3334  ;;  %v3920_v59 = vld [vmem:[#allocation4 + $0x438] sm:$0xff] }
 0x5bd   : > { %v3928_v29 = vld [vmem:[#allocation4 + $0x478] sm:$0xff]  ;;  %v3344_v43 = vsel %vm7388_vm15, %v6607_v38, %v3333_v15  ;;  %v3345_v54 = vsel %vm7389_vm0, %v3333_v15, %v3335_v31  ;;  %vm7399_vm15 = vmmov %vm7395_vm2 }
 0x5be   : > { %v4072_v10 = vpack.c.bf16 %v3928_v29, %v3920_v59  ;;  %v4078_v51 = vpack.c.bf16 %v3345_v54, %v3285_v41  ;;  %v4077_v45 = vpack.c.bf16 %v3344_v43, %v3284_v5  ;;  %vm7400_vm0 = vmmov %vm7396_vm4 }
 0x5c0   : > { %4287 = vmatprep.subr.bf16.mxu1 %v4072_v10  ;;  %v3277_v42 = vpop.permute.xlu0 %3276  ;;  %v3279_v40 = vpop.permute.xlu1 %3278  ;;  %4248 = vmatprep.subr.bf16.mxu0 %v4078_v51 }
 0x5c1   : > { %4288 = vmatpush1.bf16.msra.mxu1 %v4071_v52  ;;  %v3286_v53 = vsel %vm7390_vm1, %v3275_v33, %v3277_v42  ;;  %v3287_v57 = vsel %vm7391_vm9, %v3277_v42, %v3279_v40  ;;  %4249 = vmatpush1.bf16.msra.mxu0 %v4077_v45  ;;  %vm7401_vm1 = vmmov %vm7400_vm0  ;;  %vm7402_vm9 = vcmask 228352  }
 0x5c2   : > { %3303 = vst.msk [vmem:[#allocation4 + $0x4b8] sm:$0xff] %vm2154_vm3, %v3287_v57 }
 0x5c4   : > { %v3337_v26 = vpop.permute.xlu0 %3336  ;;  %v3339_v38 = vpop.permute.xlu1 %3338 }
 0x5c5   : > { %v3346_v49 = vsel %vm7392_vm8, %v3335_v31, %v3337_v26  ;;  %v3347_v36 = vsel %vm7393_vm7, %v3337_v26, %v3339_v38  ;;  %vm7403_vm8 = vmmov %vm7402_vm9  ;;  %vm7404_vm7 = vcmask 220160  }
 0x5c6   : > { %3363 = vst.msk [vmem:[#allocation4 + $0x4f8] sm:$0xff] %vm2154_vm3, %v3347_v36  ;;  %v4079_v61 = vpack.c.bf16 %v3346_v49, %v3286_v53 }
 0x5c8   : > { %v3393_v46 = vpop.permute.xlu0 %3392  ;;  %v3395_v39 = vpop.permute.xlu1 %3394 }
 0x5c9   : > { %v3404_v8 = vsel %vm7394_vm5, %v6634_v56, %v3393_v46  ;;  %v3405_v30 = vsel %vm7395_vm2, %v3393_v46, %v3395_v39  ;;  %v3936_v48 = vld [vmem:[#allocation4 + $0x4b8] sm:$0xff]  ;;  %vm7405_vm5 = vmmov %vm7404_vm7 }
 0x5ca   : > { %vm7406_vm2 = vmmov %vm7403_vm8 }
 0x5cc   : > { %v3453_v22 = vpop.permute.xlu0 %3452  ;;  %v3455_v25 = vpop.permute.xlu1 %3454 }
 0x5cd   : > { %v3464_v44 = vsel %vm7396_vm4, %v6645_v9, %v3453_v22  ;;  %v3465_v47 = vsel %vm7397_vm10, %v3453_v22, %v3455_v25  ;;  %v3944_v12 = vld [vmem:[#allocation4 + $0x4f8] sm:$0xff]  ;;  %vm7407_vm4 = vmmov %vm7406_vm2 }
 0x5ce   : > { %v4080_v0 = vpack.c.bf16 %v3944_v12, %v3936_v48  ;;  %v4086_v24 = vpack.c.bf16 %v3465_v47, %v3405_v30  ;;  %v4085_v27 = vpack.c.bf16 %v3464_v44, %v3404_v8  ;;  %vm7408_vm10 = vmmov %vm7405_vm5 }
 0x5d0   : > { %v3397_v20 = vpop.permute.xlu0 %3396  ;;  %4289 = vmatprep.subr.bf16.mxu1 %v4080_v0  ;;  %v3399_v1 = vpop.permute.xlu1 %3398  ;;  %4250 = vmatprep.subr.bf16.mxu0 %v4086_v24 }
 0x5d1   : > { %v3406_v56 = vsel %vm7398_vm12, %v3395_v39, %v3397_v20  ;;  %v3407_v21 = vsel %vm7399_vm15, %v3397_v20, %v3399_v1  ;;  %4290 = vmatpush1.bf16.msra.mxu1 %v4079_v61  ;;  %4251 = vmatpush1.bf16.msra.mxu0 %v4085_v27  ;;  %vm7409_vm12 = vmmov %vm7405_vm5  ;;  %v4312_v61 = vld [vmem:[%s5090_s26 + $0x4] sm:$0xff] }
 0x5d2   : > { %3423 = vst.msk [vmem:[#allocation4 + $0x538] sm:$0xff] %vm2154_vm3, %v3407_v21 }
 0x5d4   : > { %v3457_v9 = vpop.permute.xlu0 %3456  ;;  %v3459_v32 = vpop.permute.xlu1 %3458 }
 0x5d5   : > { %v3466_v11 = vsel %vm7400_vm0, %v3455_v25, %v3457_v9  ;;  %v3467_v55 = vsel %vm7401_vm1, %v3457_v9, %v3459_v32 }
 0x5d6   : > { %3483 = vst.msk [vmem:[#allocation4 + $0x578] sm:$0xff] %vm2154_vm3, %v3467_v55  ;;  %v4087_v43 = vpack.c.bf16 %v3466_v11, %v3406_v56  ;;  %v4321_v11 = vcombine.high %v4312_v61, %v4312_v61  ;;  %v4314_v55 = vld [vmem:[%s5090_s26 + $0x14] sm:$0xff] }
 0x5d8   : > { %v3513_v4 = vpop.permute.xlu0 %3512  ;;  %v3515_v18 = vpop.permute.xlu1 %3514 }
 0x5d9   : > { %v3524_v63 = vsel %vm7402_vm9, %v6670_v2, %v3513_v4  ;;  %v3525_v50 = vsel %vm7403_vm8, %v3513_v4, %v3515_v18  ;;  %v3952_v41 = vld [vmem:[#allocation4 + $0x538] sm:$0xff] }
 0x5dc   : > { %v3573_v14 = vpop.permute.xlu0 %3572  ;;  %v3575_v19 = vpop.permute.xlu1 %3574 }
 0x5dd   : > { %v3584_v33 = vsel %vm7404_vm7, %v6679_v28, %v3573_v14  ;;  %v3585_v5 = vsel %vm7405_vm5, %v3573_v14, %v3575_v19  ;;  %v3960_v15 = vld [vmem:[#allocation4 + $0x578] sm:$0xff] }
 0x5de   : > { %v4088_v31 = vpack.c.bf16 %v3960_v15, %v3952_v41  ;;  %v4094_v59 = vpack.c.bf16 %v3585_v5, %v3525_v50  ;;  %v4093_v29 = vpack.c.bf16 %v3584_v33, %v3524_v63  ;;  %v4323_v5 = vcombine.high %v4314_v55, %v4314_v55  ;;  %v5004_v15 = vld [vmem:[#allocation3] sm:$0xff] }
 0x5e0   : > { %v3517_v54 = vpop.permute.xlu0 %3516  ;;  %4291 = vmatprep.subr.bf16.mxu1 %v4088_v31  ;;  %v3519_v10 = vpop.permute.xlu1 %3518  ;;  %4252 = vmatprep.subr.bf16.mxu0 %v4094_v59  ;;  %v4313_v31 = vld [vmem:[%s5090_s26 + $0xc] sm:$0xff] }
 0x5e1   : > { %v3526_v2 = vsel %vm7406_vm2, %v3515_v18, %v3517_v54  ;;  %v3527_v52 = vsel %vm7407_vm4, %v3517_v54, %v3519_v10  ;;  %4292 = vmatpush1.bf16.msra.mxu1 %v4087_v43  ;;  %4253 = vmatpush1.bf16.msra.mxu0 %v4093_v29  ;;  %v4316_v43 = vld [vmem:[%s7129_s5] sm:$0xff]  ;;  %v4322_v10 = vcombine.high %v4313_v31, %v4313_v31 }
 0x5e2   : > { %3543 = vst.msk [vmem:[#allocation4 + $0x5b8] sm:$0xff] %vm2154_vm3, %v3527_v52 }
 0x5e4   : > { %v3577_v28 = vpop.permute.xlu0 %3576  ;;  %v3579_v51 = vpop.permute.xlu1 %3578 }
 0x5e5   : > { %v3586_v45 = vsel %vm7408_vm10, %v3575_v19, %v3577_v28  ;;  %v3587_v42 = vsel %vm7409_vm12, %v3577_v28, %v3579_v51  ;;  %v254_v51 = vld [vmem:[%s7125_s1] sm:$0xff] }
 0x5e6   : > { %3603 = vst.msk [vmem:[#allocation4 + $0x5f8] sm:$0xff] %vm2154_vm3, %v3587_v42  ;;  %v4095_v44 = vpack.c.bf16 %v3586_v45, %v3526_v2  ;;  %v4315_v2 = vld [vmem:[%s5090_s26 + $0x1c] sm:$0xff]  ;;  %v4633_v45 = vrot.slane %v254_v51, %v2102_v23  ;;  %v4637_v42 = vrot.slane %v254_v51, %v2106_v34  ;;  %v7031_v34 = vrot.slane %v254_v51, %v2114_v13 }
 0x5e7   : > { %v4324_v28 = vcombine.high %v4315_v2, %v4315_v2 }
 0x5e8   : > { %v3633_v40 = vpop.permute.xlu0 %3632  ;;  %v3635_v53 = vpop.permute.xlu1 %3634 }
 0x5e9   : > { %v3644_v57 = vsel %vm1597_vm14, %v6704_v58, %v3633_v40  ;;  %v3645_v26 = vsel %vm1597_vm14, %v3633_v40, %v3635_v53  ;;  %v3968_v39 = vld [vmem:[#allocation4 + $0x5b8] sm:$0xff] }
 0x5ec   : > { %v3693_v38 = vpop.permute.xlu0 %3692  ;;  %v3695_v49 = vpop.permute.xlu1 %3694 }
 0x5ed   : > { %v3704_v36 = vsel %vm1655_vm13, %v6713_v37, %v3693_v38  ;;  %v3705_v46 = vsel %vm1655_vm13, %v3693_v38, %v3695_v49  ;;  %v3976_v8 = vld [vmem:[#allocation4 + $0x5f8] sm:$0xff] }
 0x5ee   : > { %v4096_v30 = vpack.c.bf16 %v3976_v8, %v3968_v39  ;;  %v4102_v22 = vpack.c.bf16 %v3705_v46, %v3645_v26  ;;  %v4101_v25 = vpack.c.bf16 %v3704_v36, %v3644_v57  ;;  %v7025_v57 = vrot.slane %v254_v51, %v2110_v62 }
 0x5f0   : > { %v3637_v47 = vpop.permute.xlu0 %3636  ;;  %4293 = vmatprep.subr.bf16.mxu1 %v4096_v30  ;;  %v3639_v48 = vpop.permute.xlu1 %3638  ;;  %4254 = vmatprep.subr.bf16.mxu0 %v4102_v22 }
 0x5f1   : > { %v3646_v58 = vsel %vm1597_vm14, %v3635_v53, %v3637_v47  ;;  %v3647_v12 = vsel %vm1597_vm14, %v3637_v47, %v3639_v48  ;;  %4294 = vmatpush1.bf16.msra.mxu1 %v4095_v44  ;;  %4255 = vmatpush1.bf16.msra.mxu0 %v4101_v25 }
 0x5f2   : > { %3663 = vst.msk [vmem:[#allocation4 + $0x638] sm:$0xff] %vm2154_vm3, %v3647_v12 }
 0x5f4   : > { %v3697_v37 = vpop.permute.xlu0 %3696  ;;  %v3699_v0 = vpop.permute.xlu1 %3698 }
 0x5f5   : > { %v3706_v24 = vsel %vm1655_vm13, %v3695_v49, %v3697_v37  ;;  %v3707_v27 = vsel %vm1655_vm13, %v3697_v37, %v3699_v0  ;;  %v4649_v0 = vrot.slane %v254_v51, %v2118_v6 }
 0x5f6   : > { %3723 = vst.msk [vmem:[#allocation4 + $0x678] sm:$0xff] %vm2154_vm3, %v3707_v27  ;;  %v4103_v41 = vpack.c.bf16 %v3706_v24, %v3646_v58  ;;  %v4653_v24 = vrot.slane %v254_v51, %v2122_v60  ;;  %v4657_v60 = vrot.slane %v254_v51, %v2126_v7 }
 0x5f8   : > { %v3753_v20 = vpop.permute.xlu0 %3752  ;;  %v3755_v1 = vpop.permute.xlu1 %3754 }
 0x5f9   : > { %v3764_v56 = vsel %vm1712_vm11, %v6733_v3, %v3753_v20  ;;  %v3765_v21 = vsel %vm1712_vm11, %v3753_v20, %v3755_v1  ;;  %v3984_v19 = vld [vmem:[#allocation4 + $0x638] sm:$0xff] }
 0x5fa   : > { %v4110_v9 = vpack.c.bf16 %v3765_v21, %v3765_v21  ;;  %v4109_v32 = vpack.c.bf16 %v3764_v56, %v3764_v56 }
 0x5fc   : > { %v3757_v4 = vpop.permute.xlu0 %3756  ;;  %v3759_v18 = vpop.permute.xlu1 %3758  ;;  %4903 = vmatprep.subr.msk.bf16.mxu0 %vm4123_vm6, %v4110_v9  ;;  %v4137_v63 = vsel %vm4123_vm6, %v4109_v32, 0 }
 0x5fd   : > { %v3766_v50 = vsel %vm1712_vm11, %v3755_v1, %v3757_v4  ;;  %v3767_v14 = vsel %vm1712_vm11, %v3757_v4, %v3759_v18  ;;  %v3992_v33 = vld [vmem:[#allocation4 + $0x678] sm:$0xff]  ;;  %4257 = vmatpush1.bf16.msra.mxu0 %v4137_v63  ;;  %vm4325_vm11 = vcmask 31744  }
 0x5fe   : > { %3783 = vst.msk [vmem:[#allocation4 + $0x6b8] sm:$0xff] %vm2154_vm3, %v3767_v14  ;;  %v4104_v3 = vpack.c.bf16 %v3992_v33, %v3984_v19  ;;  %4907 = vmatprep.subr.msk.mxu0 %vm4123_vm6, %v4321_v11  ;;  %v4111_v59 = vpack.c.bf16 %v3766_v50, %v3766_v50  ;;  %v4661_v14 = vrot.slane %v254_v51, %v2130_v35 }
 0x600   : > { %4295 = vmatprep.subr.bf16.mxu1 %v4104_v3  ;;  %4263 = vmatmul.mubr.bf16.vlgmr.msra.gmra.mrb[12].mxu0 %v6739_v17  ;;  %v4143_v52 = vsel %vm4123_vm6, %v4111_v59, 0 }
 0x601   : > { %4296 = vmatpush1.bf16.msra.mxu1 %v4103_v41  ;;  %4908 = vmatpush1.msk.msra.mxu0 %vm4123_vm6, %v4312_v61 }
 0x602   : > { %4409 = vmatprep.mubr.f32.mxu0 %v5004_v15  ;;  %4913 = vmatprep.subr.msk.mxu0 %vm4123_vm6, %v4323_v5 }
 0x605   : > { %v4000_v29 = vld [vmem:[#allocation4 + $0x6b8] sm:$0xff] }
 0x606   : > { %v4112_v54 = vpack.c.bf16 %v4000_v29, %v4000_v29 }
 0x608   : > { %4905 = vmatprep.subr.msk.bf16.mxu1 %vm4123_vm6, %v4112_v54  ;;  %4909 = vmatmul.mubr.msk.f32.vlgmr.msra.gmra.mrb[16].mxu0 %vm4325_vm11, %v4316_v43 }
 0x609   : > { %4298 = vmatpush1.bf16.msra.mxu1 %v4143_v52  ;;  %4914 = vmatpush1.msk.msra.mxu0 %vm4123_vm6, %v4314_v55 }
 0x60a   : > { %4910 = vmatprep.subr.msk.mxu1 %vm4123_vm6, %v4322_v10  ;;  %4551 = vmatprep.mubr.f32.mxu0 %v5004_v15 }
 0x60c   : > { %4304 = vmatmul.mubr.bf16.vlgmr.msra.gmra.mrb[12].mxu1 %v6739_v17  ;;  %4915 = vmatmul.mubr.msk.f32.vlgmr.msra.gmra.mrb[18].mxu0 %vm4325_vm11, %v4316_v43 }
 0x60d   : > { %4911 = vmatpush1.msk.msra.mxu1 %vm4123_vm6, %v4313_v31  ;;  %4480 = vmatprep.mubr.f32.mxu1 %v5004_v15 }
 0x60e   : > { %4916 = vmatprep.subr.msk.mxu1 %vm4123_vm6, %v4324_v28 }
 0x613   : > { %v7017_v40 = vpop.f32.mrb[8].mxu0 }
 0x614   : > { %4912 = vmatmul.mubr.msk.f32.vlgmr.msra.gmra.mrb[16].mxu1 %vm4325_vm11, %v4316_v43  ;;  %v4670_v17 = vmul.f32 %v4633_v45, %v7017_v40  ;;  %v7021_v53 = vpop.f32.mrb[9].mxu0 }
 0x615   : > { %4917 = vmatpush1.msk.msra.mxu1 %vm4123_vm6, %v4315_v2  ;;  %4622 = vmatprep.mubr.f32.mxu1 %v5004_v15  ;;  %v4671_v23 = vmul.f32 %v4637_v42, %v7021_v53  ;;  %v4186_v26 = vpop.f32.mrb[10].mxu0 }
 0x616   : > { %v4688_v38 = vmul.f32 %v4670_v17, %v4670_v17  ;;  %v4187_v49 = vpop.f32.mrb[11].mxu0 }
 0x617   : > { %v4678_v36 = vadd.f32 %v4671_v23, %v4670_v17  ;;  %v4689_v46 = vmul.f32 %v4671_v23, %v4671_v23  ;;  %v7033_v39 = vpop.f32.mrb[8].mxu1 }
 0x618   : > { %4918 = vmatmul.mubr.msk.f32.vlgmr.msra.gmra.mrb[18].mxu1 %vm4325_vm11, %v4316_v43  ;;  %v4672_v62 = vmul.f32 %v7025_v57, %v7033_v39  ;;  %v7038_v8 = vpop.f32.mrb[9].mxu1 }
 0x619   : > { %v4696_v30 = vadd.f32 %v4689_v46, %v4688_v38  ;;  %v4673_v22 = vmul.f32 %v7031_v34, %v7038_v8  ;;  %v4227_v25 = vpop.f32.mrb[10].mxu1 }
 0x61a   : > { %v4679_v13 = vadd.f32 %v4678_v36, %v4672_v62  ;;  %v4690_v44 = vmul.f32 %v4672_v62, %v4672_v62  ;;  %v4228_v47 = vpop.f32.mrb[11].mxu1 }
 0x61b   : > { %v4691_v48 = vmul.f32 %v4673_v22, %v4673_v22 }
 0x61c   : > { %v4697_v58 = vadd.f32 %v4696_v30, %v4690_v44  ;;  %v4680_v12 = vadd.f32 %v4679_v13, %v4673_v22 }
 0x61e   : > { %v4698_v37 = vadd.f32 %v4697_v58, %v4691_v48 }
 0x6d3   : > { %v7046_v27 = vpop.f32.mrb[12].mxu0 }
 0x6d4   : > { %v4674_v61 = vmul.f32 %v4649_v0, %v7046_v27  ;;  %v7049_v20 = vpop.f32.mrb[13].mxu0 }
 0x6d5   : > { %v4675_v1 = vmul.f32 %v4653_v24, %v7049_v20  ;;  %v4268_v56 = vpop.f32.mrb[14].mxu0 }
 0x6d6   : > { %v4681_v21 = vadd.f32 %v4680_v12, %v4674_v61  ;;  %v4692_v9 = vmul.f32 %v4674_v61, %v4674_v61  ;;  %v4269_v32 = vpop.f32.mrb[15].mxu0 }
 0x6d7   : > { %v4693_v11 = vmul.f32 %v4675_v1, %v4675_v1 }
 0x6d8   : > { %v4699_v55 = vadd.f32 %v4698_v37, %v4692_v9  ;;  %v4682_v4 = vadd.f32 %v4681_v21, %v4675_v1 }
 0x6da   : > { %v4700_v18 = vadd.f32 %v4699_v55, %v4693_v11 }
 0x6db   : > { %v7052_v6 = vpop.f32.mrb[16].mxu0 }
 0x6dc   : > { %v4728_v63 = vmul.f32 %v4633_v45, %v7052_v6  ;;  %v7057_v50 = vpop.f32.mrb[17].mxu0 }
 0x6dd   : > { %v4729_v19 = vmul.f32 %v4637_v42, %v7057_v50 }
 0x6de   : > { %v4746_v33 = vmul.f32 %v4728_v63, %v4728_v63 }
 0x6df   : > { %v7062_v3 = vpop.f32.mrb[12].mxu1  ;;  %v4736_v5 = vadd.f32 %v4729_v19, %v4728_v63  ;;  %v4747_v41 = vmul.f32 %v4729_v19, %v4729_v19  ;;  %v7064_v15 = vpop.f32.mrb[18].mxu0 }
 0x6e0   : > { %v4676_v31 = vmul.f32 %v4657_v60, %v7062_v3  ;;  %v7067_v59 = vpop.f32.mrb[13].mxu1  ;;  %v7069_v7 = vpop.f32.mrb[19].mxu0  ;;  %v4732_v38 = vmul.f32 %v4649_v0, %v7064_v15 }
 0x6e1   : > { %v4677_v29 = vmul.f32 %v4661_v14, %v7067_v59  ;;  %v4309_v43 = vpop.f32.mrb[14].mxu1  ;;  %v4754_v16 = vadd.f32 %v4747_v41, %v4746_v33  ;;  %v4733_v30 = vmul.f32 %v4653_v24, %v7069_v7 }
 0x6e2   : > { %v4683_v35 = vadd.f32 %v4682_v4, %v4676_v31  ;;  %v4694_v54 = vmul.f32 %v4676_v31, %v4676_v31  ;;  %v4310_v10 = vpop.f32.mrb[15].mxu1  ;;  %v4750_v44 = vmul.f32 %v4732_v38, %v4732_v38 }
 0x6e3   : > { %v4684_v2 = vsel %vm2154_vm3, %v4677_v29, 0.0  ;;  %v4695_v52 = vmul.f32 %v4677_v29, %v4677_v29  ;;  %v4751_v61 = vmul.f32 %v4733_v30, %v4733_v30 }
 0x6e4   : > { %v4701_v28 = vadd.f32 %v4700_v18, %v4694_v54  ;;  %v4685_v51 = vadd.f32 %v4684_v2, %v4683_v35 }
 0x6e5   : > { %v4702_v45 = vsel %vm2154_vm3, %v4695_v52, 0.0 }
 0x6e6   : > { %4686 = vadd.xlane.f32.xlu0 %v4685_v51  ;;  %v4703_v42 = vadd.f32 %v4702_v45, %v4701_v28 }
 0x6e7   : > { %v7074_v17 = vpop.f32.mrb[16].mxu1 }
 0x6e8   : > { %v4730_v23 = vmul.f32 %v7025_v57, %v7074_v17  ;;  %v7078_v26 = vpop.f32.mrb[17].mxu1 }
 0x6e9   : > { %v4731_v49 = vmul.f32 %v7031_v34, %v7078_v26 }
 0x6ea   : > { %v4737_v36 = vadd.f32 %v4736_v5, %v4730_v23  ;;  %v4748_v46 = vmul.f32 %v4730_v23, %v4730_v23  ;;  %4704 = vadd.xlane.f32.xlu0 %v4703_v42 }
 0x6eb   : > { %v4749_v62 = vmul.f32 %v4731_v49, %v4731_v49  ;;  %v7084_v22 = vpop.f32.mrb[18].mxu1 }
 0x6ec   : > { %v4755_v25 = vadd.f32 %v4754_v16, %v4748_v46  ;;  %v4738_v13 = vadd.f32 %v4737_v36, %v4731_v49  ;;  %v4734_v57 = vmul.f32 %v4657_v60, %v7084_v22  ;;  %v7087_v47 = vpop.f32.mrb[19].mxu1 }
 0x6ed   : > { %v4735_v48 = vmul.f32 %v4661_v14, %v7087_v47 }
 0x6ee   : > { %v4756_v58 = vadd.f32 %v4755_v25, %v4749_v62  ;;  %v4739_v12 = vadd.f32 %v4738_v13, %v4732_v38  ;;  %v4752_v1 = vmul.f32 %v4734_v57, %v4734_v57 }
 0x6ef   : > { %v4753_v34 = vmul.f32 %v4735_v48, %v4735_v48  ;;  %v4742_v24 = vsel %vm2154_vm3, %v4735_v48, 0.0 }
 0x6f0   : > { %v4757_v37 = vadd.f32 %v4756_v58, %v4750_v44  ;;  %v4740_v0 = vadd.f32 %v4739_v12, %v4733_v30 }
 0x6f1   : > { %v4760_v9 = vsel %vm2154_vm3, %v4753_v34, 0.0 }
 0x6f2   : > { %v4758_v56 = vadd.f32 %v4757_v37, %v4751_v61  ;;  %v4741_v21 = vadd.f32 %v4740_v0, %v4734_v57 }
 0x6f4   : > { %v4759_v32 = vadd.f32 %v4758_v56, %v4752_v1  ;;  %v4743_v11 = vadd.f32 %v4742_v24, %v4741_v21 }
 0x6f6   : > { %4744 = vadd.xlane.f32.xlu1 %v4743_v11  ;;  %v4761_v55 = vadd.f32 %v4760_v9, %v4759_v32 }
 0x6f8   : > { %4762 = vadd.xlane.f32.xlu0 %v4761_v55 }
 0x773   : > { %v4687_v4 = vpop.xlane.xlu0 %4686 }
 0x774   : > { %v4706_v60 = vmul.f32 0.001953125, %v4687_v4 }
 0x776   : > { %v4708_v14 = vmul.f32 %v4706_v60, %v4706_v60  ;;  %v4710_v54 = vsub.f32 %v7017_v40, %v4706_v60  ;;  %v4711_v10 = vsub.f32 %v7021_v53, %v4706_v60  ;;  %v4712_v2 = vsub.f32 %v7033_v39, %v4706_v60 }
 0x777   : > { %v4705_v18 = vpop.xlane.xlu0 %4704  ;;  %v4713_v52 = vsub.f32 %v7038_v8, %v4706_v60  ;;  %v4714_v51 = vsub.f32 %v7046_v27, %v4706_v60  ;;  %v4715_v45 = vsub.f32 %v7049_v20, %v4706_v60  ;;  %v4716_v42 = vsub.f32 %v7062_v3, %v4706_v60 }
 0x778   : > { %v4707_v63 = vmul.f32 0.001953125, %v4705_v18  ;;  %v4717_v23 = vsub.f32 %v7067_v59, %v4706_v60 }
 0x77a   : > { %v4709_v19 = vsub.f32 %v4707_v63, %v4708_v14 }
 0x77c   : > { %v4718_v31 = vadd.f32 1e-05, %v4709_v19 }
 0x77e   : > { %4993 = vrsqrt.f32 %v4718_v31 }
 0x783   : > { %v4745_v33 = vpop.xlane.xlu1 %4744 }
 0x784   : > { %v4764_v5 = vmul.f32 0.001953125, %v4745_v33 }
 0x785   : > { %v4763_v41 = vpop.xlane.xlu0 %4762 }
 0x786   : > { %v4765_v29 = vmul.f32 0.001953125, %v4763_v41  ;;  %v4766_v43 = vmul.f32 %v4764_v5, %v4764_v5  ;;  %v4768_v38 = vsub.f32 %v7052_v6, %v4764_v5  ;;  %v4769_v49 = vsub.f32 %v7057_v50, %v4764_v5 }
 0x787   : > { %v4770_v40 = vsub.f32 %v7074_v17, %v4764_v5  ;;  %v4771_v53 = vsub.f32 %v7078_v26, %v4764_v5  ;;  %v4772_v39 = vsub.f32 %v7064_v15, %v4764_v5  ;;  %v4773_v8 = vsub.f32 %v7069_v7, %v4764_v5 }
 0x788   : > { %v4767_v16 = vsub.f32 %v4765_v29, %v4766_v43  ;;  %v4994_v28 = vpop.eup %4993  ;;  %v4774_v27 = vsub.f32 %v7084_v22, %v4764_v5  ;;  %v4775_v20 = vsub.f32 %v7087_v47, %v4764_v5 }
 0x789   : > { %v4720_v36 = vmul.f32 %v4994_v28, %v4710_v54  ;;  %v4721_v3 = vmul.f32 %v4994_v28, %v4711_v10  ;;  %v4722_v46 = vmul.f32 %v4994_v28, %v4712_v2  ;;  %v4723_v59 = vmul.f32 %v4994_v28, %v4713_v52 }
 0x78a   : > { %v4776_v35 = vadd.f32 1e-05, %v4767_v16  ;;  %v4724_v6 = vmul.f32 %v4994_v28, %v4714_v51  ;;  %v4725_v50 = vmul.f32 %v4994_v28, %v4715_v45  ;;  %v4726_v30 = vmul.f32 %v4994_v28, %v4716_v42 }
 0x78b   : > { %v4727_v17 = vmul.f32 %v4994_v28, %v4717_v23 }
 0x78c   : > { %4995 = vrsqrt.f32 %v4776_v35 }
 0x796   : > { %v4996_v62 = vpop.eup %4995 }
 0x797   : > { %v4778_v25 = vmul.f32 %v4996_v62, %v4768_v38  ;;  %v4779_v26 = vmul.f32 %v4996_v62, %v4769_v49  ;;  %v4780_v13 = vmul.f32 %v4996_v62, %v4770_v40  ;;  %v4781_v15 = vmul.f32 %v4996_v62, %v4771_v53 }
 0x798   : > { %v4782_v44 = vmul.f32 %v4996_v62, %v4772_v39  ;;  %v4783_v7 = vmul.f32 %v4996_v62, %v4773_v8  ;;  %v4784_v57 = vmul.f32 %v4996_v62, %v4774_v27  ;;  %v4785_v22 = vmul.f32 %v4996_v62, %v4775_v20 }
 0x799   : > { %v4786_v48 = vadd.f32 %v4778_v25, %v4720_v36  ;;  %v4787_v47 = vadd.f32 %v4779_v26, %v4721_v3  ;;  %v4788_v58 = vadd.f32 %v4780_v13, %v4722_v46  ;;  %v4789_v12 = vadd.f32 %v4781_v15, %v4723_v59 }
 0x79a   : > { %v4790_v34 = vadd.f32 %v4782_v44, %v4724_v6  ;;  %v4791_v37 = vadd.f32 %v4783_v7, %v4725_v50  ;;  %v4792_v0 = vadd.f32 %v4784_v57, %v4726_v30  ;;  %v4793_v61 = vadd.f32 %v4785_v22, %v4727_v17 }
 0x79b   : > { %vm4794_vm13 = vcmp.ge.f32.partialorder %v4786_v48, 0.0  ;;  %vm4795_vm14 = vcmp.ge.f32.partialorder %v4787_v47, 0.0  ;;  %vm4796_vm6 = vcmp.ge.f32.partialorder %v4788_v58, 0.0  ;;  %vm4797_vm15 = vcmp.ge.f32.partialorder %v4789_v12, 0.0 }
 0x79c   : > { %vm4798_vm0 = vcmp.ge.f32.partialorder %v4790_v34, 0.0  ;;  %vm4799_vm1 = vcmp.ge.f32.partialorder %v4791_v37, 0.0  ;;  %vm4800_vm9 = vcmp.ge.f32.partialorder %v4792_v0, 0.0  ;;  %vm4801_vm8 = vcmp.ge.f32.partialorder %v4793_v61, 0.0 }
 0x79d   : > { %v4802_v1 = vmul.f32 0.01, %v4786_v48  ;;  %v4803_v24 = vmul.f32 0.01, %v4787_v47  ;;  %v4804_v56 = vmul.f32 0.01, %v4788_v58 }
 0x79e   : > { %v4805_v21 = vmul.f32 0.01, %v4789_v12  ;;  %v4806_v9 = vmul.f32 0.01, %v4790_v34  ;;  %v4807_v32 = vmul.f32 0.01, %v4791_v37 }
 0x79f   : > { %v4808_v11 = vmul.f32 0.01, %v4792_v0  ;;  %v4809_v55 = vmul.f32 0.01, %v4793_v61  ;;  %v4810_v4 = vsel %vm4794_vm13, %v4786_v48, %v4802_v1  ;;  %v4811_v18 = vsel %vm4795_vm14, %v4787_v47, %v4803_v24 }
 0x7a0   : > { %v4812_v60 = vsel %vm4796_vm6, %v4788_v58, %v4804_v56  ;;  %v4813_v63 = vsel %vm4797_vm15, %v4789_v12, %v4805_v21  ;;  %v4814_v14 = vsel %vm4798_vm0, %v4790_v34, %v4806_v9  ;;  %v4815_v19 = vsel %vm4799_vm1, %v4791_v37, %v4807_v32  ;;  %4818 = vst [vmem:[%s251_s18] sm:$0xff] %v4810_v4 }
 0x7a1   : > { %4819 = vst [vmem:[%s251_s18 + $0x8] sm:$0xff] %v4811_v18  ;;  %v4816_v33 = vsel %vm4800_vm9, %v4792_v0, %v4808_v11  ;;  %v4817_v5 = vsel %vm4801_vm8, %v4793_v61, %v4809_v55  ;;  %4820 = vst [vmem:[%s251_s18 + $0x10] sm:$0xff] %v4812_v60 }
 0x7a2   : > { %4821 = vst [vmem:[%s251_s18 + $0x18] sm:$0xff] %v4813_v63  ;;  %4822 = vst [vmem:[%s251_s18 + $0x20] sm:$0xff] %v4814_v14 }
 0x7a3   : > { %4823 = vst [vmem:[%s251_s18 + $0x28] sm:$0xff] %v4815_v19  ;;  %4824 = vst [vmem:[%s251_s18 + $0x30] sm:$0xff] %v4816_v33 }
 0x7a4   : > { %4825 = vst.msk [vmem:[%s251_s18 + $0x38] sm:$0xff] %vm2154_vm3, %v4817_v5 }
 0x7a5 PF: > { %s16_s21 = sadd.s32 1, %s5011_s21  }
 0x7a6   : > { %p13_p4 = scmp.ge.s32.totalorder %s16_s21, 4  }
 0x7a8   :  { %15 = sbr.rel (!%p13_p4) target bundleno = 1 (0x1), region = 74 }

</bundles_post_ra>
